<compile_context>
chip_gen: v7x
topology: tpu7x:2x2x1
jax: 0.10.0
libtpu: 0.0.40
codegen_flags: <defaults>
</compile_context>

<pallas_src>
import jax
import jax.numpy as jnp
from jax.experimental import pallas as pl
from jax.experimental.pallas import tpu as pltpu

HIDDEN = 128
INPUT = 28
OUT = 10
OUT_PAD = 128   # lane-dense output width; sliced back to OUT in the wrapper


def _gates(gates, c):
    """PyTorch-ordered (i, f, g, o) LSTM gate math in f32."""
    H = HIDDEN
    i = jax.nn.sigmoid(gates[:, 0 * H:1 * H])
    f = jax.nn.sigmoid(gates[:, 1 * H:2 * H])
    g = jnp.tanh(gates[:, 2 * H:3 * H])
    o = jax.nn.sigmoid(gates[:, 3 * H:4 * H])
    c_new = f * c + i * g
    h_new = o * jnp.tanh(c_new)
    return h_new, c_new


def lstm_fc_kernel(x_ref, wih0_ref, b0_ref, wstack_ref, b1_ref,
                   fcw_ref, fcb_ref, out_ref, gates_ref):
    # x_ref:      (T*bB, I)    bf16, time-major inside the batch block
    # wih0_ref:   (I, 4H)      bf16
    # b0_ref:     (1, 4H)      f32  (b_ih0 + b_hh0)
    # wstack_ref: (2H, 8H)     bf16 [[Whh0^T, Wih1^T], [0, Whh1^T]]
    # b1_ref:     (1, 4H)      f32  (b_ih1 + b_hh1)
    # fcw_ref:    (H, OUT_PAD) bf16 (zero-padded beyond OUT)
    # fcb_ref:    (1, OUT_PAD) f32
    # out_ref:    (bB, OUT_PAD) f32
    # gates_ref:  (T*bB, 4H)   f32 VMEM scratch
    TB, _ = x_ref.shape
    bB = out_ref.shape[0]
    T = TB // bB
    H = HIDDEN

    wstack = wstack_ref[...]
    fcw = fcw_ref[...]
    # Hoist the (1,4H)->(bB,4H) bias broadcast out of the loop (no CSE in JAX).
    b1 = jnp.broadcast_to(b1_ref[...], (bB, 4 * H))

    # Hoisted layer-0 input projection: one MXU matmul for all timesteps,
    # bias folded, staged in VMEM scratch for aligned per-step reads.
    gates_ref[...] = (
        jnp.dot(x_ref[...], wih0_ref[...], preferred_element_type=jnp.float32)
        + b0_ref[...]
    )

    c1 = jnp.zeros((bB, H), jnp.float32)
    c2 = jnp.zeros((bB, H), jnp.float32)
    h2_bf = jnp.zeros((bB, H), jnp.bfloat16)

    # Prologue: layer-0 at t=0 (h1_{-1} = 0, so recurrent term vanishes).
    h1, c1 = _gates(gates_ref[pl.ds(0, bB), :], c1)

    # Software-pipelined recurrence, one MXU push per step:
    #   p[:, :4H] = h1_t @ Whh0                      -> layer-0 gates for t+1
    #   p[:, 4H:] = h1_t @ Wih1 + h2_{t-1} @ Whh1    -> layer-1 gates for t
    # Both gate evaluations depend only on p -> independent, overlap on EUP.
    # T is small & static: full Python unroll gives the LLO scheduler
    # cross-step visibility.
    for t in range(T):
        lhs = jnp.concatenate([h1.astype(jnp.bfloat16), h2_bf], axis=-1)
        p = jnp.dot(lhs, wstack, preferred_element_type=jnp.float32)
        # TODO(synk): nn.LSTM dropout=0.2 between layers is train-only; eval
        #             forward is identity, so nothing to apply here.
        h2, c2 = _gates(p[:, 4 * H:] + b1, c2)
        h2_bf = h2.astype(jnp.bfloat16)
        if t + 1 < T:
            g0 = gates_ref[pl.ds((t + 1) * bB, bB), :] + p[:, :4 * H]
            h1, c1 = _gates(g0, c1)

    # Final FC on the last layer-1 hidden state; OUT padded to 128 lanes so
    # the store is an unmasked, lane-dense vst.
    out_ref[...] = (
        jnp.dot(h2_bf, fcw, preferred_element_type=jnp.float32) + fcb_ref[...]
    )


def init_params(key):
    """Deterministic synthetic params matching nn.LSTM(28,128,2)+Linear(128,10),
    PyTorch layout, f32 (used directly by the pure-JAX reference)."""
    ks = jax.random.split(key, 10)
    s = 1.0 / jnp.sqrt(jnp.float32(HIDDEN))

    def u(k, shape):
        return jax.random.uniform(k, shape, jnp.float32, -s, s)

    return dict(
        w_ih0=u(ks[0], (4 * HIDDEN, INPUT)),
        w_hh0=u(ks[1], (4 * HIDDEN, HIDDEN)),
        b_ih0=u(ks[2], (4 * HIDDEN,)),
        b_hh0=u(ks[3], (4 * HIDDEN,)),
        w_ih1=u(ks[4], (4 * HIDDEN, HIDDEN)),
        w_hh1=u(ks[5], (4 * HIDDEN, HIDDEN)),
        b_ih1=u(ks[6], (4 * HIDDEN,)),
        b_hh1=u(ks[7], (4 * HIDDEN,)),
        fc_w=u(ks[8], (OUT, HIDDEN)),
        fc_b=u(ks[9], (OUT,)),
    )


def prepare_kernel_params(raw):
    """Kernel layout: pre-transposed, bias-folded, stacked recurrence weight,
    bf16 weights (host-side precast; biases stay f32), lane-dense padded FC."""
    H = HIDDEN
    wih0 = raw["w_ih0"].T.astype(jnp.bfloat16)                          # (I, 4H)
    b0 = (raw["b_ih0"] + raw["b_hh0"])[None, :]                         # (1, 4H)
    # [h1_t | h2_{t-1}] @ wstack = [h1_t@Whh0 | h1_t@Wih1 + h2_{t-1}@Whh1]
    top = jnp.concatenate([raw["w_hh0"].T, raw["w_ih1"].T], axis=1)     # (H, 8H)
    bot = jnp.concatenate([jnp.zeros((H, 4 * H), jnp.float32),
                           raw["w_hh1"].T], axis=1)                     # (H, 8H)
    wstack = jnp.concatenate([top, bot], axis=0).astype(jnp.bfloat16)   # (2H, 8H)
    b1 = (raw["b_ih1"] + raw["b_hh1"])[None, :]                         # (1, 4H)
    fcw = jnp.zeros((H, OUT_PAD), jnp.float32).at[:, :OUT].set(raw["fc_w"].T)
    fcb = jnp.zeros((1, OUT_PAD), jnp.float32).at[:, :OUT].set(raw["fc_b"][None, :])
    return dict(wih0=wih0, b0=b0, wstack=wstack, b1=b1,
                fcw=fcw.astype(jnp.bfloat16), fcb=fcb)


@jax.jit
def model_forward(x, kparams):
    # x: (B, 1, T, 28) -> squeeze(1) -> (B, T, 28)
    x = jnp.squeeze(x, axis=1).astype(jnp.float32)
    B, T, I = x.shape

    # Batch blocking: pad to 8 sublanes; for real batches use 256-row blocks so
    # the recurrent matmuls fill MXU rows and the "parallel" grid axis shards
    # blocks across v7x's two TensorCores.
    Bp8 = max(8, ((B + 7) // 8) * 8)
    if Bp8 >= 256:
        bB = 256
        Bp = ((Bp8 + bB - 1) // bB) * bB
    else:
        bB = Bp8
        Bp = Bp8
    nb = Bp // bB

    if Bp != B:
        x = jnp.pad(x, ((0, Bp - B), (0, 0), (0, 0)))

    # Block-local time-major layout: in block b, row t*bB + i <-> (t, b*bB + i).
    # Precast to bf16 (the MXU LHS is bf16 anyway); halves the input DMA.
    x_blk = (x.reshape(nb, bB, T, I)
               .transpose(0, 2, 1, 3)
               .reshape(nb, T * bB, I)
               .astype(jnp.bfloat16))

    operands = (x_blk, kparams["wih0"], kparams["b0"], kparams["wstack"],
                kparams["b1"], kparams["fcw"], kparams["fcb"])

    full2d = lambda a: pl.BlockSpec(a.shape, lambda b: (0, 0))

    out = pl.pallas_call(
        lstm_fc_kernel,
        out_shape=jax.ShapeDtypeStruct((Bp, OUT_PAD), jnp.float32),
        grid=(nb,),
        in_specs=[pl.BlockSpec((None, T * bB, I), lambda b: (b, 0, 0))]
                + [full2d(a) for a in operands[1:]],
        out_specs=pl.BlockSpec((bB, OUT_PAD), lambda b: (b, 0)),
        scratch_shapes=[pltpu.VMEM((T * bB, 4 * HIDDEN), jnp.float32)],
        compiler_params=pltpu.CompilerParams(
            dimension_semantics=("parallel",)),
    )(*operands)
    return out[:B, :OUT]


def _reference(x, raw):
    """Pure-JAX f32 reference mirroring nn.LSTM(2 layers, eval) + Linear."""
    x = jnp.squeeze(x, axis=1).astype(jnp.float32)
    B, T, _ = x.shape
    wih0 = raw["w_ih0"].T
    whh0 = raw["w_hh0"].T
    wih1 = raw["w_ih1"].T
    whh1 = raw["w_hh1"].T
    b0 = (raw["b_ih0"] + raw["b_hh0"])[None, :]
    b1 = (raw["b_ih1"] + raw["b_hh1"])[None, :]
    h1 = c1 = h2 = c2 = jnp.zeros((B, HIDDEN), jnp.float32)
    for t in range(T):
        g0 = x[:, t, :] @ wih0 + h1 @ whh0 + b0
        h1, c1 = _gates(g0, c1)
        # dropout=0.2 is train-only; eval forward is identity.
        g1 = h1 @ wih1 + h2 @ whh1 + b1
        h2, c2 = _gates(g1, c2)
    return h2 @ raw["fc_w"].T + raw["fc_b"][None, :]


if __name__ == "__main__":
    key = jax.random.PRNGKey(0)
    kx, kp = jax.random.split(key)

    B, T = 2, 8
    x = jax.random.normal(kx, (B, 1, T, INPUT), jnp.float32)
    raw = init_params(kp)
    kparams = prepare_kernel_params(raw)

    out = jax.block_until_ready(model_forward(x, kparams))
    ref = _reference(x, raw)

    assert out.shape == (B, OUT)
    # bf16 weights/activations on the MXU (f32 accumulation) drift slightly
    # from the pure-f32 reference; 3e-2 tolerance is the signed-off tradeoff.
    assert jnp.allclose(out, ref, atol=3e-2, rtol=3e-2), "mismatch vs reference"

    print("KERNEL_OK")
</pallas_src>

<mosaic_0001>
module attributes {stable_mosaic.version = 11 : i64} {
  func.func @lstm_fc_kernel(%arg0: i32, %arg1: memref<1x64x28xbf16, #tpu.memory_space<vmem>>, %arg2: memref<28x512xbf16, #tpu.memory_space<vmem>>, %arg3: memref<1x512xf32, #tpu.memory_space<vmem>>, %arg4: memref<256x1024xbf16, #tpu.memory_space<vmem>>, %arg5: memref<1x512xf32, #tpu.memory_space<vmem>>, %arg6: memref<128x128xbf16, #tpu.memory_space<vmem>>, %arg7: memref<1x128xf32, #tpu.memory_space<vmem>>, %arg8: memref<8x128xf32, #tpu.memory_space<vmem>>, %arg9: memref<64x512xf32, #tpu.memory_space<vmem>>) attributes {dimension_semantics = [#tpu.dimension_semantics<parallel>], iteration_bounds = array<i64: 1>, scalar_prefetch = 0 : i64, scratch_operands = 1 : i64, tpu.core_type = #tpu.core_type<tc>, window_params = [{transform_indices = @transform_0, window_bounds = array<i64: 1, 64, 28>}, {pipeline_mode = #tpu.pipeline_mode<synchronous>, transform_indices = @transform_1, window_bounds = array<i64: 28, 512>}, {pipeline_mode = #tpu.pipeline_mode<synchronous>, transform_indices = @transform_2, window_bounds = array<i64: 1, 512>}, {pipeline_mode = #tpu.pipeline_mode<synchronous>, transform_indices = @transform_3, window_bounds = array<i64: 256, 1024>}, {pipeline_mode = #tpu.pipeline_mode<synchronous>, transform_indices = @transform_4, window_bounds = array<i64: 1, 512>}, {pipeline_mode = #tpu.pipeline_mode<synchronous>, transform_indices = @transform_5, window_bounds = array<i64: 128, 128>}, {pipeline_mode = #tpu.pipeline_mode<synchronous>, transform_indices = @transform_6, window_bounds = array<i64: 1, 128>}, {transform_indices = @transform_7, window_bounds = array<i64: 8, 128>}]} {
    %c0 = arith.constant 0 : index
    %c0_0 = arith.constant 0 : index
    %0 = vector.load %arg4[%c0, %c0_0] : memref<256x1024xbf16, #tpu.memory_space<vmem>>, vector<256x1024xbf16>
    %c0_1 = arith.constant 0 : index
    %c0_2 = arith.constant 0 : index
    %1 = vector.load %arg6[%c0_1, %c0_2] : memref<128x128xbf16, #tpu.memory_space<vmem>>, vector<128x128xbf16>
    %c0_3 = arith.constant 0 : index
    %c0_4 = arith.constant 0 : index
    %2 = vector.load %arg5[%c0_3, %c0_4] : memref<1x512xf32, #tpu.memory_space<vmem>>, vector<1x512xf32>
    %3 = vector.shape_cast %2 : vector<1x512xf32> to vector<1x512xf32>
    %4 = vector.broadcast %3 : vector<1x512xf32> to vector<8x512xf32>
    %c0_5 = arith.constant 0 : index
    %c0_6 = arith.constant 0 : index
    %c0_7 = arith.constant 0 : index
    %5 = vector.load %arg1[%c0_5, %c0_6, %c0_7] : memref<1x64x28xbf16, #tpu.memory_space<vmem>>, vector<1x64x28xbf16>
    %6 = vector.shape_cast %5 : vector<1x64x28xbf16> to vector<64x28xbf16>
    %c0_8 = arith.constant 0 : index
    %c0_9 = arith.constant 0 : index
    %7 = vector.load %arg2[%c0_8, %c0_9] : memref<28x512xbf16, #tpu.memory_space<vmem>>, vector<28x512xbf16>
    %cst = arith.constant dense<0.000000e+00> : vector<64x512xf32>
    %8 = tpu.matmul %6, %7, %cst {dimension_numbers = #tpu.dot_dimension_numbers<[1], [0], [0], [1], [0, 0, 1, 1], [], []>} : vector<64x28xbf16>, vector<28x512xbf16>, vector<64x512xf32> -> vector<64x512xf32>
    %c0_10 = arith.constant 0 : index
    %c0_11 = arith.constant 0 : index
    %9 = vector.load %arg3[%c0_10, %c0_11] : memref<1x512xf32, #tpu.memory_space<vmem>>, vector<1x512xf32>
    %10 = vector.broadcast %9 : vector<1x512xf32> to vector<64x512xf32>
    %11 = arith.addf %8, %10 : vector<64x512xf32>
    %c0_12 = arith.constant 0 : index
    %c0_13 = arith.constant 0 : index
    %12 = vector.load %arg9[%c0_12, %c0_13] : memref<64x512xf32, #tpu.memory_space<vmem>>, vector<64x512xf32>
    tpu.vector_store %arg9[%c0_12, %c0_13], %11 {strides = array<i32>} : memref<64x512xf32, #tpu.memory_space<vmem>>, vector<64x512xf32>,
    %cst_14 = arith.constant 0.000000e+00 : f32
    %13 = vector.broadcast %cst_14 : f32 to vector<8x128xf32>
    %cst_15 = arith.constant 0.000000e+00 : f32
    %14 = vector.broadcast %cst_15 : f32 to vector<8x128xf32>
    %cst_16 = arith.constant 0.000000e+00 : bf16
    %15 = vector.broadcast %cst_16 : bf16 to vector<8x128xbf16>
    %c0_17 = arith.constant 0 : index
    %c0_18 = arith.constant 0 : index
    %16 = vector.load %arg9[%c0_17, %c0_18] : memref<64x512xf32, #tpu.memory_space<vmem>>, vector<8x512xf32>
    %17 = vector.extract_strided_slice %16 {offsets = [0, 0], sizes = [8, 128], strides = [1, 1]} : vector<8x512xf32> to vector<8x128xf32>
    %18 = arith.negf %17 : vector<8x128xf32>
    %19 = math.exp %18 : vector<8x128xf32>
    %cst_19 = arith.constant 1.000000e+00 : f32
    %20 = vector.broadcast %cst_19 : f32 to vector<8x128xf32>
    %21 = arith.addf %20, %19 : vector<8x128xf32>
    %22 = arith.divf %20, %21 : vector<8x128xf32>
    %23 = vector.extract_strided_slice %16 {offsets = [0, 128], sizes = [8, 128], strides = [1, 1]} : vector<8x512xf32> to vector<8x128xf32>
    %24 = arith.negf %23 : vector<8x128xf32>
    %25 = math.exp %24 : vector<8x128xf32>
    %cst_20 = arith.constant 1.000000e+00 : f32
    %26 = vector.broadcast %cst_20 : f32 to vector<8x128xf32>
    %27 = arith.addf %26, %25 : vector<8x128xf32>
    %28 = arith.divf %26, %27 : vector<8x128xf32>
    %29 = vector.extract_strided_slice %16 {offsets = [0, 256], sizes = [8, 128], strides = [1, 1]} : vector<8x512xf32> to vector<8x128xf32>
    %30 = math.tanh %29 : vector<8x128xf32>
    %31 = vector.extract_strided_slice %16 {offsets = [0, 384], sizes = [8, 128], strides = [1, 1]} : vector<8x512xf32> to vector<8x128xf32>
    %32 = arith.negf %31 : vector<8x128xf32>
    %33 = math.exp %32 : vector<8x128xf32>
    %cst_21 = arith.constant 1.000000e+00 : f32
    %34 = vector.broadcast %cst_21 : f32 to vector<8x128xf32>
    %35 = arith.addf %34, %33 : vector<8x128xf32>
    %36 = arith.divf %34, %35 : vector<8x128xf32>
    %37 = arith.mulf %28, %13 : vector<8x128xf32>
    %38 = arith.mulf %22, %30 : vector<8x128xf32>
    %39 = arith.addf %37, %38 : vector<8x128xf32>
    %40 = math.tanh %39 : vector<8x128xf32>
    %41 = arith.mulf %36, %40 : vector<8x128xf32>
    %42 = arith.truncf %41 : vector<8x128xf32> to vector<8x128xbf16>
    %43 = tpu.concatenate %42, %15 in 1 : vector<8x128xbf16>, vector<8x128xbf16> -> vector<8x256xbf16>
    %cst_22 = arith.constant dense<0.000000e+00> : vector<8x1024xf32>
    %44 = tpu.matmul %43, %0, %cst_22 {dimension_numbers = #tpu.dot_dimension_numbers<[1], [0], [0], [1], [0, 0, 1, 1], [], []>} : vector<8x256xbf16>, vector<256x1024xbf16>, vector<8x1024xf32> -> vector<8x1024xf32>
    %45 = vector.extract_strided_slice %44 {offsets = [0, 512], sizes = [8, 512], strides = [1, 1]} : vector<8x1024xf32> to vector<8x512xf32>
    %46 = arith.addf %45, %4 : vector<8x512xf32>
    %47 = vector.extract_strided_slice %46 {offsets = [0, 0], sizes = [8, 128], strides = [1, 1]} : vector<8x512xf32> to vector<8x128xf32>
    %48 = arith.negf %47 : vector<8x128xf32>
    %49 = math.exp %48 : vector<8x128xf32>
    %cst_23 = arith.constant 1.000000e+00 : f32
    %50 = vector.broadcast %cst_23 : f32 to vector<8x128xf32>
    %51 = arith.addf %50, %49 : vector<8x128xf32>
    %52 = arith.divf %50, %51 : vector<8x128xf32>
    %53 = vector.extract_strided_slice %46 {offsets = [0, 128], sizes = [8, 128], strides = [1, 1]} : vector<8x512xf32> to vector<8x128xf32>
    %54 = arith.negf %53 : vector<8x128xf32>
    %55 = math.exp %54 : vector<8x128xf32>
    %cst_24 = arith.constant 1.000000e+00 : f32
    %56 = vector.broadcast %cst_24 : f32 to vector<8x128xf32>
    %57 = arith.addf %56, %55 : vector<8x128xf32>
    %58 = arith.divf %56, %57 : vector<8x128xf32>
    %59 = vector.extract_strided_slice %46 {offsets = [0, 256], sizes = [8, 128], strides = [1, 1]} : vector<8x512xf32> to vector<8x128xf32>
    %60 = math.tanh %59 : vector<8x128xf32>
    %61 = vector.extract_strided_slice %46 {offsets = [0, 384], sizes = [8, 128], strides = [1, 1]} : vector<8x512xf32> to vector<8x128xf32>
    %62 = arith.negf %61 : vector<8x128xf32>
    %63 = math.exp %62 : vector<8x128xf32>
    %cst_25 = arith.constant 1.000000e+00 : f32
    %64 = vector.broadcast %cst_25 : f32 to vector<8x128xf32>
    %65 = arith.addf %64, %63 : vector<8x128xf32>
    %66 = arith.divf %64, %65 : vector<8x128xf32>
    %67 = arith.mulf %58, %14 : vector<8x128xf32>
    %68 = arith.mulf %52, %60 : vector<8x128xf32>
    %69 = arith.addf %67, %68 : vector<8x128xf32>
    %70 = math.tanh %69 : vector<8x128xf32>
    %71 = arith.mulf %66, %70 : vector<8x128xf32>
    %72 = arith.truncf %71 : vector<8x128xf32> to vector<8x128xbf16>
    %c8 = arith.constant 8 : index
    %c0_26 = arith.constant 0 : index
    %73 = vector.load %arg9[%c8, %c0_26] : memref<64x512xf32, #tpu.memory_space<vmem>>, vector<8x512xf32>
    %74 = vector.extract_strided_slice %44 {offsets = [0, 0], sizes = [8, 512], strides = [1, 1]} : vector<8x1024xf32> to vector<8x512xf32>
    %75 = arith.addf %73, %74 : vector<8x512xf32>
    %76 = vector.extract_strided_slice %75 {offsets = [0, 0], sizes = [8, 128], strides = [1, 1]} : vector<8x512xf32> to vector<8x128xf32>
    %77 = arith.negf %76 : vector<8x128xf32>
    %78 = math.exp %77 : vector<8x128xf32>
    %cst_27 = arith.constant 1.000000e+00 : f32
    %79 = vector.broadcast %cst_27 : f32 to vector<8x128xf32>
    %80 = arith.addf %79, %78 : vector<8x128xf32>
    %81 = arith.divf %79, %80 : vector<8x128xf32>
    %82 = vector.extract_strided_slice %75 {offsets = [0, 128], sizes = [8, 128], strides = [1, 1]} : vector<8x512xf32> to vector<8x128xf32>
    %83 = arith.negf %82 : vector<8x128xf32>
    %84 = math.exp %83 : vector<8x128xf32>
    %cst_28 = arith.constant 1.000000e+00 : f32
    %85 = vector.broadcast %cst_28 : f32 to vector<8x128xf32>
    %86 = arith.addf %85, %84 : vector<8x128xf32>
    %87 = arith.divf %85, %86 : vector<8x128xf32>
    %88 = vector.extract_strided_slice %75 {offsets = [0, 256], sizes = [8, 128], strides = [1, 1]} : vector<8x512xf32> to vector<8x128xf32>
    %89 = math.tanh %88 : vector<8x128xf32>
    %90 = vector.extract_strided_slice %75 {offsets = [0, 384], sizes = [8, 128], strides = [1, 1]} : vector<8x512xf32> to vector<8x128xf32>
    %91 = arith.negf %90 : vector<8x128xf32>
    %92 = math.exp %91 : vector<8x128xf32>
    %cst_29 = arith.constant 1.000000e+00 : f32
    %93 = vector.broadcast %cst_29 : f32 to vector<8x128xf32>
    %94 = arith.addf %93, %92 : vector<8x128xf32>
    %95 = arith.divf %93, %94 : vector<8x128xf32>
    %96 = arith.mulf %87, %39 : vector<8x128xf32>
    %97 = arith.mulf %81, %89 : vector<8x128xf32>
    %98 = arith.addf %96, %97 : vector<8x128xf32>
    %99 = math.tanh %98 : vector<8x128xf32>
    %100 = arith.mulf %95, %99 : vector<8x128xf32>
    %101 = arith.truncf %100 : vector<8x128xf32> to vector<8x128xbf16>
    %102 = tpu.concatenate %101, %72 in 1 : vector<8x128xbf16>, vector<8x128xbf16> -> vector<8x256xbf16>
    %cst_30 = arith.constant dense<0.000000e+00> : vector<8x1024xf32>
    %103 = tpu.matmul %102, %0, %cst_30 {dimension_numbers = #tpu.dot_dimension_numbers<[1], [0], [0], [1], [0, 0, 1, 1], [], []>} : vector<8x256xbf16>, vector<256x1024xbf16>, vector<8x1024xf32> -> vector<8x1024xf32>
    %104 = vector.extract_strided_slice %103 {offsets = [0, 512], sizes = [8, 512], strides = [1, 1]} : vector<8x1024xf32> to vector<8x512xf32>
    %105 = arith.addf %104, %4 : vector<8x512xf32>
    %106 = vector.extract_strided_slice %105 {offsets = [0, 0], sizes = [8, 128], strides = [1, 1]} : vector<8x512xf32> to vector<8x128xf32>
    %107 = arith.negf %106 : vector<8x128xf32>
    %108 = math.exp %107 : vector<8x128xf32>
    %cst_31 = arith.constant 1.000000e+00 : f32
    %109 = vector.broadcast %cst_31 : f32 to vector<8x128xf32>
    %110 = arith.addf %109, %108 : vector<8x128xf32>
    %111 = arith.divf %109, %110 : vector<8x128xf32>
    %112 = vector.extract_strided_slice %105 {offsets = [0, 128], sizes = [8, 128], strides = [1, 1]} : vector<8x512xf32> to vector<8x128xf32>
    %113 = arith.negf %112 : vector<8x128xf32>
    %114 = math.exp %113 : vector<8x128xf32>
    %cst_32 = arith.constant 1.000000e+00 : f32
    %115 = vector.broadcast %cst_32 : f32 to vector<8x128xf32>
    %116 = arith.addf %115, %114 : vector<8x128xf32>
    %117 = arith.divf %115, %116 : vector<8x128xf32>
    %118 = vector.extract_strided_slice %105 {offsets = [0, 256], sizes = [8, 128], strides = [1, 1]} : vector<8x512xf32> to vector<8x128xf32>
    %119 = math.tanh %118 : vector<8x128xf32>
    %120 = vector.extract_strided_slice %105 {offsets = [0, 384], sizes = [8, 128], strides = [1, 1]} : vector<8x512xf32> to vector<8x128xf32>
    %121 = arith.negf %120 : vector<8x128xf32>
    %122 = math.exp %121 : vector<8x128xf32>
    %cst_33 = arith.constant 1.000000e+00 : f32
    %123 = vector.broadcast %cst_33 : f32 to vector<8x128xf32>
    %124 = arith.addf %123, %122 : vector<8x128xf32>
    %125 = arith.divf %123, %124 : vector<8x128xf32>
    %126 = arith.mulf %117, %69 : vector<8x128xf32>
    %127 = arith.mulf %111, %119 : vector<8x128xf32>
    %128 = arith.addf %126, %127 : vector<8x128xf32>
    %129 = math.tanh %128 : vector<8x128xf32>
    %130 = arith.mulf %125, %129 : vector<8x128xf32>
    %131 = arith.truncf %130 : vector<8x128xf32> to vector<8x128xbf16>
    %c16 = arith.constant 16 : index
    %c0_34 = arith.constant 0 : index
    %132 = vector.load %arg9[%c16, %c0_34] : memref<64x512xf32, #tpu.memory_space<vmem>>, vector<8x512xf32>
    %133 = vector.extract_strided_slice %103 {offsets = [0, 0], sizes = [8, 512], strides = [1, 1]} : vector<8x1024xf32> to vector<8x512xf32>
    %134 = arith.addf %132, %133 : vector<8x512xf32>
    %135 = vector.extract_strided_slice %134 {offsets = [0, 0], sizes = [8, 128], strides = [1, 1]} : vector<8x512xf32> to vector<8x128xf32>
    %136 = arith.negf %135 : vector<8x128xf32>
    %137 = math.exp %136 : vector<8x128xf32>
    %cst_35 = arith.constant 1.000000e+00 : f32
    %138 = vector.broadcast %cst_35 : f32 to vector<8x128xf32>
    %139 = arith.addf %138, %137 : vector<8x128xf32>
    %140 = arith.divf %138, %139 : vector<8x128xf32>
    %141 = vector.extract_strided_slice %134 {offsets = [0, 128], sizes = [8, 128], strides = [1, 1]} : vector<8x512xf32> to vector<8x128xf32>
    %142 = arith.negf %141 : vector<8x128xf32>
    %143 = math.exp %142 : vector<8x128xf32>
    %cst_36 = arith.constant 1.000000e+00 : f32
    %144 = vector.broadcast %cst_36 : f32 to vector<8x128xf32>
    %145 = arith.addf %144, %143 : vector<8x128xf32>
    %146 = arith.divf %144, %145 : vector<8x128xf32>
    %147 = vector.extract_strided_slice %134 {offsets = [0, 256], sizes = [8, 128], strides = [1, 1]} : vector<8x512xf32> to vector<8x128xf32>
    %148 = math.tanh %147 : vector<8x128xf32>
    %149 = vector.extract_strided_slice %134 {offsets = [0, 384], sizes = [8, 128], strides = [1, 1]} : vector<8x512xf32> to vector<8x128xf32>
    %150 = arith.negf %149 : vector<8x128xf32>
    %151 = math.exp %150 : vector<8x128xf32>
    %cst_37 = arith.constant 1.000000e+00 : f32
    %152 = vector.broadcast %cst_37 : f32 to vector<8x128xf32>
    %153 = arith.addf %152, %151 : vector<8x128xf32>
    %154 = arith.divf %152, %153 : vector<8x128xf32>
    %155 = arith.mulf %146, %98 : vector<8x128xf32>
    %156 = arith.mulf %140, %148 : vector<8x128xf32>
    %157 = arith.addf %155, %156 : vector<8x128xf32>
    %158 = math.tanh %157 : vector<8x128xf32>
    %159 = arith.mulf %154, %158 : vector<8x128xf32>
    %160 = arith.truncf %159 : vector<8x128xf32> to vector<8x128xbf16>
    %161 = tpu.concatenate %160, %131 in 1 : vector<8x128xbf16>, vector<8x128xbf16> -> vector<8x256xbf16>
    %cst_38 = arith.constant dense<0.000000e+00> : vector<8x1024xf32>
    %162 = tpu.matmul %161, %0, %cst_38 {dimension_numbers = #tpu.dot_dimension_numbers<[1], [0], [0], [1], [0, 0, 1, 1], [], []>} : vector<8x256xbf16>, vector<256x1024xbf16>, vector<8x1024xf32> -> vector<8x1024xf32>
    %163 = vector.extract_strided_slice %162 {offsets = [0, 512], sizes = [8, 512], strides = [1, 1]} : vector<8x1024xf32> to vector<8x512xf32>
    %164 = arith.addf %163, %4 : vector<8x512xf32>
    %165 = vector.extract_strided_slice %164 {offsets = [0, 0], sizes = [8, 128], strides = [1, 1]} : vector<8x512xf32> to vector<8x128xf32>
    %166 = arith.negf %165 : vector<8x128xf32>
    %167 = math.exp %166 : vector<8x128xf32>
    %cst_39 = arith.constant 1.000000e+00 : f32
    %168 = vector.broadcast %cst_39 : f32 to vector<8x128xf32>
    %169 = arith.addf %168, %167 : vector<8x128xf32>
    %170 = arith.divf %168, %169 : vector<8x128xf32>
    %171 = vector.extract_strided_slice %164 {offsets = [0, 128], sizes = [8, 128], strides = [1, 1]} : vector<8x512xf32> to vector<8x128xf32>
    %172 = arith.negf %171 : vector<8x128xf32>
    %173 = math.exp %172 : vector<8x128xf32>
    %cst_40 = arith.constant 1.000000e+00 : f32
    %174 = vector.broadcast %cst_40 : f32 to vector<8x128xf32>
    %175 = arith.addf %174, %173 : vector<8x128xf32>
    %176 = arith.divf %174, %175 : vector<8x128xf32>
    %177 = vector.extract_strided_slice %164 {offsets = [0, 256], sizes = [8, 128], strides = [1, 1]} : vector<8x512xf32> to vector<8x128xf32>
    %178 = math.tanh %177 : vector<8x128xf32>
    %179 = vector.extract_strided_slice %164 {offsets = [0, 384], sizes = [8, 128], strides = [1, 1]} : vector<8x512xf32> to vector<8x128xf32>
    %180 = arith.negf %179 : vector<8x128xf32>
    %181 = math.exp %180 : vector<8x128xf32>
    %cst_41 = arith.constant 1.000000e+00 : f32
    %182 = vector.broadcast %cst_41 : f32 to vector<8x128xf32>
    %183 = arith.addf %182, %181 : vector<8x128xf32>
    %184 = arith.divf %182, %183 : vector<8x128xf32>
    %185 = arith.mulf %176, %128 : vector<8x128xf32>
    %186 = arith.mulf %170, %178 : vector<8x128xf32>
    %187 = arith.addf %185, %186 : vector<8x128xf32>
    %188 = math.tanh %187 : vector<8x128xf32>
    %189 = arith.mulf %184, %188 : vector<8x128xf32>
    %190 = arith.truncf %189 : vector<8x128xf32> to vector<8x128xbf16>
    %c24 = arith.constant 24 : index
    %c0_42 = arith.constant 0 : index
    %191 = vector.load %arg9[%c24, %c0_42] : memref<64x512xf32, #tpu.memory_space<vmem>>, vector<8x512xf32>
    %192 = vector.extract_strided_slice %162 {offsets = [0, 0], sizes = [8, 512], strides = [1, 1]} : vector<8x1024xf32> to vector<8x512xf32>
    %193 = arith.addf %191, %192 : vector<8x512xf32>
    %194 = vector.extract_strided_slice %193 {offsets = [0, 0], sizes = [8, 128], strides = [1, 1]} : vector<8x512xf32> to vector<8x128xf32>
    %195 = arith.negf %194 : vector<8x128xf32>
    %196 = math.exp %195 : vector<8x128xf32>
    %cst_43 = arith.constant 1.000000e+00 : f32
    %197 = vector.broadcast %cst_43 : f32 to vector<8x128xf32>
    %198 = arith.addf %197, %196 : vector<8x128xf32>
    %199 = arith.divf %197, %198 : vector<8x128xf32>
    %200 = vector.extract_strided_slice %193 {offsets = [0, 128], sizes = [8, 128], strides = [1, 1]} : vector<8x512xf32> to vector<8x128xf32>
    %201 = arith.negf %200 : vector<8x128xf32>
    %202 = math.exp %201 : vector<8x128xf32>
    %cst_44 = arith.constant 1.000000e+00 : f32
    %203 = vector.broadcast %cst_44 : f32 to vector<8x128xf32>
    %204 = arith.addf %203, %202 : vector<8x128xf32>
    %205 = arith.divf %203, %204 : vector<8x128xf32>
    %206 = vector.extract_strided_slice %193 {offsets = [0, 256], sizes = [8, 128], strides = [1, 1]} : vector<8x512xf32> to vector<8x128xf32>
    %207 = math.tanh %206 : vector<8x128xf32>
    %208 = vector.extract_strided_slice %193 {offsets = [0, 384], sizes = [8, 128], strides = [1, 1]} : vector<8x512xf32> to vector<8x128xf32>
    %209 = arith.negf %208 : vector<8x128xf32>
    %210 = math.exp %209 : vector<8x128xf32>
    %cst_45 = arith.constant 1.000000e+00 : f32
    %211 = vector.broadcast %cst_45 : f32 to vector<8x128xf32>
    %212 = arith.addf %211, %210 : vector<8x128xf32>
    %213 = arith.divf %211, %212 : vector<8x128xf32>
    %214 = arith.mulf %205, %157 : vector<8x128xf32>
    %215 = arith.mulf %199, %207 : vector<8x128xf32>
    %216 = arith.addf %214, %215 : vector<8x128xf32>
    %217 = math.tanh %216 : vector<8x128xf32>
    %218 = arith.mulf %213, %217 : vector<8x128xf32>
    %219 = arith.truncf %218 : vector<8x128xf32> to vector<8x128xbf16>
    %220 = tpu.concatenate %219, %190 in 1 : vector<8x128xbf16>, vector<8x128xbf16> -> vector<8x256xbf16>
    %cst_46 = arith.constant dense<0.000000e+00> : vector<8x1024xf32>
    %221 = tpu.matmul %220, %0, %cst_46 {dimension_numbers = #tpu.dot_dimension_numbers<[1], [0], [0], [1], [0, 0, 1, 1], [], []>} : vector<8x256xbf16>, vector<256x1024xbf16>, vector<8x1024xf32> -> vector<8x1024xf32>
    %222 = vector.extract_strided_slice %221 {offsets = [0, 512], sizes = [8, 512], strides = [1, 1]} : vector<8x1024xf32> to vector<8x512xf32>
    %223 = arith.addf %222, %4 : vector<8x512xf32>
    %224 = vector.extract_strided_slice %223 {offsets = [0, 0], sizes = [8, 128], strides = [1, 1]} : vector<8x512xf32> to vector<8x128xf32>
    %225 = arith.negf %224 : vector<8x128xf32>
    %226 = math.exp %225 : vector<8x128xf32>
    %cst_47 = arith.constant 1.000000e+00 : f32
    %227 = vector.broadcast %cst_47 : f32 to vector<8x128xf32>
    %228 = arith.addf %227, %226 : vector<8x128xf32>
    %229 = arith.divf %227, %228 : vector<8x128xf32>
    %230 = vector.extract_strided_slice %223 {offsets = [0, 128], sizes = [8, 128], strides = [1, 1]} : vector<8x512xf32> to vector<8x128xf32>
    %231 = arith.negf %230 : vector<8x128xf32>
    %232 = math.exp %231 : vector<8x128xf32>
    %cst_48 = arith.constant 1.000000e+00 : f32
    %233 = vector.broadcast %cst_48 : f32 to vector<8x128xf32>
    %234 = arith.addf %233, %232 : vector<8x128xf32>
    %235 = arith.divf %233, %234 : vector<8x128xf32>
    %236 = vector.extract_strided_slice %223 {offsets = [0, 256], sizes = [8, 128], strides = [1, 1]} : vector<8x512xf32> to vector<8x128xf32>
    %237 = math.tanh %236 : vector<8x128xf32>
    %238 = vector.extract_strided_slice %223 {offsets = [0, 384], sizes = [8, 128], strides = [1, 1]} : vector<8x512xf32> to vector<8x128xf32>
    %239 = arith.negf %238 : vector<8x128xf32>
    %240 = math.exp %239 : vector<8x128xf32>
    %cst_49 = arith.constant 1.000000e+00 : f32
    %241 = vector.broadcast %cst_49 : f32 to vector<8x128xf32>
    %242 = arith.addf %241, %240 : vector<8x128xf32>
    %243 = arith.divf %241, %242 : vector<8x128xf32>
    %244 = arith.mulf %235, %187 : vector<8x128xf32>
    %245 = arith.mulf %229, %237 : vector<8x128xf32>
    %246 = arith.addf %244, %245 : vector<8x128xf32>
    %247 = math.tanh %246 : vector<8x128xf32>
    %248 = arith.mulf %243, %247 : vector<8x128xf32>
    %249 = arith.truncf %248 : vector<8x128xf32> to vector<8x128xbf16>
    %c32 = arith.constant 32 : index
    %c0_50 = arith.constant 0 : index
    %250 = vector.load %arg9[%c32, %c0_50] : memref<64x512xf32, #tpu.memory_space<vmem>>, vector<8x512xf32>
    %251 = vector.extract_strided_slice %221 {offsets = [0, 0], sizes = [8, 512], strides = [1, 1]} : vector<8x1024xf32> to vector<8x512xf32>
    %252 = arith.addf %250, %251 : vector<8x512xf32>
    %253 = vector.extract_strided_slice %252 {offsets = [0, 0], sizes = [8, 128], strides = [1, 1]} : vector<8x512xf32> to vector<8x128xf32>
    %254 = arith.negf %253 : vector<8x128xf32>
    %255 = math.exp %254 : vector<8x128xf32>
    %cst_51 = arith.constant 1.000000e+00 : f32
    %256 = vector.broadcast %cst_51 : f32 to vector<8x128xf32>
    %257 = arith.addf %256, %255 : vector<8x128xf32>
    %258 = arith.divf %256, %257 : vector<8x128xf32>
    %259 = vector.extract_strided_slice %252 {offsets = [0, 128], sizes = [8, 128], strides = [1, 1]} : vector<8x512xf32> to vector<8x128xf32>
    %260 = arith.negf %259 : vector<8x128xf32>
    %261 = math.exp %260 : vector<8x128xf32>
    %cst_52 = arith.constant 1.000000e+00 : f32
    %262 = vector.broadcast %cst_52 : f32 to vector<8x128xf32>
    %263 = arith.addf %262, %261 : vector<8x128xf32>
    %264 = arith.divf %262, %263 : vector<8x128xf32>
    %265 = vector.extract_strided_slice %252 {offsets = [0, 256], sizes = [8, 128], strides = [1, 1]} : vector<8x512xf32> to vector<8x128xf32>
    %266 = math.tanh %265 : vector<8x128xf32>
    %267 = vector.extract_strided_slice %252 {offsets = [0, 384], sizes = [8, 128], strides = [1, 1]} : vector<8x512xf32> to vector<8x128xf32>
    %268 = arith.negf %267 : vector<8x128xf32>
    %269 = math.exp %268 : vector<8x128xf32>
    %cst_53 = arith.constant 1.000000e+00 : f32
    %270 = vector.broadcast %cst_53 : f32 to vector<8x128xf32>
    %271 = arith.addf %270, %269 : vector<8x128xf32>
    %272 = arith.divf %270, %271 : vector<8x128xf32>
    %273 = arith.mulf %264, %216 : vector<8x128xf32>
    %274 = arith.mulf %258, %266 : vector<8x128xf32>
    %275 = arith.addf %273, %274 : vector<8x128xf32>
    %276 = math.tanh %275 : vector<8x128xf32>
    %277 = arith.mulf %272, %276 : vector<8x128xf32>
    %278 = arith.truncf %277 : vector<8x128xf32> to vector<8x128xbf16>
    %279 = tpu.concatenate %278, %249 in 1 : vector<8x128xbf16>, vector<8x128xbf16> -> vector<8x256xbf16>
    %cst_54 = arith.constant dense<0.000000e+00> : vector<8x1024xf32>
    %280 = tpu.matmul %279, %0, %cst_54 {dimension_numbers = #tpu.dot_dimension_numbers<[1], [0], [0], [1], [0, 0, 1, 1], [], []>} : vector<8x256xbf16>, vector<256x1024xbf16>, vector<8x1024xf32> -> vector<8x1024xf32>
    %281 = vector.extract_strided_slice %280 {offsets = [0, 512], sizes = [8, 512], strides = [1, 1]} : vector<8x1024xf32> to vector<8x512xf32>
    %282 = arith.addf %281, %4 : vector<8x512xf32>
    %283 = vector.extract_strided_slice %282 {offsets = [0, 0], sizes = [8, 128], strides = [1, 1]} : vector<8x512xf32> to vector<8x128xf32>
    %284 = arith.negf %283 : vector<8x128xf32>
    %285 = math.exp %284 : vector<8x128xf32>
    %cst_55 = arith.constant 1.000000e+00 : f32
    %286 = vector.broadcast %cst_55 : f32 to vector<8x128xf32>
    %287 = arith.addf %286, %285 : vector<8x128xf32>
    %288 = arith.divf %286, %287 : vector<8x128xf32>
    %289 = vector.extract_strided_slice %282 {offsets = [0, 128], sizes = [8, 128], strides = [1, 1]} : vector<8x512xf32> to vector<8x128xf32>
    %290 = arith.negf %289 : vector<8x128xf32>
    %291 = math.exp %290 : vector<8x128xf32>
    %cst_56 = arith.constant 1.000000e+00 : f32
    %292 = vector.broadcast %cst_56 : f32 to vector<8x128xf32>
    %293 = arith.addf %292, %291 : vector<8x128xf32>
    %294 = arith.divf %292, %293 : vector<8x128xf32>
    %295 = vector.extract_strided_slice %282 {offsets = [0, 256], sizes = [8, 128], strides = [1, 1]} : vector<8x512xf32> to vector<8x128xf32>
    %296 = math.tanh %295 : vector<8x128xf32>
    %297 = vector.extract_strided_slice %282 {offsets = [0, 384], sizes = [8, 128], strides = [1, 1]} : vector<8x512xf32> to vector<8x128xf32>
    %298 = arith.negf %297 : vector<8x128xf32>
    %299 = math.exp %298 : vector<8x128xf32>
    %cst_57 = arith.constant 1.000000e+00 : f32
    %300 = vector.broadcast %cst_57 : f32 to vector<8x128xf32>
    %301 = arith.addf %300, %299 : vector<8x128xf32>
    %302 = arith.divf %300, %301 : vector<8x128xf32>
    %303 = arith.mulf %294, %246 : vector<8x128xf32>
    %304 = arith.mulf %288, %296 : vector<8x128xf32>
    %305 = arith.addf %303, %304 : vector<8x128xf32>
    %306 = math.tanh %305 : vector<8x128xf32>
    %307 = arith.mulf %302, %306 : vector<8x128xf32>
    %308 = arith.truncf %307 : vector<8x128xf32> to vector<8x128xbf16>
    %c40 = arith.constant 40 : index
    %c0_58 = arith.constant 0 : index
    %309 = vector.load %arg9[%c40, %c0_58] : memref<64x512xf32, #tpu.memory_space<vmem>>, vector<8x512xf32>
    %310 = vector.extract_strided_slice %280 {offsets = [0, 0], sizes = [8, 512], strides = [1, 1]} : vector<8x1024xf32> to vector<8x512xf32>
    %311 = arith.addf %309, %310 : vector<8x512xf32>
    %312 = vector.extract_strided_slice %311 {offsets = [0, 0], sizes = [8, 128], strides = [1, 1]} : vector<8x512xf32> to vector<8x128xf32>
    %313 = arith.negf %312 : vector<8x128xf32>
    %314 = math.exp %313 : vector<8x128xf32>
    %cst_59 = arith.constant 1.000000e+00 : f32
    %315 = vector.broadcast %cst_59 : f32 to vector<8x128xf32>
    %316 = arith.addf %315, %314 : vector<8x128xf32>
    %317 = arith.divf %315, %316 : vector<8x128xf32>
    %318 = vector.extract_strided_slice %311 {offsets = [0, 128], sizes = [8, 128], strides = [1, 1]} : vector<8x512xf32> to vector<8x128xf32>
    %319 = arith.negf %318 : vector<8x128xf32>
    %320 = math.exp %319 : vector<8x128xf32>
    %cst_60 = arith.constant 1.000000e+00 : f32
    %321 = vector.broadcast %cst_60 : f32 to vector<8x128xf32>
    %322 = arith.addf %321, %320 : vector<8x128xf32>
    %323 = arith.divf %321, %322 : vector<8x128xf32>
    %324 = vector.extract_strided_slice %311 {offsets = [0, 256], sizes = [8, 128], strides = [1, 1]} : vector<8x512xf32> to vector<8x128xf32>
    %325 = math.tanh %324 : vector<8x128xf32>
    %326 = vector.extract_strided_slice %311 {offsets = [0, 384], sizes = [8, 128], strides = [1, 1]} : vector<8x512xf32> to vector<8x128xf32>
    %327 = arith.negf %326 : vector<8x128xf32>
    %328 = math.exp %327 : vector<8x128xf32>
    %cst_61 = arith.constant 1.000000e+00 : f32
    %329 = vector.broadcast %cst_61 : f32 to vector<8x128xf32>
    %330 = arith.addf %329, %328 : vector<8x128xf32>
    %331 = arith.divf %329, %330 : vector<8x128xf32>
    %332 = arith.mulf %323, %275 : vector<8x128xf32>
    %333 = arith.mulf %317, %325 : vector<8x128xf32>
    %334 = arith.addf %332, %333 : vector<8x128xf32>
    %335 = math.tanh %334 : vector<8x128xf32>
    %336 = arith.mulf %331, %335 : vector<8x128xf32>
    %337 = arith.truncf %336 : vector<8x128xf32> to vector<8x128xbf16>
    %338 = tpu.concatenate %337, %308 in 1 : vector<8x128xbf16>, vector<8x128xbf16> -> vector<8x256xbf16>
    %cst_62 = arith.constant dense<0.000000e+00> : vector<8x1024xf32>
    %339 = tpu.matmul %338, %0, %cst_62 {dimension_numbers = #tpu.dot_dimension_numbers<[1], [0], [0], [1], [0, 0, 1, 1], [], []>} : vector<8x256xbf16>, vector<256x1024xbf16>, vector<8x1024xf32> -> vector<8x1024xf32>
    %340 = vector.extract_strided_slice %339 {offsets = [0, 512], sizes = [8, 512], strides = [1, 1]} : vector<8x1024xf32> to vector<8x512xf32>
    %341 = arith.addf %340, %4 : vector<8x512xf32>
    %342 = vector.extract_strided_slice %341 {offsets = [0, 0], sizes = [8, 128], strides = [1, 1]} : vector<8x512xf32> to vector<8x128xf32>
    %343 = arith.negf %342 : vector<8x128xf32>
    %344 = math.exp %343 : vector<8x128xf32>
    %cst_63 = arith.constant 1.000000e+00 : f32
    %345 = vector.broadcast %cst_63 : f32 to vector<8x128xf32>
    %346 = arith.addf %345, %344 : vector<8x128xf32>
    %347 = arith.divf %345, %346 : vector<8x128xf32>
    %348 = vector.extract_strided_slice %341 {offsets = [0, 128], sizes = [8, 128], strides = [1, 1]} : vector<8x512xf32> to vector<8x128xf32>
    %349 = arith.negf %348 : vector<8x128xf32>
    %350 = math.exp %349 : vector<8x128xf32>
    %cst_64 = arith.constant 1.000000e+00 : f32
    %351 = vector.broadcast %cst_64 : f32 to vector<8x128xf32>
    %352 = arith.addf %351, %350 : vector<8x128xf32>
    %353 = arith.divf %351, %352 : vector<8x128xf32>
    %354 = vector.extract_strided_slice %341 {offsets = [0, 256], sizes = [8, 128], strides = [1, 1]} : vector<8x512xf32> to vector<8x128xf32>
    %355 = math.tanh %354 : vector<8x128xf32>
    %356 = vector.extract_strided_slice %341 {offsets = [0, 384], sizes = [8, 128], strides = [1, 1]} : vector<8x512xf32> to vector<8x128xf32>
    %357 = arith.negf %356 : vector<8x128xf32>
    %358 = math.exp %357 : vector<8x128xf32>
    %cst_65 = arith.constant 1.000000e+00 : f32
    %359 = vector.broadcast %cst_65 : f32 to vector<8x128xf32>
    %360 = arith.addf %359, %358 : vector<8x128xf32>
    %361 = arith.divf %359, %360 : vector<8x128xf32>
    %362 = arith.mulf %353, %305 : vector<8x128xf32>
    %363 = arith.mulf %347, %355 : vector<8x128xf32>
    %364 = arith.addf %362, %363 : vector<8x128xf32>
    %365 = math.tanh %364 : vector<8x128xf32>
    %366 = arith.mulf %361, %365 : vector<8x128xf32>
    %367 = arith.truncf %366 : vector<8x128xf32> to vector<8x128xbf16>
    %c48 = arith.constant 48 : index
    %c0_66 = arith.constant 0 : index
    %368 = vector.load %arg9[%c48, %c0_66] : memref<64x512xf32, #tpu.memory_space<vmem>>, vector<8x512xf32>
    %369 = vector.extract_strided_slice %339 {offsets = [0, 0], sizes = [8, 512], strides = [1, 1]} : vector<8x1024xf32> to vector<8x512xf32>
    %370 = arith.addf %368, %369 : vector<8x512xf32>
    %371 = vector.extract_strided_slice %370 {offsets = [0, 0], sizes = [8, 128], strides = [1, 1]} : vector<8x512xf32> to vector<8x128xf32>
    %372 = arith.negf %371 : vector<8x128xf32>
    %373 = math.exp %372 : vector<8x128xf32>
    %cst_67 = arith.constant 1.000000e+00 : f32
    %374 = vector.broadcast %cst_67 : f32 to vector<8x128xf32>
    %375 = arith.addf %374, %373 : vector<8x128xf32>
    %376 = arith.divf %374, %375 : vector<8x128xf32>
    %377 = vector.extract_strided_slice %370 {offsets = [0, 128], sizes = [8, 128], strides = [1, 1]} : vector<8x512xf32> to vector<8x128xf32>
    %378 = arith.negf %377 : vector<8x128xf32>
    %379 = math.exp %378 : vector<8x128xf32>
    %cst_68 = arith.constant 1.000000e+00 : f32
    %380 = vector.broadcast %cst_68 : f32 to vector<8x128xf32>
    %381 = arith.addf %380, %379 : vector<8x128xf32>
    %382 = arith.divf %380, %381 : vector<8x128xf32>
    %383 = vector.extract_strided_slice %370 {offsets = [0, 256], sizes = [8, 128], strides = [1, 1]} : vector<8x512xf32> to vector<8x128xf32>
    %384 = math.tanh %383 : vector<8x128xf32>
    %385 = vector.extract_strided_slice %370 {offsets = [0, 384], sizes = [8, 128], strides = [1, 1]} : vector<8x512xf32> to vector<8x128xf32>
    %386 = arith.negf %385 : vector<8x128xf32>
    %387 = math.exp %386 : vector<8x128xf32>
    %cst_69 = arith.constant 1.000000e+00 : f32
    %388 = vector.broadcast %cst_69 : f32 to vector<8x128xf32>
    %389 = arith.addf %388, %387 : vector<8x128xf32>
    %390 = arith.divf %388, %389 : vector<8x128xf32>
    %391 = arith.mulf %382, %334 : vector<8x128xf32>
    %392 = arith.mulf %376, %384 : vector<8x128xf32>
    %393 = arith.addf %391, %392 : vector<8x128xf32>
    %394 = math.tanh %393 : vector<8x128xf32>
    %395 = arith.mulf %390, %394 : vector<8x128xf32>
    %396 = arith.truncf %395 : vector<8x128xf32> to vector<8x128xbf16>
    %397 = tpu.concatenate %396, %367 in 1 : vector<8x128xbf16>, vector<8x128xbf16> -> vector<8x256xbf16>
    %cst_70 = arith.constant dense<0.000000e+00> : vector<8x1024xf32>
    %398 = tpu.matmul %397, %0, %cst_70 {dimension_numbers = #tpu.dot_dimension_numbers<[1], [0], [0], [1], [0, 0, 1, 1], [], []>} : vector<8x256xbf16>, vector<256x1024xbf16>, vector<8x1024xf32> -> vector<8x1024xf32>
    %399 = vector.extract_strided_slice %398 {offsets = [0, 512], sizes = [8, 512], strides = [1, 1]} : vector<8x1024xf32> to vector<8x512xf32>
    %400 = arith.addf %399, %4 : vector<8x512xf32>
    %401 = vector.extract_strided_slice %400 {offsets = [0, 0], sizes = [8, 128], strides = [1, 1]} : vector<8x512xf32> to vector<8x128xf32>
    %402 = arith.negf %401 : vector<8x128xf32>
    %403 = math.exp %402 : vector<8x128xf32>
    %cst_71 = arith.constant 1.000000e+00 : f32
    %404 = vector.broadcast %cst_71 : f32 to vector<8x128xf32>
    %405 = arith.addf %404, %403 : vector<8x128xf32>
    %406 = arith.divf %404, %405 : vector<8x128xf32>
    %407 = vector.extract_strided_slice %400 {offsets = [0, 128], sizes = [8, 128], strides = [1, 1]} : vector<8x512xf32> to vector<8x128xf32>
    %408 = arith.negf %407 : vector<8x128xf32>
    %409 = math.exp %408 : vector<8x128xf32>
    %cst_72 = arith.constant 1.000000e+00 : f32
    %410 = vector.broadcast %cst_72 : f32 to vector<8x128xf32>
    %411 = arith.addf %410, %409 : vector<8x128xf32>
    %412 = arith.divf %410, %411 : vector<8x128xf32>
    %413 = vector.extract_strided_slice %400 {offsets = [0, 256], sizes = [8, 128], strides = [1, 1]} : vector<8x512xf32> to vector<8x128xf32>
    %414 = math.tanh %413 : vector<8x128xf32>
    %415 = vector.extract_strided_slice %400 {offsets = [0, 384], sizes = [8, 128], strides = [1, 1]} : vector<8x512xf32> to vector<8x128xf32>
    %416 = arith.negf %415 : vector<8x128xf32>
    %417 = math.exp %416 : vector<8x128xf32>
    %cst_73 = arith.constant 1.000000e+00 : f32
    %418 = vector.broadcast %cst_73 : f32 to vector<8x128xf32>
    %419 = arith.addf %418, %417 : vector<8x128xf32>
    %420 = arith.divf %418, %419 : vector<8x128xf32>
    %421 = arith.mulf %412, %364 : vector<8x128xf32>
    %422 = arith.mulf %406, %414 : vector<8x128xf32>
    %423 = arith.addf %421, %422 : vector<8x128xf32>
    %424 = math.tanh %423 : vector<8x128xf32>
    %425 = arith.mulf %420, %424 : vector<8x128xf32>
    %426 = arith.truncf %425 : vector<8x128xf32> to vector<8x128xbf16>
    %c56 = arith.constant 56 : index
    %c0_74 = arith.constant 0 : index
    %427 = vector.load %arg9[%c56, %c0_74] : memref<64x512xf32, #tpu.memory_space<vmem>>, vector<8x512xf32>
    %428 = vector.extract_strided_slice %398 {offsets = [0, 0], sizes = [8, 512], strides = [1, 1]} : vector<8x1024xf32> to vector<8x512xf32>
    %429 = arith.addf %427, %428 : vector<8x512xf32>
    %430 = vector.extract_strided_slice %429 {offsets = [0, 0], sizes = [8, 128], strides = [1, 1]} : vector<8x512xf32> to vector<8x128xf32>
    %431 = arith.negf %430 : vector<8x128xf32>
    %432 = math.exp %431 : vector<8x128xf32>
    %cst_75 = arith.constant 1.000000e+00 : f32
    %433 = vector.broadcast %cst_75 : f32 to vector<8x128xf32>
    %434 = arith.addf %433, %432 : vector<8x128xf32>
    %435 = arith.divf %433, %434 : vector<8x128xf32>
    %436 = vector.extract_strided_slice %429 {offsets = [0, 128], sizes = [8, 128], strides = [1, 1]} : vector<8x512xf32> to vector<8x128xf32>
    %437 = arith.negf %436 : vector<8x128xf32>
    %438 = math.exp %437 : vector<8x128xf32>
    %cst_76 = arith.constant 1.000000e+00 : f32
    %439 = vector.broadcast %cst_76 : f32 to vector<8x128xf32>
    %440 = arith.addf %439, %438 : vector<8x128xf32>
    %441 = arith.divf %439, %440 : vector<8x128xf32>
    %442 = vector.extract_strided_slice %429 {offsets = [0, 256], sizes = [8, 128], strides = [1, 1]} : vector<8x512xf32> to vector<8x128xf32>
    %443 = math.tanh %442 : vector<8x128xf32>
    %444 = vector.extract_strided_slice %429 {offsets = [0, 384], sizes = [8, 128], strides = [1, 1]} : vector<8x512xf32> to vector<8x128xf32>
    %445 = arith.negf %444 : vector<8x128xf32>
    %446 = math.exp %445 : vector<8x128xf32>
    %cst_77 = arith.constant 1.000000e+00 : f32
    %447 = vector.broadcast %cst_77 : f32 to vector<8x128xf32>
    %448 = arith.addf %447, %446 : vector<8x128xf32>
    %449 = arith.divf %447, %448 : vector<8x128xf32>
    %450 = arith.mulf %441, %393 : vector<8x128xf32>
    %451 = arith.mulf %435, %443 : vector<8x128xf32>
    %452 = arith.addf %450, %451 : vector<8x128xf32>
    %453 = math.tanh %452 : vector<8x128xf32>
    %454 = arith.mulf %449, %453 : vector<8x128xf32>
    %455 = arith.truncf %454 : vector<8x128xf32> to vector<8x128xbf16>
    %456 = tpu.concatenate %455, %426 in 1 : vector<8x128xbf16>, vector<8x128xbf16> -> vector<8x256xbf16>
    %cst_78 = arith.constant dense<0.000000e+00> : vector<8x1024xf32>
    %457 = tpu.matmul %456, %0, %cst_78 {dimension_numbers = #tpu.dot_dimension_numbers<[1], [0], [0], [1], [0, 0, 1, 1], [], []>} : vector<8x256xbf16>, vector<256x1024xbf16>, vector<8x1024xf32> -> vector<8x1024xf32>
    %458 = vector.extract_strided_slice %457 {offsets = [0, 512], sizes = [8, 512], strides = [1, 1]} : vector<8x1024xf32> to vector<8x512xf32>
    %459 = arith.addf %458, %4 : vector<8x512xf32>
    %460 = vector.extract_strided_slice %459 {offsets = [0, 0], sizes = [8, 128], strides = [1, 1]} : vector<8x512xf32> to vector<8x128xf32>
    %461 = arith.negf %460 : vector<8x128xf32>
    %462 = math.exp %461 : vector<8x128xf32>
    %cst_79 = arith.constant 1.000000e+00 : f32
    %463 = vector.broadcast %cst_79 : f32 to vector<8x128xf32>
    %464 = arith.addf %463, %462 : vector<8x128xf32>
    %465 = arith.divf %463, %464 : vector<8x128xf32>
    %466 = vector.extract_strided_slice %459 {offsets = [0, 128], sizes = [8, 128], strides = [1, 1]} : vector<8x512xf32> to vector<8x128xf32>
    %467 = arith.negf %466 : vector<8x128xf32>
    %468 = math.exp %467 : vector<8x128xf32>
    %cst_80 = arith.constant 1.000000e+00 : f32
    %469 = vector.broadcast %cst_80 : f32 to vector<8x128xf32>
    %470 = arith.addf %469, %468 : vector<8x128xf32>
    %471 = arith.divf %469, %470 : vector<8x128xf32>
    %472 = vector.extract_strided_slice %459 {offsets = [0, 256], sizes = [8, 128], strides = [1, 1]} : vector<8x512xf32> to vector<8x128xf32>
    %473 = math.tanh %472 : vector<8x128xf32>
    %474 = vector.extract_strided_slice %459 {offsets = [0, 384], sizes = [8, 128], strides = [1, 1]} : vector<8x512xf32> to vector<8x128xf32>
    %475 = arith.negf %474 : vector<8x128xf32>
    %476 = math.exp %475 : vector<8x128xf32>
    %cst_81 = arith.constant 1.000000e+00 : f32
    %477 = vector.broadcast %cst_81 : f32 to vector<8x128xf32>
    %478 = arith.addf %477, %476 : vector<8x128xf32>
    %479 = arith.divf %477, %478 : vector<8x128xf32>
    %480 = arith.mulf %471, %423 : vector<8x128xf32>
    %481 = arith.mulf %465, %473 : vector<8x128xf32>
    %482 = arith.addf %480, %481 : vector<8x128xf32>
    %483 = math.tanh %482 : vector<8x128xf32>
    %484 = arith.mulf %479, %483 : vector<8x128xf32>
    %485 = arith.truncf %484 : vector<8x128xf32> to vector<8x128xbf16>
    %cst_82 = arith.constant dense<0.000000e+00> : vector<8x128xf32>
    %486 = tpu.matmul %485, %1, %cst_82 {dimension_numbers = #tpu.dot_dimension_numbers<[1], [0], [0], [1], [0, 0, 1, 1], [], []>} : vector<8x128xbf16>, vector<128x128xbf16>, vector<8x128xf32> -> vector<8x128xf32>
    %c0_83 = arith.constant 0 : index
    %c0_84 = arith.constant 0 : index
    %487 = vector.load %arg7[%c0_83, %c0_84] : memref<1x128xf32, #tpu.memory_space<vmem>>, vector<1x128xf32>
    %488 = vector.broadcast %487 : vector<1x128xf32> to vector<8x128xf32>
    %489 = arith.addf %486, %488 : vector<8x128xf32>
    %c0_85 = arith.constant 0 : index
    %c0_86 = arith.constant 0 : index
    %490 = vector.load %arg8[%c0_85, %c0_86] : memref<8x128xf32, #tpu.memory_space<vmem>>, vector<8x128xf32>
    tpu.vector_store %arg8[%c0_85, %c0_86], %489 {strides = array<i32>} : memref<8x128xf32, #tpu.memory_space<vmem>>, vector<8x128xf32>,
    return
  }
  func.func @transform_0(%arg0: i32) -> (i32, i32, i32) {
    %c0_i32 = arith.constant 0 : i32
    %c0_i32_0 = arith.constant 0 : i32
    %c0_i32_1 = arith.constant 0 : i32
    return %arg0, %c0_i32, %c0_i32_0 : i32, i32, i32
  }
  func.func @transform_1(%arg0: i32) -> (i32, i32) {
    %c0_i32 = arith.constant 0 : i32
    %c0_i32_0 = arith.constant 0 : i32
    %c0_i32_1 = arith.constant 0 : i32
    return %c0_i32, %c0_i32_0 : i32, i32
  }
  func.func @transform_2(%arg0: i32) -> (i32, i32) {
    %c0_i32 = arith.constant 0 : i32
    %c0_i32_0 = arith.constant 0 : i32
    %c0_i32_1 = arith.constant 0 : i32
    return %c0_i32, %c0_i32_0 : i32, i32
  }
  func.func @transform_3(%arg0: i32) -> (i32, i32) {
    %c0_i32 = arith.constant 0 : i32
    %c0_i32_0 = arith.constant 0 : i32
    %c0_i32_1 = arith.constant 0 : i32
    return %c0_i32, %c0_i32_0 : i32, i32
  }
  func.func @transform_4(%arg0: i32) -> (i32, i32) {
    %c0_i32 = arith.constant 0 : i32
    %c0_i32_0 = arith.constant 0 : i32
    %c0_i32_1 = arith.constant 0 : i32
    return %c0_i32, %c0_i32_0 : i32, i32
  }
  func.func @transform_5(%arg0: i32) -> (i32, i32) {
    %c0_i32 = arith.constant 0 : i32
    %c0_i32_0 = arith.constant 0 : i32
    %c0_i32_1 = arith.constant 0 : i32
    return %c0_i32, %c0_i32_0 : i32, i32
  }
  func.func @transform_6(%arg0: i32) -> (i32, i32) {
    %c0_i32 = arith.constant 0 : i32
    %c0_i32_0 = arith.constant 0 : i32
    %c0_i32_1 = arith.constant 0 : i32
    return %c0_i32, %c0_i32_0 : i32, i32
  }
  func.func @transform_7(%arg0: i32) -> (i32, i32) {
    %c0_i32 = arith.constant 0 : i32
    %c0_i32_0 = arith.constant 0 : i32
    return %arg0, %c0_i32 : i32, i32
  }
}

</mosaic_0001>

<bundles_post_ra>
// kernel: model_forward.1
= control target key start
LH: loop header
LB: loop body
LE: loop exit
PB: predicated region body
PF: predicated region fallthrough
CT: control target
= control target key end

     0   :  { %12 = vsyncpa [#allocation4], 0  ;;  %s5223_s0 = inlined_call_operand.vmem [shape: bf16[1,64,28], index: 0, kind: input, shape index: {}]   ;;  %s5224_s1 = inlined_call_operand.vmem [shape: bf16[28,512], index: 1, kind: input, shape index: {}]   ;;  %s5225_s2 = inlined_call_operand.hbm [shape: f32[1,512], index: 2, kind: input, shape index: {}]   ;;  %s5226_s3 = inlined_call_operand.hbm [shape: bf16[256,1024], index: 3, kind: input, shape index: {}]   ;;  %s5227_s4 = inlined_call_operand.vmem [shape: f32[1,512], index: 4, kind: input, shape index: {}]   ;;  %s5228_s5 = inlined_call_operand.vmem [shape: bf16[128,128], index: 5, kind: input, shape index: {}]   ;;  %s5229_s6 = inlined_call_operand.vmem [shape: f32[1,128], index: 6, kind: input, shape index: {}]   ;;  %s5230_s7 = inlined_call_operand.vmem [shape: f32[8,128], index: 7, kind: output, shape index: {}]  }
   0x1   :  { %13 = vsyncpa [#allocation6], 0  ;;  %s3552_s24 = smov [#allocation3]   ;;  %s3553_s26 = smov [#allocation5]  }
   0x2   :  { %s24_s25 = sshll.u32 %s3552_s24, 4  ;;  %s33_s27 = sshll.u32 %s3553_s26, 4  ;;  %s25_s25 = int_to_ptr.vmem [resolvable:$true] %s24_s25  ;;  %s3599_s27 = int_to_ptr.vmem [resolvable:$true] %s33_s27 }
   0x3   :  { %s3504_s30 = scalar_lea.hbm %s5225_s2, 64 }
   0x4   :  { %p3505_p0 = scmp.ne.s32.totalorder %s5225_s2, %s3504_s30  ;;  %p3508_p1 = scmp.lt.u32.totalorder %s3504_s30, %s5225_s2 }
   0x6   :  { %p3510_p2 = pnand %p3508_p1, %p3505_p0 }
   0x8   :  { %3513 = shalt.err (!%p3510_p2)
}
   0x9   :  { %s3514_s12 = scalar_lea.vmem %s25_s25, 64  ;;  %p3519_p4 = scmp.lt.s32.totalorder %s25_s25, %s25_s25 }
   0xa   :  { %p3515_p3 = scmp.ne.s32.totalorder %s25_s25, %s3514_s12  ;;  %p3520_p5 = scmp.lt.s32.totalorder %s3514_s12, %s3514_s12 }
   0xc   :  { %p3521_p6 = por %p3520_p5, %p3519_p4 }
   0xe   :  { %p3522_p7 = pnand %p3521_p6, %p3515_p3 }
  0x10   :  { %3525 = shalt.err (!%p3522_p7)
}
  0x11   :  { %27 = dma.hbm_to_vmem [thread:$0]  %s5225_s2, 64, %s25_s25, [#allocation4]  }
  0x12   :  { %s3526_s17 = scalar_lea.hbm %s5226_s3, 16384 }
  0x13   :  { %p3527_p8 = scmp.ne.s32.totalorder %s5226_s3, %s3526_s17  ;;  %p3530_p9 = scmp.lt.u32.totalorder %s3526_s17, %s5226_s3 }
  0x15   :  { %p3532_p10 = pnand %p3530_p9, %p3527_p8 }
  0x17   :  { %3535 = shalt.err (!%p3532_p10)
}
  0x18   :  { %s3536_s22 = scalar_lea.vmem %s3599_s27, 16384  ;;  %p3541_p12 = scmp.lt.s32.totalorder %s3599_s27, %s3599_s27 }
  0x19   :  { %p3537_p11 = scmp.ne.s32.totalorder %s3599_s27, %s3536_s22  ;;  %p3542_p13 = scmp.lt.s32.totalorder %s3536_s22, %s3536_s22 }
  0x1b   :  { %p3543_p0 = por %p3542_p13, %p3541_p12 }
  0x1d   :  { %p3544_p1 = pnand %p3543_p0, %p3537_p11 }
  0x1f   :  { %3547 = shalt.err (!%p3544_p1)
}
  0x20   :  { %s3554_s2 = smov 512   ;;  %s3555_s23 = smov 32  }
  0x21   :  { %39 = dma.hbm_to_vmem [thread:$0]  %s5226_s3, 16384, %s3599_s27, [#allocation6], %s3554_s2, %s3554_s2, %s3555_s23  }
  0x22   :  { %3548 = dma.done.wait [#allocation4], 64  }
  0x23   :  { %3549 = vsyncadd [#allocation4], 4294967232 }
  0x24   :  { %3550 = dma.done.wait [#allocation6], 16384  }
  0x25   :  { %3551 = vsyncadd [#allocation6], 4294950912  ;;  %v5231_v0 = vmov 0   ;;  %v3224_v1 = vld [vmem:[%s5224_s1 + $0x4] ss:$16 sps:$4 sm:$0xff]   ;;  %vm326_vm0 = vcmask 1045504  }
  0x26   :  { %371 = vmatprep.mubr.bf16.mxu0 %v5231_v0  ;;  %444 = vmatprep.mubr.bf16.mxu1 %v5231_v0  ;;  %v3226_v2 = vld [vmem:[%s5224_s1] ss:$16 sps:$4 sm:$0xff]   ;;  %v3227_v3 = vld [vmem:[%s5224_s1 + $0x24] ss:$16 sps:$4 sm:$0x3f]   ;;  %vm313_vm1 = vcmask 228352  }
  0x27   :  { %339 = vmatprep.subr.bf16.mxu0 %v3224_v1  ;;  %v3229_v4 = vld [vmem:[%s5224_s1 + $0x20] ss:$16 sps:$4 sm:$0x3f]   ;;  %v3231_v7 = vld [vmem:[%s5224_s1 + $0xc] ss:$16 sps:$4 sm:$0xff]   ;;  %v53_v11 = vld [vmem:[#allocation5] sm:$0xff] }
  0x28   :  { %340 = vmatpush1.bf16.msra.mxu0 %v3226_v2  ;;  %v328_v5 = vsel %vm326_vm0, %v3229_v4, 0  ;;  %v3230_v6 = vld [vmem:[%s5223_s0] sm:$0xff]   ;;  %v3233_v8 = vld [vmem:[%s5224_s1 + $0x8] ss:$16 sps:$4 sm:$0xff]   ;;  %412 = vmatprep.subr.bf16.mxu1 %v3231_v7  ;;  %v54_v13 = vld [vmem:[#allocation5 + $0x8] sm:$0xff]  ;;  %vm3558_vm2 = vmmov 0  }
  0x29   :  { %2993 = vmatprep.subr.msk.bf16.mxu0 %vm326_vm0, %v3227_v3  ;;  %v3234_v9 = vld [vmem:[%s5224_s1 + $0x2c] ss:$16 sps:$4 sm:$0x3f]   ;;  %v3236_v10 = vld [vmem:[%s5224_s1 + $0x28] ss:$16 sps:$4 sm:$0x3f]   ;;  %413 = vmatpush1.bf16.msra.mxu1 %v3233_v8 }
  0x2a   :  { %v57_v12 = vld [vmem:[#allocation5 + $0x20] sm:$0xff]  ;;  %2998 = vmatprep.subr.msk.bf16.mxu1 %vm326_vm0, %v3234_v9  ;;  %v334_v14 = vsel %vm326_vm0, %v3236_v10, 0  ;;  %v58_v16 = vld [vmem:[#allocation5 + $0x28] sm:$0xff] }
  0x2b   :  { %v3663_v15 = vcombine.high %v53_v11, %v57_v12  ;;  %v3665_v17 = vcombine.low %v53_v11, %v57_v12  ;;  %v61_v18 = vld [vmem:[#allocation5 + $0x40] sm:$0xff]  ;;  %v3667_v20 = vcombine.high %v54_v13, %v58_v16  ;;  %v62_v22 = vld [vmem:[#allocation5 + $0x48] sm:$0xff]  ;;  %v3674_v26 = vcombine.low %v54_v13, %v58_v16 }
  0x2c   :  { %342 = vmatpush1.bf16.msra.mxu0 %v328_v5  ;;  %v65_v19 = vld [vmem:[#allocation5 + $0x60] sm:$0xff]  ;;  %v66_v23 = vld [vmem:[#allocation5 + $0x68] sm:$0xff] }
  0x2d   :  { %5531 = vst [vmem:[#allocation9_spill] sm:$0xff] %v3663_v15  ;;  %5532 = vst [vmem:[#allocation10_spill] sm:$0xff] %v3665_v17  ;;  %v3669_v21 = vcombine.high %v61_v18, %v65_v19  ;;  %v69_v24 = vld [vmem:[#allocation5 + $0x80] sm:$0xff]  ;;  %1186 = vmatprep.subr.bf16.mxu0 %v3663_v15  ;;  %415 = vmatpush1.bf16.msra.mxu1 %v334_v14  ;;  %v3676_v27 = vcombine.low %v61_v18, %v65_v19  ;;  %v70_v28 = vld [vmem:[#allocation5 + $0x88] sm:$0xff] }
  0x2e   :  { %5533 = vst [vmem:[#allocation11_spill] sm:$0xff] %v3667_v20  ;;  %v73_v25 = vld [vmem:[#allocation5 + $0xa0] sm:$0xff]  ;;  %5535 = vst [vmem:[#allocation13_spill] sm:$0xff] %v3674_v26  ;;  %v74_v29 = vld [vmem:[#allocation5 + $0xa8] sm:$0xff]  ;;  %1227 = vmatprep.subr.bf16.mxu1 %v3667_v20  ;;  %v3680_v30 = vcombine.high %v62_v22, %v66_v23  ;;  %v3688_v34 = vcombine.low %v62_v22, %v66_v23 }
  0x2f   :  { %5534 = vst [vmem:[#allocation12_spill] sm:$0xff] %v3669_v21  ;;  %2994 = vmatmul.mubr.msk.bf16.vlgmr.msra.gmra.mrb[0].mxu0 %vm313_vm1, %v3230_v6  ;;  %5536 = vst [vmem:[#allocation14_spill] sm:$0xff] %v3676_v27  ;;  %v3682_v31 = vcombine.high %v69_v24, %v73_v25  ;;  %v77_v32 = vld [vmem:[#allocation5 + $0xc0] sm:$0xff]  ;;  %v3690_v35 = vcombine.low %v69_v24, %v73_v25  ;;  %v78_v36 = vld [vmem:[#allocation5 + $0xc8] sm:$0xff]  ;;  %v3694_v38 = vcombine.high %v70_v28, %v74_v29 }
  0x30   :  { %1187 = vmatpush1.bf16.msra.mxu0 %v3665_v17  ;;  %5537 = vst [vmem:[#allocation15_spill] sm:$0xff] %v3680_v30  ;;  %v81_v33 = vld [vmem:[#allocation5 + $0xe0] sm:$0xff]  ;;  %381 = vmatprep.mubr.bf16.mxu0 %v5231_v0  ;;  %5539 = vst [vmem:[#allocation17_spill] sm:$0xff] %v3688_v34  ;;  %v82_v37 = vld [vmem:[#allocation5 + $0xe8] sm:$0xff]  ;;  %v3701_v40 = vcombine.low %v70_v28, %v74_v29 }
  0x31   :  { %1188 = vmatprep.subr.bf16.mxu0 %v3669_v21  ;;  %5538 = vst [vmem:[#allocation16_spill] sm:$0xff] %v3682_v31  ;;  %2999 = vmatmul.mubr.msk.bf16.vlgmr.msra.gmra.mrb[0].mxu1 %vm313_vm1, %v3230_v6  ;;  %5540 = vst [vmem:[#allocation18_spill] sm:$0xff] %v3690_v35  ;;  %v3696_v39 = vcombine.high %v77_v32, %v81_v33  ;;  %v3703_v41 = vcombine.low %v77_v32, %v81_v33  ;;  %v85_v44 = vld [vmem:[#allocation5 + $0x100] sm:$0xff]  ;;  %v86_v46 = vld [vmem:[#allocation5 + $0x108] sm:$0xff] }
  0x32   :  { %1228 = vmatpush1.bf16.msra.mxu1 %v3674_v26  ;;  %5541 = vst [vmem:[#allocation19_spill] sm:$0xff] %v3694_v38  ;;  %454 = vmatprep.mubr.bf16.mxu1 %v5231_v0  ;;  %5543 = vst [vmem:[#allocation21_spill] sm:$0xff] %v3701_v40  ;;  %v3707_v42 = vcombine.high %v78_v36, %v82_v37  ;;  %v3711_v43 = vcombine.low %v78_v36, %v82_v37  ;;  %v89_v45 = vld [vmem:[#allocation5 + $0x120] sm:$0xff]  ;;  %v90_v48 = vld [vmem:[#allocation5 + $0x128] sm:$0xff] }
  0x33   :  { %1229 = vmatprep.subr.bf16.mxu1 %v3680_v30  ;;  %5542 = vst [vmem:[#allocation20_spill] sm:$0xff] %v3696_v39  ;;  %5544 = vst [vmem:[#allocation22_spill] sm:$0xff] %v3703_v41  ;;  %v3715_v47 = vcombine.high %v85_v44, %v89_v45  ;;  %v3717_v49 = vcombine.high %v86_v46, %v90_v48  ;;  %v3719_v50 = vcombine.low %v85_v44, %v89_v45  ;;  %v93_v52 = vld [vmem:[#allocation5 + $0x140] sm:$0xff]  ;;  %v94_v54 = vld [vmem:[#allocation5 + $0x148] sm:$0xff] }
  0x34   :  { %1189 = vmatpush1.bf16.msra.mxu0 %v3676_v27  ;;  %5545 = vst [vmem:[#allocation23_spill] sm:$0xff] %v3707_v42  ;;  %5546 = vst [vmem:[#allocation24_spill] sm:$0xff] %v3711_v43  ;;  %v3721_v51 = vcombine.low %v86_v46, %v90_v48  ;;  %v97_v53 = vld [vmem:[#allocation5 + $0x160] sm:$0xff]  ;;  %v98_v56 = vld [vmem:[#allocation5 + $0x168] sm:$0xff] }
  0x35   :  { %1190 = vmatprep.subr.bf16.mxu0 %v3682_v31  ;;  %5547 = vst [vmem:[#allocation25_spill] sm:$0xff] %v3715_v47  ;;  %5548 = vst [vmem:[#allocation26_spill] sm:$0xff] %v3717_v49  ;;  %v3727_v55 = vcombine.high %v93_v52, %v97_v53  ;;  %v3729_v57 = vcombine.high %v94_v54, %v98_v56  ;;  %v3731_v58 = vcombine.low %v93_v52, %v97_v53  ;;  %v101_v60 = vld [vmem:[#allocation5 + $0x180] sm:$0xff]  ;;  %v102_v62 = vld [vmem:[#allocation5 + $0x188] sm:$0xff] }
  0x36   :  { %1230 = vmatpush1.bf16.msra.mxu1 %v3688_v34  ;;  %5549 = vst [vmem:[#allocation27_spill] sm:$0xff] %v3719_v50  ;;  %5550 = vst [vmem:[#allocation28_spill] sm:$0xff] %v3721_v51  ;;  %v3733_v59 = vcombine.low %v94_v54, %v98_v56  ;;  %v105_v61 = vld [vmem:[#allocation5 + $0x1a0] sm:$0xff]  ;;  %v106_v1 = vld [vmem:[#allocation5 + $0x1a8] sm:$0xff] }
  0x37   :  { %1231 = vmatprep.subr.bf16.mxu1 %v3694_v38  ;;  %5551 = vst [vmem:[#allocation29_spill] sm:$0xff] %v3727_v55  ;;  %5552 = vst [vmem:[#allocation30_spill] sm:$0xff] %v3729_v57  ;;  %v3739_v63 = vcombine.high %v101_v60, %v105_v61  ;;  %v3741_v2 = vcombine.high %v102_v62, %v106_v1  ;;  %v3743_v3 = vcombine.low %v101_v60, %v105_v61  ;;  %v109_v5 = vld [vmem:[#allocation5 + $0x1c0] sm:$0xff]  ;;  %v110_v7 = vld [vmem:[#allocation5 + $0x1c8] sm:$0xff] }
  0x38   :  { %1191 = vmatpush1.bf16.msra.mxu0 %v3690_v35  ;;  %5553 = vst [vmem:[#allocation31_spill] sm:$0xff] %v3731_v58  ;;  %5554 = vst [vmem:[#allocation32_spill] sm:$0xff] %v3733_v59  ;;  %v3745_v4 = vcombine.low %v102_v62, %v106_v1  ;;  %v113_v6 = vld [vmem:[#allocation5 + $0x1e0] sm:$0xff]  ;;  %v114_v9 = vld [vmem:[#allocation5 + $0x1e8] sm:$0xff] }
  0x39   :  { %1192 = vmatprep.subr.bf16.mxu0 %v3696_v39  ;;  %5555 = vst [vmem:[#allocation33_spill] sm:$0xff] %v3739_v63  ;;  %5556 = vst [vmem:[#allocation34_spill] sm:$0xff] %v3741_v2  ;;  %v3751_v8 = vcombine.high %v109_v5, %v113_v6  ;;  %v3753_v10 = vcombine.high %v110_v7, %v114_v9  ;;  %v3755_v11 = vcombine.low %v109_v5, %v113_v6  ;;  %v117_v13 = vld [vmem:[#allocation5 + $0x200] sm:$0xff]  ;;  %v118_v16 = vld [vmem:[#allocation5 + $0x208] sm:$0xff] }
  0x3a   :  { %1232 = vmatpush1.bf16.msra.mxu1 %v3701_v40  ;;  %5557 = vst [vmem:[#allocation35_spill] sm:$0xff] %v3743_v3  ;;  %5558 = vst [vmem:[#allocation36_spill] sm:$0xff] %v3745_v4  ;;  %v3757_v12 = vcombine.low %v110_v7, %v114_v9  ;;  %v121_v14 = vld [vmem:[#allocation5 + $0x220] sm:$0xff]  ;;  %v122_v19 = vld [vmem:[#allocation5 + $0x228] sm:$0xff] }
  0x3b   :  { %1233 = vmatprep.subr.bf16.mxu1 %v3707_v42  ;;  %5559 = vst [vmem:[#allocation37_spill] sm:$0xff] %v3751_v8  ;;  %5560 = vst [vmem:[#allocation38_spill] sm:$0xff] %v3753_v10  ;;  %v3763_v18 = vcombine.high %v117_v13, %v121_v14  ;;  %v3765_v22 = vcombine.high %v118_v16, %v122_v19  ;;  %v3767_v23 = vcombine.low %v117_v13, %v121_v14  ;;  %v125_v25 = vld [vmem:[#allocation5 + $0x240] sm:$0xff]  ;;  %v126_v29 = vld [vmem:[#allocation5 + $0x248] sm:$0xff] }
  0x3c   :  { %1193 = vmatpush1.bf16.msra.mxu0 %v3703_v41  ;;  %5561 = vst [vmem:[#allocation39_spill] sm:$0xff] %v3755_v11  ;;  %5562 = vst [vmem:[#allocation40_spill] sm:$0xff] %v3757_v12  ;;  %v3769_v24 = vcombine.low %v118_v16, %v122_v19  ;;  %v129_v28 = vld [vmem:[#allocation5 + $0x260] sm:$0xff]  ;;  %v130_v33 = vld [vmem:[#allocation5 + $0x268] sm:$0xff] }
  0x3d   :  { %1194 = vmatprep.subr.bf16.mxu0 %v3715_v47  ;;  %5563 = vst [vmem:[#allocation41_spill] sm:$0xff] %v3763_v18  ;;  %5564 = vst [vmem:[#allocation42_spill] sm:$0xff] %v3765_v22  ;;  %v3775_v32 = vcombine.high %v125_v25, %v129_v28  ;;  %v3777_v36 = vcombine.high %v126_v29, %v130_v33  ;;  %v3779_v37 = vcombine.low %v125_v25, %v129_v28  ;;  %v3237_v45 = vld [vmem:[%s5223_s0 + $0x8] sm:$0xff]   ;;  %v3238_v16 = vld [vmem:[%s5223_s0 + $0x10] sm:$0xff]  }
  0x3e   :  { %1234 = vmatpush1.bf16.msra.mxu1 %v3711_v43  ;;  %5565 = vst [vmem:[#allocation43_spill] sm:$0xff] %v3767_v23  ;;  %5566 = vst [vmem:[#allocation44_spill] sm:$0xff] %v3769_v24  ;;  %v3781_v44 = vcombine.low %v126_v29, %v130_v33  ;;  %v133_v46 = vld [vmem:[#allocation5 + $0x280] sm:$0xff]  ;;  %v134_v52 = vld [vmem:[#allocation5 + $0x288] sm:$0xff]  ;;  %2995 = vmatmul.mubr.msk.bf16.gmra.mrb[4].mxu0 %vm313_vm1, %v3237_v45 }
  0x3f   :  { %1235 = vmatprep.subr.bf16.mxu1 %v3717_v49  ;;  %5567 = vst [vmem:[#allocation45_spill] sm:$0xff] %v3775_v32  ;;  %5568 = vst [vmem:[#allocation46_spill] sm:$0xff] %v3777_v36  ;;  %v137_v48 = vld [vmem:[#allocation5 + $0x2a0] sm:$0xff]  ;;  %v138_v54 = vld [vmem:[#allocation5 + $0x2a8] sm:$0xff]  ;;  %3000 = vmatmul.mubr.msk.bf16.gmra.mrb[4].mxu1 %vm313_vm1, %v3237_v45 }
  0x40   :  { %1195 = vmatpush1.bf16.msra.mxu0 %v3719_v50  ;;  %5569 = vst [vmem:[#allocation47_spill] sm:$0xff] %v3779_v37  ;;  %5570 = vst [vmem:[#allocation48_spill] sm:$0xff] %v3781_v44  ;;  %v3791_v53 = vcombine.high %v133_v46, %v137_v48  ;;  %v3793_v56 = vcombine.high %v134_v52, %v138_v54  ;;  %v3796_v60 = vcombine.low %v133_v46, %v137_v48  ;;  %v141_v62 = vld [vmem:[#allocation5 + $0x2c0] sm:$0xff]  ;;  %v142_v5 = vld [vmem:[#allocation5 + $0x2c8] sm:$0xff] }
  0x41   :  { %1196 = vmatprep.subr.bf16.mxu0 %v3727_v55  ;;  %v3798_v61 = vcombine.low %v134_v52, %v138_v54  ;;  %391 = vmatprep.mubr.bf16.mxu0 %v5231_v0  ;;  %v145_v1 = vld [vmem:[#allocation5 + $0x2e0] sm:$0xff]  ;;  %v146_v7 = vld [vmem:[#allocation5 + $0x2e8] sm:$0xff] }
  0x42   :  { %1236 = vmatpush1.bf16.msra.mxu1 %v3721_v51  ;;  %5571 = vst [vmem:[#allocation49_spill] sm:$0xff] %v3791_v53  ;;  %5572 = vst [vmem:[#allocation50_spill] sm:$0xff] %v3793_v56  ;;  %464 = vmatprep.mubr.bf16.mxu1 %v5231_v0  ;;  %v3806_v6 = vcombine.high %v141_v62, %v145_v1  ;;  %v3808_v9 = vcombine.high %v142_v5, %v146_v7  ;;  %v149_v19 = vld [vmem:[#allocation5 + $0x300] sm:$0xff]  ;;  %v150_v28 = vld [vmem:[#allocation5 + $0x308] sm:$0xff] }
  0x43   :  { %1237 = vmatprep.subr.bf16.mxu1 %v3729_v57  ;;  %5573 = vst [vmem:[#allocation51_spill] sm:$0xff] %v3796_v60  ;;  %5574 = vst [vmem:[#allocation52_spill] sm:$0xff] %v3798_v61  ;;  %v3810_v13 = vcombine.low %v141_v62, %v145_v1  ;;  %v3812_v14 = vcombine.low %v142_v5, %v146_v7  ;;  %v153_v25 = vld [vmem:[#allocation5 + $0x320] sm:$0xff]  ;;  %v154_v33 = vld [vmem:[#allocation5 + $0x328] sm:$0xff] }
  0x44   :  { %1197 = vmatpush1.bf16.msra.mxu0 %v3731_v58  ;;  %5575 = vst [vmem:[#allocation53_spill] sm:$0xff] %v3806_v6  ;;  %5576 = vst [vmem:[#allocation54_spill] sm:$0xff] %v3808_v9  ;;  %v3822_v29 = vcombine.high %v149_v19, %v153_v25  ;;  %v3824_v45 = vcombine.high %v150_v28, %v154_v33  ;;  %v3827_v46 = vcombine.low %v149_v19, %v153_v25  ;;  %v157_v52 = vld [vmem:[#allocation5 + $0x340] sm:$0xff]  ;;  %v158_v62 = vld [vmem:[#allocation5 + $0x348] sm:$0xff] }
  0x45   :  { %1198 = vmatprep.subr.bf16.mxu0 %v3739_v63  ;;  %5577 = vst [vmem:[#allocation55_spill] sm:$0xff] %v3810_v13  ;;  %5578 = vst [vmem:[#allocation56_spill] sm:$0xff] %v3812_v14  ;;  %v3829_v48 = vcombine.low %v150_v28, %v154_v33  ;;  %v161_v54 = vld [vmem:[#allocation5 + $0x360] sm:$0xff]  ;;  %v162_v5 = vld [vmem:[#allocation5 + $0x368] sm:$0xff] }
  0x46   :  { %1238 = vmatpush1.bf16.msra.mxu1 %v3733_v59  ;;  %2996 = vmatmul.mubr.msk.bf16.gmra.mrb[8].mxu0 %vm313_vm1, %v3238_v16  ;;  %5579 = vst [vmem:[#allocation57_spill] sm:$0xff] %v3822_v29  ;;  %5580 = vst [vmem:[#allocation58_spill] sm:$0xff] %v3824_v45  ;;  %v3837_v1 = vcombine.high %v157_v52, %v161_v54  ;;  %v3839_v7 = vcombine.low %v157_v52, %v161_v54  ;;  %v165_v19 = vld [vmem:[#allocation5 + $0x380] sm:$0xff] }
  0x47   :  { %1239 = vmatprep.subr.bf16.mxu1 %v3741_v2  ;;  %3001 = vmatmul.mubr.msk.bf16.gmra.mrb[8].mxu1 %vm313_vm1, %v3238_v16  ;;  %5581 = vst [vmem:[#allocation59_spill] sm:$0xff] %v3827_v46  ;;  %5582 = vst [vmem:[#allocation60_spill] sm:$0xff] %v3829_v48  ;;  %v3239_v16 = vld [vmem:[%s5223_s0 + $0x18] sm:$0xff]   ;;  %v3844_v25 = vcombine.high %v158_v62, %v162_v5  ;;  %v3846_v28 = vcombine.low %v158_v62, %v162_v5  ;;  %v169_v33 = vld [vmem:[#allocation5 + $0x3a0] sm:$0xff] }
  0x48   :  { %1199 = vmatpush1.bf16.msra.mxu0 %v3743_v3  ;;  %401 = vmatprep.mubr.bf16.mxu0 %v5231_v0  ;;  %5583 = vst [vmem:[#allocation61_spill] sm:$0xff] %v3837_v1  ;;  %5584 = vst [vmem:[#allocation62_spill] sm:$0xff] %v3839_v7  ;;  %v173_v52 = vld [vmem:[#allocation5 + $0x3c0] sm:$0xff]  ;;  %v178_v62 = vld [vmem:[#allocation5 + $0x3e8] sm:$0xff] }
  0x49   :  { %1200 = vmatprep.subr.bf16.mxu0 %v3751_v8  ;;  %474 = vmatprep.mubr.bf16.mxu1 %v5231_v0  ;;  %5585 = vst [vmem:[#allocation63_spill] sm:$0xff] %v3844_v25  ;;  %5586 = vst [vmem:[#allocation64_spill] sm:$0xff] %v3846_v28  ;;  %v166_v0 = vld [vmem:[#allocation5 + $0x388] sm:$0xff]  ;;  %v177_v54 = vld [vmem:[#allocation5 + $0x3e0] sm:$0xff] }
  0x4a   :  { %1240 = vmatpush1.bf16.msra.mxu1 %v3745_v4 }
  0x4b   :  { %1241 = vmatprep.subr.bf16.mxu1 %v3753_v10 }
  0x4c   :  { %1201 = vmatpush1.bf16.msra.mxu0 %v3755_v11 }
  0x4d   :  { %1202 = vmatprep.subr.bf16.mxu0 %v3763_v18 }
  0x4e   :  { %1242 = vmatpush1.bf16.msra.mxu1 %v3757_v12  ;;  %2997 = vmatmul.mubr.msk.bf16.gmra.mrb[12].mxu0 %vm313_vm1, %v3239_v16 }
  0x4f   :  { %1243 = vmatprep.subr.bf16.mxu1 %v3765_v22  ;;  %3002 = vmatmul.mubr.msk.bf16.gmra.mrb[12].mxu1 %vm313_vm1, %v3239_v16 }
  0x50   :  { %1203 = vmatpush1.bf16.msra.mxu0 %v3767_v23 }
  0x51   :  { %1204 = vmatprep.subr.bf16.mxu0 %v3775_v32 }
  0x52   :  { %1244 = vmatpush1.bf16.msra.mxu1 %v3769_v24 }
  0x53   :  { %1245 = vmatprep.subr.bf16.mxu1 %v3777_v36 }
  0x54   :  { %1205 = vmatpush1.bf16.msra.mxu0 %v3779_v37 }
  0x55   :  { %1206 = vmatprep.subr.bf16.mxu0 %v3791_v53 }
  0x56   :  { %1246 = vmatpush1.bf16.msra.mxu1 %v3781_v44 }
  0x57   :  { %1247 = vmatprep.subr.bf16.mxu1 %v3793_v56 }
  0x58   :  { %1207 = vmatpush1.bf16.msra.mxu0 %v3796_v60  ;;  %v84_v60 = vld [vmem:[#allocation5 + $0xf8] sm:$0xff] }
  0x59   :  { %1208 = vmatprep.subr.bf16.mxu0 %v3806_v6 }
  0x5a   :  { %1248 = vmatpush1.bf16.msra.mxu1 %v3798_v61 }
  0x5b   :  { %1249 = vmatprep.subr.bf16.mxu1 %v3808_v9  ;;  %v59_v9 = vld [vmem:[#allocation5 + $0x30] sm:$0xff] }
  0x5c   :  { %1209 = vmatpush1.bf16.msra.mxu0 %v3810_v13 }
  0x5d   :  { %1210 = vmatprep.subr.bf16.mxu0 %v3822_v29  ;;  %v174_v29 = vld [vmem:[#allocation5 + $0x3c8] sm:$0xff] }
  0x5e   :  { %1250 = vmatpush1.bf16.msra.mxu1 %v3812_v14  ;;  %v3855_v14 = vcombine.low %v165_v19, %v169_v33  ;;  %v3865_v13 = vcombine.high %v174_v29, %v178_v62 }
  0x5f   :  { %1251 = vmatprep.subr.bf16.mxu1 %v3824_v45 }
  0x60   :  { %1211 = vmatpush1.bf16.msra.mxu0 %v3827_v46  ;;  %v170_v46 = vld [vmem:[#allocation5 + $0x3a8] sm:$0xff]  ;;  %5589 = vst [vmem:[#allocation67_spill] sm:$0xff] %v3855_v14  ;;  %5592 = vst [vmem:[#allocation70_spill] sm:$0xff] %v3865_v13 }
  0x61   :  { %1212 = vmatprep.subr.bf16.mxu0 %v3837_v1  ;;  %v3851_v45 = vcombine.high %v166_v0, %v170_v46  ;;  %v3859_v5 = vcombine.low %v166_v0, %v170_v46  ;;  %v3861_v1 = vcombine.high %v173_v52, %v177_v54  ;;  %v3870_v0 = vcombine.low %v173_v52, %v177_v54 }
  0x62   :  { %1252 = vmatpush1.bf16.msra.mxu1 %v3829_v48  ;;  %v3849_v48 = vcombine.high %v165_v19, %v169_v33  ;;  %v5593_v19 = vmov 0   ;;  %v56_v33 = vld [vmem:[#allocation5 + $0x18] sm:$0xff]  ;;  %v3875_v46 = vcombine.low %v174_v29, %v178_v62  ;;  %v199_v29 = vlaneseq }
  0x63   :  { %5588 = vst [vmem:[#allocation66_spill] sm:$0xff] %v3851_v45  ;;  %1253 = vmatprep.subr.bf16.mxu1 %v3844_v25  ;;  %5590 = vst [vmem:[#allocation68_spill] sm:$0xff] %v3859_v5  ;;  %v55_v25 = vld [vmem:[#allocation5 + $0x10] sm:$0xff]  ;;  %1218 = vmatprep.mubr.bf16.mxu0 %v5593_v19 }
  0x64   :  { %5587 = vst [vmem:[#allocation65_spill] sm:$0xff] %v3849_v48  ;;  %1213 = vmatpush1.bf16.msra.mxu0 %v3839_v7  ;;  %5591 = vst [vmem:[#allocation69_spill] sm:$0xff] %v3861_v1  ;;  %1259 = vmatprep.mubr.bf16.mxu1 %v5593_v19  ;;  %v3886_v52 = vcombine.low %v55_v25, %v59_v9  ;;  %v3890_v62 = vshrl.u32 %v199_v29, 7 }
  0x65   :  { %1214 = vmatprep.subr.bf16.mxu0 %v3849_v48  ;;  %5594 = vst [vmem:[#allocation71_spill] sm:$0xff] %v3870_v0  ;;  %5595 = vst [vmem:[#allocation72_spill] sm:$0xff] %v3875_v46 }
  0x66   :  { %1254 = vmatpush1.bf16.msra.mxu1 %v3846_v28  ;;  %v60_v28 = vld [vmem:[#allocation5 + $0x38] sm:$0xff]  ;;  %5599 = vst [vmem:[#allocation76_spill] sm:$0xff] %v3890_v62 }
  0x67   :  { %1255 = vmatprep.subr.bf16.mxu1 %v3851_v45  ;;  %v3877_v45 = vcombine.high %v55_v25, %v59_v9  ;;  %v3880_v16 = vcombine.high %v56_v33, %v60_v28  ;;  %v3888_v54 = vcombine.low %v56_v33, %v60_v28  ;;  %v5281_v9 = vsub.s32 3, %v3890_v62 }
  0x68   :  { %1215 = vmatpush1.bf16.msra.mxu0 %v3855_v14 }
  0x69   :  { %1216 = vmatprep.subr.bf16.mxu0 %v3861_v1  ;;  %5596 = vst [vmem:[#allocation73_spill] sm:$0xff] %v3877_v45  ;;  %5597 = vst [vmem:[#allocation74_spill] sm:$0xff] %v3880_v16  ;;  %v5271_v1 = vsub.s32 0, %v3890_v62 }
  0x6a   :  { %1256 = vmatpush1.bf16.msra.mxu1 %v3859_v5  ;;  %5598 = vst [vmem:[#allocation75_spill] sm:$0xff] %v3888_v54  ;;  %v5274_v5 = vsub.s32 1, %v3890_v62 }
  0x6b   :  { %1257 = vmatprep.subr.bf16.mxu1 %v3865_v13  ;;  %v235_v13 = vld [vmem:[#allocation3] sm:$0xf] }
  0x6c   :  { %1217 = vmatpush1.bf16.msra.mxu0 %v3870_v0  ;;  %v3896_v0 = vrot.slane %v235_v13, %v5271_v1  ;;  %v3911_v1 = vrot.slane %v235_v13, %v5281_v9 }
  0x6d   :  { %1268 = vmatprep.subr.bf16.mxu0 %v3877_v45  ;;  %v3900_v45 = vrot.slane %v235_v13, %v5274_v5  ;;  %v5290_v5 = vsub.s32 2, %v3890_v62 }
  0x6e   :  { %1258 = vmatpush1.bf16.msra.mxu1 %v3875_v46  ;;  %5600 = vst [vmem:[#allocation77_spill] sm:$0xff] %v3896_v0  ;;  %5604 = vst [vmem:[#allocation81_spill] sm:$0xff] %v3911_v1 }
  0x6f   :  { %1309 = vmatprep.subr.bf16.mxu1 %v3880_v16  ;;  %5601 = vst [vmem:[#allocation78_spill] sm:$0xff] %v3900_v45 }
 0x102   :  { %v373_v25 = vpop.f32.mrb[0].mxu0 }
 0x103   :  { %v374_v28 = vadd.f32 %v373_v25, %v3896_v0  ;;  %v375_v33 = vpop.f32.mrb[1].mxu0 }
 0x104   :  { %v376_v29 = vadd.f32 %v375_v33, %v3900_v45  ;;  %v3905_v16 = vpop.f32.mrb[2].mxu0  ;;  %v446_v7 = vpop.f32.mrb[0].mxu1 }
 0x105   :  { %5602 = vst [vmem:[#allocation79_spill] sm:$0xff] %v3905_v16  ;;  %v3003_v46 = vmul.f32 -1.442695, %v374_v28  ;;  %v3907_v14 = vpop.f32.mrb[3].mxu0  ;;  %v448_v6 = vpop.f32.mrb[1].mxu1  ;;  %v3921_v28 = vrot.slane %v235_v13, %v5290_v5 }
 0x106   :  { %5603 = vst [vmem:[#allocation80_spill] sm:$0xff] %v3907_v14  ;;  %v3004_v48 = vmul.f32 -1.442695, %v376_v29  ;;  %v3914_v25 = vpop.f32.mrb[2].mxu1  ;;  %v449_v33 = vadd.f32 %v448_v6, %v3911_v1 }
 0x107   :  { %3248 = vpow2.f32 %v3003_v46  ;;  %5605 = vst [vmem:[#allocation82_spill] sm:$0xff] %v3914_v25  ;;  %v3917_v45 = vpop.f32.mrb[3].mxu1  ;;  %5607 = vst [vmem:[#allocation84_spill] sm:$0xff] %v3921_v28  ;;  %v447_v9 = vadd.f32 %v446_v7, %v3921_v28  ;;  %v80_v28 = vld [vmem:[#allocation5 + $0xd8] sm:$0xff] }
 0x108   :  { %3250 = vpow2.f32 %v3004_v48  ;;  %5606 = vst [vmem:[#allocation83_spill] sm:$0xff] %v3917_v45  ;;  %v3005_v14 = vmul.f32 -1.442695, %v449_v33 }
 0x10a   :  { %3252 = vpow2.f32 %v3005_v14  ;;  %v63_v14 = vld [vmem:[#allocation5 + $0x50] sm:$0xff] }
 0x10b   :  { %3254 = vtanh.f32 %v447_v9  ;;  %v64_v9 = vld [vmem:[#allocation5 + $0x58] sm:$0xff] }
 0x111   :  { %v3249_v29 = vpop.eup %3248 }
 0x112   :  { %v3251_v16 = vpop.eup %3250  ;;  %v524_v0 = vadd.f32 1.0, %v3249_v29  ;;  %v67_v29 = vld [vmem:[#allocation5 + $0x70] sm:$0xff] }
 0x113   :  { %v530_v46 = vadd.f32 1.0, %v3251_v16  ;;  %v68_v16 = vld [vmem:[#allocation5 + $0x78] sm:$0xff]  ;;  %v3929_v5 = vcombine.high %v63_v14, %v67_v29 }
 0x114   :  { %3256 = vrcp.f32 %v524_v0  ;;  %v3253_v48 = vpop.eup %3252 }
 0x115   :  { %3258 = vrcp.f32 %v530_v46  ;;  %v3255_v25 = vpop.eup %3254  ;;  %v537_v1 = vadd.f32 1.0, %v3253_v48  ;;  %5609 = vst [vmem:[#allocation86_spill] sm:$0xff] %v3929_v5  ;;  %v3931_v48 = vcombine.high %v64_v9, %v68_v16 }
 0x117   :  { %3260 = vrcp.f32 %v537_v1  ;;  %5610 = vst [vmem:[#allocation87_spill] sm:$0xff] %v3931_v48  ;;  %v3937_v1 = vcombine.low %v63_v14, %v67_v29 }
 0x119   :  { %5611 = vst [vmem:[#allocation88_spill] sm:$0xff] %v3937_v1 }
 0x11e   :  { %v3257_v6 = vpop.eup %3256 }
 0x11f   :  { %v3259_v45 = vpop.eup %3258  ;;  %v541_v61 = vmul.f32 %v3257_v6, %v3255_v25  ;;  %v71_v25 = vld [vmem:[#allocation5 + $0x90] sm:$0xff]  ;;  %v3939_v6 = vcombine.low %v64_v9, %v68_v16  ;;  %v3959_v16 = vcombine.high %v80_v28, %v84_v60 }
 0x120   :  { %v540_v62 = vmul.f32 0.0, %v3259_v45  ;;  %v75_v45 = vld [vmem:[#allocation5 + $0xb0] sm:$0xff] }
 0x121   :  { %v3261_v7 = vpop.eup %3260  ;;  %5612 = vst [vmem:[#allocation89_spill] sm:$0xff] %v3939_v6  ;;  %v3951_v14 = vcombine.low %v71_v25, %v75_v45  ;;  %5618 = vst [vmem:[#allocation95_spill] sm:$0xff] %v3959_v16 }
 0x122   :  { %v3924_v13 = vadd.f32 %v541_v61, %v540_v62  ;;  %v72_v61 = vld [vmem:[#allocation5 + $0x98] sm:$0xff] }
 0x123   :  { %v76_v62 = vld [vmem:[#allocation5 + $0xb8] sm:$0xff]  ;;  %5615 = vst [vmem:[#allocation92_spill] sm:$0xff] %v3951_v14 }
 0x124   :  { %5608 = vst [vmem:[#allocation85_spill] sm:$0xff] %v3924_v13  ;;  %3262 = vtanh.f32 %v3924_v13  ;;  %v83_v13 = vld [vmem:[#allocation5 + $0xf0] sm:$0xff]  ;;  %v3953_v29 = vcombine.low %v72_v61, %v76_v62 }
 0x126   :  { %5616 = vst [vmem:[#allocation93_spill] sm:$0xff] %v3953_v29 }
 0x12e   :  { %v3263_v33 = vpop.eup %3262 }
 0x12f   :  { %v544_v0 = vmul.f32 %v3263_v33, %v3261_v7  ;;  %v3943_v7 = vcombine.high %v71_v25, %v75_v45  ;;  %v3945_v33 = vcombine.high %v72_v61, %v76_v62  ;;  %v3965_v45 = vcombine.low %v80_v28, %v84_v60 }
 0x131   :  { %v3927_v46 = vpack.c.bf16 %v544_v0, %v544_v0  ;;  %5613 = vst [vmem:[#allocation90_spill] sm:$0xff] %v3943_v7  ;;  %5614 = vst [vmem:[#allocation91_spill] sm:$0xff] %v3945_v33  ;;  %v79_v0 = vld [vmem:[#allocation5 + $0xd0] sm:$0xff] }
 0x132   :  { %v3957_v9 = vcombine.high %v79_v0, %v83_v13  ;;  %v3963_v25 = vcombine.low %v79_v0, %v83_v13  ;;  %5620 = vst [vmem:[#allocation97_spill] sm:$0xff] %v3965_v45 }
 0x133   :  { %1219 = vmatmul.mubr.bf16.vlgmr.msra.gmra.mrb[16].mxu0 %v3927_v46  ;;  %1260 = vmatmul.mubr.bf16.vlgmr.msra.gmra.mrb[16].mxu1 %v3927_v46 }
 0x134   :  { %1269 = vmatpush1.bf16.msra.mxu0 %v3886_v52  ;;  %1310 = vmatpush1.bf16.msra.mxu1 %v3888_v54  ;;  %5617 = vst [vmem:[#allocation94_spill] sm:$0xff] %v3957_v9  ;;  %v88_v54 = vld [vmem:[#allocation5 + $0x118] sm:$0xff]  ;;  %5619 = vst [vmem:[#allocation96_spill] sm:$0xff] %v3963_v25 }
 0x135   :  { %1270 = vmatprep.subr.bf16.mxu0 %v3929_v5  ;;  %1311 = vmatprep.subr.bf16.mxu1 %v3931_v48  ;;  %v87_v48 = vld [vmem:[#allocation5 + $0x110] sm:$0xff] }
 0x136   :  { %1300 = vmatprep.mubr.bf16.mxu0 %v5593_v19  ;;  %1341 = vmatprep.mubr.bf16.mxu1 %v5593_v19  ;;  %v91_v5 = vld [vmem:[#allocation5 + $0x130] sm:$0xff]  ;;  %v92_v19 = vld [vmem:[#allocation5 + $0x138] sm:$0xff] }
 0x137   :  { %v3969_v61 = vcombine.high %v87_v48, %v91_v5  ;;  %v3971_v62 = vcombine.high %v88_v54, %v92_v19  ;;  %v3975_v13 = vcombine.low %v87_v48, %v91_v5  ;;  %v3977_v60 = vcombine.low %v88_v54, %v92_v19 }
 0x138   :  { %1271 = vmatpush1.bf16.msra.mxu0 %v3937_v1  ;;  %1312 = vmatpush1.bf16.msra.mxu1 %v3939_v6  ;;  %v96_v6 = vld [vmem:[#allocation5 + $0x158] sm:$0xff] }
 0x139   :  { %1272 = vmatprep.subr.bf16.mxu0 %v3943_v7  ;;  %1313 = vmatprep.subr.bf16.mxu1 %v3945_v33  ;;  %5621 = vst [vmem:[#allocation98_spill] sm:$0xff] %v3969_v61  ;;  %5622 = vst [vmem:[#allocation99_spill] sm:$0xff] %v3971_v62  ;;  %v95_v33 = vld [vmem:[#allocation5 + $0x150] sm:$0xff]  ;;  %v100_v1 = vld [vmem:[#allocation5 + $0x178] sm:$0xff] }
 0x13a   :  { %v99_v7 = vld [vmem:[#allocation5 + $0x170] sm:$0xff]  ;;  %5623 = vst [vmem:[#allocation100_spill] sm:$0xff] %v3975_v13  ;;  %5624 = vst [vmem:[#allocation101_spill] sm:$0xff] %v3977_v60  ;;  %v3983_v0 = vcombine.high %v96_v6, %v100_v1  ;;  %v3989_v54 = vcombine.low %v96_v6, %v100_v1 }
 0x13b   :  { %v3981_v28 = vcombine.high %v95_v33, %v99_v7  ;;  %v3987_v5 = vcombine.low %v95_v33, %v99_v7 }
 0x13c   :  { %1273 = vmatpush1.bf16.msra.mxu0 %v3951_v14  ;;  %1314 = vmatpush1.bf16.msra.mxu1 %v3953_v29  ;;  %5626 = vst [vmem:[#allocation103_spill] sm:$0xff] %v3983_v0  ;;  %v104_v29 = vld [vmem:[#allocation5 + $0x198] sm:$0xff]  ;;  %5628 = vst [vmem:[#allocation105_spill] sm:$0xff] %v3989_v54 }
 0x13d   :  { %1274 = vmatprep.subr.bf16.mxu0 %v3957_v9  ;;  %1315 = vmatprep.subr.bf16.mxu1 %v3959_v16  ;;  %5625 = vst [vmem:[#allocation102_spill] sm:$0xff] %v3981_v28  ;;  %v103_v16 = vld [vmem:[#allocation5 + $0x190] sm:$0xff]  ;;  %v108_v14 = vld [vmem:[#allocation5 + $0x1b8] sm:$0xff]  ;;  %5627 = vst [vmem:[#allocation104_spill] sm:$0xff] %v3987_v5 }
 0x13e   :  { %v107_v9 = vld [vmem:[#allocation5 + $0x1b0] sm:$0xff]  ;;  %v3995_v19 = vcombine.high %v104_v29, %v108_v14  ;;  %v4001_v1 = vcombine.low %v104_v29, %v108_v14 }
 0x13f   :  { %v3993_v48 = vcombine.high %v103_v16, %v107_v9  ;;  %v3999_v7 = vcombine.low %v103_v16, %v107_v9 }
 0x140   :  { %1275 = vmatpush1.bf16.msra.mxu0 %v3963_v25  ;;  %1316 = vmatpush1.bf16.msra.mxu1 %v3965_v45  ;;  %5630 = vst [vmem:[#allocation107_spill] sm:$0xff] %v3995_v19  ;;  %v112_v45 = vld [vmem:[#allocation5 + $0x1d8] sm:$0xff]  ;;  %5632 = vst [vmem:[#allocation109_spill] sm:$0xff] %v4001_v1 }
 0x141   :  { %1276 = vmatprep.subr.bf16.mxu0 %v3969_v61  ;;  %1317 = vmatprep.subr.bf16.mxu1 %v3971_v62  ;;  %5629 = vst [vmem:[#allocation106_spill] sm:$0xff] %v3993_v48  ;;  %v111_v62 = vld [vmem:[#allocation5 + $0x1d0] sm:$0xff]  ;;  %v116_v25 = vld [vmem:[#allocation5 + $0x1f8] sm:$0xff]  ;;  %5631 = vst [vmem:[#allocation108_spill] sm:$0xff] %v3999_v7 }
 0x142   :  { %v115_v61 = vld [vmem:[#allocation5 + $0x1f0] sm:$0xff]  ;;  %v4007_v33 = vcombine.high %v112_v45, %v116_v25  ;;  %v4013_v14 = vcombine.low %v112_v45, %v116_v25 }
 0x143   :  { %v4005_v6 = vcombine.high %v111_v62, %v115_v61  ;;  %v4011_v9 = vcombine.low %v111_v62, %v115_v61 }
 0x144   :  { %1277 = vmatpush1.bf16.msra.mxu0 %v3975_v13  ;;  %1318 = vmatpush1.bf16.msra.mxu1 %v3977_v60  ;;  %5634 = vst [vmem:[#allocation111_spill] sm:$0xff] %v4007_v33  ;;  %v120_v60 = vld [vmem:[#allocation5 + $0x218] sm:$0xff]  ;;  %5636 = vst [vmem:[#allocation113_spill] sm:$0xff] %v4013_v14 }
 0x145   :  { %1278 = vmatprep.subr.bf16.mxu0 %v3981_v28  ;;  %1319 = vmatprep.subr.bf16.mxu1 %v3983_v0  ;;  %5633 = vst [vmem:[#allocation110_spill] sm:$0xff] %v4005_v6  ;;  %v119_v0 = vld [vmem:[#allocation5 + $0x210] sm:$0xff]  ;;  %v124_v13 = vld [vmem:[#allocation5 + $0x238] sm:$0xff]  ;;  %5635 = vst [vmem:[#allocation112_spill] sm:$0xff] %v4011_v9 }
 0x146   :  { %v123_v28 = vld [vmem:[#allocation5 + $0x230] sm:$0xff]  ;;  %v4019_v16 = vcombine.high %v120_v60, %v124_v13  ;;  %v4025_v25 = vcombine.low %v120_v60, %v124_v13 }
 0x147   :  { %v4017_v29 = vcombine.high %v119_v0, %v123_v28  ;;  %v4023_v61 = vcombine.low %v119_v0, %v123_v28 }
 0x148   :  { %1279 = vmatpush1.bf16.msra.mxu0 %v3987_v5  ;;  %1320 = vmatpush1.bf16.msra.mxu1 %v3989_v54  ;;  %5638 = vst [vmem:[#allocation115_spill] sm:$0xff] %v4019_v16  ;;  %v128_v54 = vld [vmem:[#allocation5 + $0x258] sm:$0xff]  ;;  %5640 = vst [vmem:[#allocation117_spill] sm:$0xff] %v4025_v25 }
 0x149   :  { %1280 = vmatprep.subr.bf16.mxu0 %v3993_v48  ;;  %1321 = vmatprep.subr.bf16.mxu1 %v3995_v19  ;;  %5637 = vst [vmem:[#allocation114_spill] sm:$0xff] %v4017_v29  ;;  %v127_v19 = vld [vmem:[#allocation5 + $0x250] sm:$0xff]  ;;  %v132_v5 = vld [vmem:[#allocation5 + $0x278] sm:$0xff]  ;;  %5639 = vst [vmem:[#allocation116_spill] sm:$0xff] %v4023_v61 }
 0x14a   :  { %v131_v48 = vld [vmem:[#allocation5 + $0x270] sm:$0xff]  ;;  %v4031_v62 = vcombine.high %v128_v54, %v132_v5  ;;  %v4037_v13 = vcombine.low %v128_v54, %v132_v5 }
 0x14b   :  { %v4029_v45 = vcombine.high %v127_v19, %v131_v48  ;;  %v4035_v28 = vcombine.low %v127_v19, %v131_v48 }
 0x14c   :  { %1281 = vmatpush1.bf16.msra.mxu0 %v3999_v7  ;;  %1322 = vmatpush1.bf16.msra.mxu1 %v4001_v1  ;;  %5642 = vst [vmem:[#allocation119_spill] sm:$0xff] %v4031_v62  ;;  %v136_v1 = vld [vmem:[#allocation5 + $0x298] sm:$0xff]  ;;  %5644 = vst [vmem:[#allocation121_spill] sm:$0xff] %v4037_v13 }
 0x14d   :  { %1282 = vmatprep.subr.bf16.mxu0 %v4005_v6  ;;  %1323 = vmatprep.subr.bf16.mxu1 %v4007_v33  ;;  %5641 = vst [vmem:[#allocation118_spill] sm:$0xff] %v4029_v45  ;;  %v135_v33 = vld [vmem:[#allocation5 + $0x290] sm:$0xff]  ;;  %v140_v7 = vld [vmem:[#allocation5 + $0x2b8] sm:$0xff]  ;;  %5643 = vst [vmem:[#allocation120_spill] sm:$0xff] %v4035_v28 }
 0x14e   :  { %v139_v6 = vld [vmem:[#allocation5 + $0x2b0] sm:$0xff]  ;;  %v4043_v0 = vcombine.high %v136_v1, %v140_v7  ;;  %v4049_v5 = vcombine.low %v136_v1, %v140_v7 }
 0x14f   :  { %v4041_v60 = vcombine.high %v135_v33, %v139_v6  ;;  %v4047_v48 = vcombine.low %v135_v33, %v139_v6 }
 0x150   :  { %1283 = vmatpush1.bf16.msra.mxu0 %v4011_v9  ;;  %1324 = vmatpush1.bf16.msra.mxu1 %v4013_v14  ;;  %5646 = vst [vmem:[#allocation123_spill] sm:$0xff] %v4043_v0  ;;  %v144_v14 = vld [vmem:[#allocation5 + $0x2d8] sm:$0xff]  ;;  %5648 = vst [vmem:[#allocation125_spill] sm:$0xff] %v4049_v5 }
 0x151   :  { %1284 = vmatprep.subr.bf16.mxu0 %v4017_v29  ;;  %1325 = vmatprep.subr.bf16.mxu1 %v4019_v16  ;;  %5645 = vst [vmem:[#allocation122_spill] sm:$0xff] %v4041_v60  ;;  %v143_v16 = vld [vmem:[#allocation5 + $0x2d0] sm:$0xff]  ;;  %v148_v9 = vld [vmem:[#allocation5 + $0x2f8] sm:$0xff]  ;;  %5647 = vst [vmem:[#allocation124_spill] sm:$0xff] %v4047_v48 }
 0x152   :  { %v147_v29 = vld [vmem:[#allocation5 + $0x2f0] sm:$0xff]  ;;  %v4055_v19 = vcombine.high %v144_v14, %v148_v9  ;;  %v4061_v7 = vcombine.low %v144_v14, %v148_v9 }
 0x153   :  { %v4053_v54 = vcombine.high %v143_v16, %v147_v29  ;;  %v4059_v6 = vcombine.low %v143_v16, %v147_v29 }
 0x154   :  { %1285 = vmatpush1.bf16.msra.mxu0 %v4023_v61  ;;  %1326 = vmatpush1.bf16.msra.mxu1 %v4025_v25  ;;  %5650 = vst [vmem:[#allocation127_spill] sm:$0xff] %v4055_v19  ;;  %v152_v25 = vld [vmem:[#allocation5 + $0x318] sm:$0xff]  ;;  %5652 = vst [vmem:[#allocation129_spill] sm:$0xff] %v4061_v7 }
 0x155   :  { %1286 = vmatprep.subr.bf16.mxu0 %v4029_v45  ;;  %1327 = vmatprep.subr.bf16.mxu1 %v4031_v62  ;;  %5649 = vst [vmem:[#allocation126_spill] sm:$0xff] %v4053_v54  ;;  %v151_v62 = vld [vmem:[#allocation5 + $0x310] sm:$0xff]  ;;  %v156_v61 = vld [vmem:[#allocation5 + $0x338] sm:$0xff]  ;;  %5651 = vst [vmem:[#allocation128_spill] sm:$0xff] %v4059_v6 }
 0x156   :  { %v155_v45 = vld [vmem:[#allocation5 + $0x330] sm:$0xff]  ;;  %v4067_v33 = vcombine.high %v152_v25, %v156_v61  ;;  %v4073_v9 = vcombine.low %v152_v25, %v156_v61 }
 0x157   :  { %v4065_v1 = vcombine.high %v151_v62, %v155_v45  ;;  %v4071_v29 = vcombine.low %v151_v62, %v155_v45 }
 0x158   :  { %1287 = vmatpush1.bf16.msra.mxu0 %v4035_v28  ;;  %1328 = vmatpush1.bf16.msra.mxu1 %v4037_v13  ;;  %5654 = vst [vmem:[#allocation131_spill] sm:$0xff] %v4067_v33  ;;  %v160_v13 = vld [vmem:[#allocation5 + $0x358] sm:$0xff]  ;;  %5656 = vst [vmem:[#allocation133_spill] sm:$0xff] %v4073_v9 }
 0x159   :  { %1288 = vmatprep.subr.bf16.mxu0 %v4041_v60  ;;  %1329 = vmatprep.subr.bf16.mxu1 %v4043_v0  ;;  %5653 = vst [vmem:[#allocation130_spill] sm:$0xff] %v4065_v1  ;;  %v159_v0 = vld [vmem:[#allocation5 + $0x350] sm:$0xff]  ;;  %v164_v28 = vld [vmem:[#allocation5 + $0x378] sm:$0xff]  ;;  %5655 = vst [vmem:[#allocation132_spill] sm:$0xff] %v4071_v29 }
 0x15a   :  { %v163_v60 = vld [vmem:[#allocation5 + $0x370] sm:$0xff]  ;;  %v4079_v16 = vcombine.high %v160_v13, %v164_v28  ;;  %v4085_v61 = vcombine.low %v160_v13, %v164_v28 }
 0x15b   :  { %v4077_v14 = vcombine.high %v159_v0, %v163_v60  ;;  %v4083_v45 = vcombine.low %v159_v0, %v163_v60 }
 0x15c   :  { %1289 = vmatpush1.bf16.msra.mxu0 %v4047_v48  ;;  %1330 = vmatpush1.bf16.msra.mxu1 %v4049_v5  ;;  %5658 = vst [vmem:[#allocation135_spill] sm:$0xff] %v4079_v16  ;;  %v168_v5 = vld [vmem:[#allocation5 + $0x398] sm:$0xff]  ;;  %5660 = vst [vmem:[#allocation137_spill] sm:$0xff] %v4085_v61 }
 0x15d   :  { %1290 = vmatprep.subr.bf16.mxu0 %v4053_v54  ;;  %1331 = vmatprep.subr.bf16.mxu1 %v4055_v19  ;;  %5657 = vst [vmem:[#allocation134_spill] sm:$0xff] %v4077_v14  ;;  %v167_v19 = vld [vmem:[#allocation5 + $0x390] sm:$0xff]  ;;  %v172_v48 = vld [vmem:[#allocation5 + $0x3b8] sm:$0xff]  ;;  %5659 = vst [vmem:[#allocation136_spill] sm:$0xff] %v4083_v45 }
 0x15e   :  { %v171_v54 = vld [vmem:[#allocation5 + $0x3b0] sm:$0xff]  ;;  %v4091_v62 = vcombine.high %v168_v5, %v172_v48  ;;  %v4097_v28 = vcombine.low %v168_v5, %v172_v48  ;;  %v4115_v5 = vpop.f32.mrb[4].mxu1 }
 0x15f   :  { %v4089_v25 = vcombine.high %v167_v19, %v171_v54  ;;  %v4095_v60 = vcombine.low %v167_v19, %v171_v54  ;;  %5671 = vst [vmem:[#allocation148_spill] sm:$0xff] %v4115_v5  ;;  %v5703_v5 = vld [vmem:[#allocation61_spill] sm:$0xff] }
 0x160   :  { %1291 = vmatpush1.bf16.msra.mxu0 %v4059_v6  ;;  %1332 = vmatpush1.bf16.msra.mxu1 %v4061_v7  ;;  %5662 = vst [vmem:[#allocation139_spill] sm:$0xff] %v4091_v62  ;;  %v176_v7 = vld [vmem:[#allocation5 + $0x3d8] sm:$0xff]  ;;  %5664 = vst [vmem:[#allocation141_spill] sm:$0xff] %v4097_v28 }
 0x161   :  { %1292 = vmatprep.subr.bf16.mxu0 %v4065_v1  ;;  %1333 = vmatprep.subr.bf16.mxu1 %v4067_v33  ;;  %5661 = vst [vmem:[#allocation138_spill] sm:$0xff] %v4089_v25  ;;  %v175_v33 = vld [vmem:[#allocation5 + $0x3d0] sm:$0xff]  ;;  %v180_v6 = vld [vmem:[#allocation5 + $0x3f8] sm:$0xff]  ;;  %5663 = vst [vmem:[#allocation140_spill] sm:$0xff] %v4095_v60 }
 0x162   :  { %v179_v1 = vld [vmem:[#allocation5 + $0x3f0] sm:$0xff]  ;;  %v4103_v0 = vcombine.high %v176_v7, %v180_v6  ;;  %v4111_v54 = vcombine.low %v176_v7, %v180_v6 }
 0x163   :  { %v4101_v13 = vcombine.high %v175_v33, %v179_v1 }
 0x164   :  { %1293 = vmatpush1.bf16.msra.mxu0 %v4071_v29  ;;  %1334 = vmatpush1.bf16.msra.mxu1 %v4073_v9  ;;  %5666 = vst [vmem:[#allocation143_spill] sm:$0xff] %v4103_v0  ;;  %5669 = vst [vmem:[#allocation146_spill] sm:$0xff] %v4111_v54 }
 0x165   :  { %1294 = vmatprep.subr.bf16.mxu0 %v4077_v14  ;;  %1335 = vmatprep.subr.bf16.mxu1 %v4079_v16  ;;  %5665 = vst [vmem:[#allocation142_spill] sm:$0xff] %v4101_v13  ;;  %v4105_v16 = vpop.f32.mrb[4].mxu0 }
 0x166   :  { %5667 = vst [vmem:[#allocation144_spill] sm:$0xff] %v4105_v16  ;;  %v4113_v48 = vpop.f32.mrb[5].mxu0 }
 0x167   :  { %5670 = vst [vmem:[#allocation147_spill] sm:$0xff] %v4113_v48  ;;  %v4119_v19 = vpop.f32.mrb[6].mxu0  ;;  %v5702_v48 = vld [vmem:[#allocation60_spill] sm:$0xff] }
 0x168   :  { %1295 = vmatpush1.bf16.msra.mxu0 %v4083_v45  ;;  %1336 = vmatpush1.bf16.msra.mxu1 %v4085_v61  ;;  %v4109_v45 = vcombine.low %v175_v33, %v179_v1  ;;  %5672 = vst [vmem:[#allocation149_spill] sm:$0xff] %v4119_v19  ;;  %v4123_v16 = vpop.f32.mrb[7].mxu0  ;;  %v5700_v19 = vld [vmem:[#allocation58_spill] sm:$0xff] }
 0x169   :  { %1296 = vmatprep.subr.bf16.mxu0 %v4089_v25  ;;  %1337 = vmatprep.subr.bf16.mxu1 %v4091_v62  ;;  %v4121_v62 = vpop.f32.mrb[5].mxu1  ;;  %5674 = vst [vmem:[#allocation151_spill] sm:$0xff] %v4123_v16  ;;  %v4135_v6 = vpop.f32.mrb[8].mxu0 }
 0x16a   :  { %5668 = vst [vmem:[#allocation145_spill] sm:$0xff] %v4109_v45  ;;  %5673 = vst [vmem:[#allocation150_spill] sm:$0xff] %v4121_v62  ;;  %v4137_v7 = vpop.f32.mrb[9].mxu0  ;;  %v5701_v62 = vld [vmem:[#allocation59_spill] sm:$0xff] }
 0x16b   :  { %5677 = vst [vmem:[#allocation154_spill] sm:$0xff] %v4135_v6  ;;  %5678 = vst [vmem:[#allocation155_spill] sm:$0xff] %v4137_v7 }
 0x16c   :  { %1297 = vmatpush1.bf16.msra.mxu0 %v4095_v60  ;;  %1338 = vmatpush1.bf16.msra.mxu1 %v4097_v28  ;;  %v4125_v60 = vpop.f32.mrb[6].mxu1 }
 0x16d   :  { %1298 = vmatprep.subr.bf16.mxu0 %v4101_v13  ;;  %1339 = vmatprep.subr.bf16.mxu1 %v4103_v0  ;;  %5675 = vst [vmem:[#allocation152_spill] sm:$0xff] %v4125_v60  ;;  %v4127_v1 = vpop.f32.mrb[7].mxu1 }
 0x16e   :  { %5676 = vst [vmem:[#allocation153_spill] sm:$0xff] %v4127_v1  ;;  %v4139_v33 = vpop.f32.mrb[8].mxu1  ;;  %v4143_v1 = vpop.f32.mrb[10].mxu0 }
 0x16f   :  { %5679 = vst [vmem:[#allocation156_spill] sm:$0xff] %v4139_v33  ;;  %5680 = vst [vmem:[#allocation157_spill] sm:$0xff] %v4143_v1  ;;  %v4145_v16 = vpop.f32.mrb[9].mxu1  ;;  %v4149_v60 = vpop.f32.mrb[11].mxu0 }
 0x170   :  { %1299 = vmatpush1.bf16.msra.mxu0 %v4109_v45  ;;  %1340 = vmatpush1.bf16.msra.mxu1 %v4111_v54  ;;  %5681 = vst [vmem:[#allocation158_spill] sm:$0xff] %v4145_v16  ;;  %5682 = vst [vmem:[#allocation159_spill] sm:$0xff] %v4149_v60  ;;  %v4159_v1 = vpop.f32.mrb[12].mxu0 }
 0x171   :  { %1412 = vmatprep.subr.bf16.mxu0 %v3663_v15  ;;  %1453 = vmatprep.subr.bf16.mxu1 %v3667_v20  ;;  %5685 = vst [vmem:[#allocation162_spill] sm:$0xff] %v4159_v1  ;;  %v4161_v16 = vpop.f32.mrb[13].mxu0 }
 0x172   :  { %5686 = vst [vmem:[#allocation163_spill] sm:$0xff] %v4161_v16  ;;  %v4165_v60 = vpop.f32.mrb[14].mxu0  ;;  %v5698_v16 = vld [vmem:[#allocation56_spill] sm:$0xff] }
 0x173   :  { %1301 = vmatmul.mubr.bf16.vlgmr.msra.gmra.mrb[20].mxu0 %v3927_v46  ;;  %1342 = vmatmul.mubr.bf16.vlgmr.msra.gmra.mrb[20].mxu1 %v3927_v46  ;;  %v4151_v46 = vpop.f32.mrb[10].mxu1  ;;  %5687 = vst [vmem:[#allocation164_spill] sm:$0xff] %v4165_v60  ;;  %v5696_v60 = vld [vmem:[#allocation54_spill] sm:$0xff] }
 0x174   :  { %1413 = vmatpush1.bf16.msra.mxu0 %v3665_v17  ;;  %1454 = vmatpush1.bf16.msra.mxu1 %v3674_v26  ;;  %5683 = vst [vmem:[#allocation160_spill] sm:$0xff] %v4151_v46  ;;  %v4153_v6 = vpop.f32.mrb[11].mxu1 }
 0x175   :  { %1414 = vmatprep.subr.bf16.mxu0 %v3669_v21  ;;  %1455 = vmatprep.subr.bf16.mxu1 %v3680_v30  ;;  %5684 = vst [vmem:[#allocation161_spill] sm:$0xff] %v4153_v6  ;;  %v4167_v46 = vpop.f32.mrb[12].mxu1  ;;  %v4171_v6 = vpop.f32.mrb[15].mxu0 }
 0x176   :  { %5688 = vst [vmem:[#allocation165_spill] sm:$0xff] %v4167_v46  ;;  %5689 = vst [vmem:[#allocation166_spill] sm:$0xff] %v4171_v6  ;;  %v4173_v7 = vpop.f32.mrb[13].mxu1  ;;  %v5694_v6 = vld [vmem:[#allocation52_spill] sm:$0xff]  ;;  %v5699_v46 = vld [vmem:[#allocation57_spill] sm:$0xff] }
 0x177   :  { %5690 = vst [vmem:[#allocation167_spill] sm:$0xff] %v4173_v7  ;;  %v4175_v33 = vpop.f32.mrb[14].mxu1  ;;  %v5697_v7 = vld [vmem:[#allocation55_spill] sm:$0xff] }
 0x178   :  { %1415 = vmatpush1.bf16.msra.mxu0 %v3676_v27  ;;  %1456 = vmatpush1.bf16.msra.mxu1 %v3688_v34  ;;  %5691 = vst [vmem:[#allocation168_spill] sm:$0xff] %v4175_v33  ;;  %v4177_v1 = vpop.f32.mrb[15].mxu1  ;;  %v5695_v33 = vld [vmem:[#allocation53_spill] sm:$0xff] }
 0x179   :  { %1416 = vmatprep.subr.bf16.mxu0 %v3682_v31  ;;  %1457 = vmatprep.subr.bf16.mxu1 %v3694_v38  ;;  %5692 = vst [vmem:[#allocation169_spill] sm:$0xff] %v4177_v1  ;;  %v5693_v1 = vld [vmem:[#allocation51_spill] sm:$0xff] }
 0x17c   :  { %1417 = vmatpush1.bf16.msra.mxu0 %v3690_v35  ;;  %1458 = vmatpush1.bf16.msra.mxu1 %v3701_v40 }
 0x17d   :  { %1418 = vmatprep.subr.bf16.mxu0 %v3696_v39  ;;  %1459 = vmatprep.subr.bf16.mxu1 %v3707_v42 }
 0x180   :  { %1419 = vmatpush1.bf16.msra.mxu0 %v3703_v41  ;;  %1460 = vmatpush1.bf16.msra.mxu1 %v3711_v43 }
 0x181   :  { %1420 = vmatprep.subr.bf16.mxu0 %v3715_v47  ;;  %1461 = vmatprep.subr.bf16.mxu1 %v3717_v49 }
 0x184   :  { %1421 = vmatpush1.bf16.msra.mxu0 %v3719_v50  ;;  %1462 = vmatpush1.bf16.msra.mxu1 %v3721_v51 }
 0x185   :  { %1422 = vmatprep.subr.bf16.mxu0 %v3727_v55  ;;  %1463 = vmatprep.subr.bf16.mxu1 %v3729_v57 }
 0x188   :  { %1423 = vmatpush1.bf16.msra.mxu0 %v3731_v58  ;;  %1464 = vmatpush1.bf16.msra.mxu1 %v3733_v59 }
 0x189   :  { %1424 = vmatprep.subr.bf16.mxu0 %v3739_v63  ;;  %1465 = vmatprep.subr.bf16.mxu1 %v3741_v2 }
 0x18c   :  { %1425 = vmatpush1.bf16.msra.mxu0 %v3743_v3  ;;  %1466 = vmatpush1.bf16.msra.mxu1 %v3745_v4 }
 0x18d   :  { %1426 = vmatprep.subr.bf16.mxu0 %v3751_v8  ;;  %1467 = vmatprep.subr.bf16.mxu1 %v3753_v10 }
 0x190   :  { %1427 = vmatpush1.bf16.msra.mxu0 %v3755_v11  ;;  %1468 = vmatpush1.bf16.msra.mxu1 %v3757_v12 }
 0x191   :  { %1428 = vmatprep.subr.bf16.mxu0 %v3763_v18  ;;  %1469 = vmatprep.subr.bf16.mxu1 %v3765_v22 }
 0x194   :  { %1429 = vmatpush1.bf16.msra.mxu0 %v3767_v23  ;;  %1470 = vmatpush1.bf16.msra.mxu1 %v3769_v24 }
 0x195   :  { %1430 = vmatprep.subr.bf16.mxu0 %v3775_v32  ;;  %1471 = vmatprep.subr.bf16.mxu1 %v3777_v36  ;;  %v5724_v36 = vld [vmem:[#allocation83_spill] sm:$0xff] }
 0x198   :  { %1431 = vmatpush1.bf16.msra.mxu0 %v3779_v37  ;;  %1472 = vmatpush1.bf16.msra.mxu1 %v3781_v44  ;;  %v5721_v44 = vld [vmem:[#allocation78_spill] sm:$0xff] }
 0x199   :  { %1432 = vmatprep.subr.bf16.mxu0 %v3791_v53  ;;  %1473 = vmatprep.subr.bf16.mxu1 %v3793_v56  ;;  %v5720_v53 = vld [vmem:[#allocation82_spill] sm:$0xff] }
 0x19c   :  { %1433 = vmatpush1.bf16.msra.mxu0 %v5693_v1  ;;  %1474 = vmatpush1.bf16.msra.mxu1 %v5694_v6  ;;  %v5704_v1 = vld [vmem:[#allocation63_spill] sm:$0xff]  ;;  %v5705_v6 = vld [vmem:[#allocation62_spill] sm:$0xff] }
 0x19d   :  { %1434 = vmatprep.subr.bf16.mxu0 %v5695_v33  ;;  %1475 = vmatprep.subr.bf16.mxu1 %v5696_v60  ;;  %v5706_v33 = vld [vmem:[#allocation64_spill] sm:$0xff]  ;;  %v5707_v60 = vld [vmem:[#allocation65_spill] sm:$0xff] }
 0x1a0   :  { %1435 = vmatpush1.bf16.msra.mxu0 %v5697_v7  ;;  %1476 = vmatpush1.bf16.msra.mxu1 %v5698_v16  ;;  %v5708_v7 = vld [vmem:[#allocation66_spill] sm:$0xff]  ;;  %v5709_v16 = vld [vmem:[#allocation67_spill] sm:$0xff] }
 0x1a1   :  { %1436 = vmatprep.subr.bf16.mxu0 %v5699_v46  ;;  %1477 = vmatprep.subr.bf16.mxu1 %v5700_v19  ;;  %v5710_v46 = vld [vmem:[#allocation68_spill] sm:$0xff]  ;;  %v5711_v19 = vld [vmem:[#allocation69_spill] sm:$0xff] }
 0x1a4   :  { %1437 = vmatpush1.bf16.msra.mxu0 %v5701_v62  ;;  %1478 = vmatpush1.bf16.msra.mxu1 %v5702_v48  ;;  %v5712_v62 = vld [vmem:[#allocation70_spill] sm:$0xff]  ;;  %v5713_v48 = vld [vmem:[#allocation71_spill] sm:$0xff] }
 0x1a5   :  { %1438 = vmatprep.subr.bf16.mxu0 %v5703_v5  ;;  %1479 = vmatprep.subr.bf16.mxu1 %v5704_v1  ;;  %v5714_v5 = vld [vmem:[#allocation72_spill] sm:$0xff]  ;;  %v5715_v1 = vld [vmem:[#allocation73_spill] sm:$0xff] }
 0x1a8   :  { %1439 = vmatpush1.bf16.msra.mxu0 %v5705_v6  ;;  %1480 = vmatpush1.bf16.msra.mxu1 %v5706_v33  ;;  %v5716_v6 = vld [vmem:[#allocation74_spill] sm:$0xff]  ;;  %v5717_v33 = vld [vmem:[#allocation77_spill] sm:$0xff] }
 0x1a9   :  { %1440 = vmatprep.subr.bf16.mxu0 %v5707_v60  ;;  %1481 = vmatprep.subr.bf16.mxu1 %v5708_v7  ;;  %v5718_v60 = vld [vmem:[#allocation79_spill] sm:$0xff]  ;;  %v5719_v7 = vld [vmem:[#allocation84_spill] sm:$0xff] }
 0x1aa   :  { %v378_v56 = vadd.f32 %v5718_v60, %v5717_v33 }
 0x1ac   :  { %1441 = vmatpush1.bf16.msra.mxu0 %v5709_v16  ;;  %1482 = vmatpush1.bf16.msra.mxu1 %v5710_v46  ;;  %v451_v16 = vadd.f32 %v5720_v53, %v5719_v7  ;;  %v5722_v46 = vld [vmem:[#allocation80_spill] sm:$0xff] }
 0x1ad   :  { %1442 = vmatprep.subr.bf16.mxu0 %v5711_v19  ;;  %1483 = vmatprep.subr.bf16.mxu1 %v5712_v62  ;;  %v380_v37 = vadd.f32 %v5722_v46, %v5721_v44  ;;  %v5723_v19 = vld [vmem:[#allocation81_spill] sm:$0xff] }
 0x1ae   :  { %v453_v62 = vadd.f32 %v5724_v36, %v5723_v19 }
 0x1b0   :  { %1443 = vmatpush1.bf16.msra.mxu0 %v5713_v48  ;;  %1484 = vmatpush1.bf16.msra.mxu1 %v5714_v5 }
 0x1b1   :  { %1494 = vmatprep.subr.bf16.mxu0 %v5715_v1  ;;  %1535 = vmatprep.subr.bf16.mxu1 %v5716_v6 }
 0x206   :  { %v1220_v32 = vpop.f32.mrb[16].mxu0  ;;  %v1261_v48 = vpop.f32.mrb[16].mxu1 }
 0x207   :  { %v1383_v24 = vadd.f32 %v1220_v32, %v378_v56  ;;  %v1385_v5 = vadd.f32 %v1261_v48, %v451_v16  ;;  %v1222_v23 = vpop.f32.mrb[17].mxu0  ;;  %v1263_v1 = vpop.f32.mrb[17].mxu1 }
 0x208   :  { %v1384_v22 = vadd.f32 %v1222_v23, %v380_v37  ;;  %v1386_v6 = vadd.f32 %v1263_v1, %v453_v62  ;;  %v1224_v18 = vpop.f32.mrb[18].mxu0  ;;  %v1265_v12 = vpop.f32.mrb[18].mxu1  ;;  %v5725_v37 = vld [vmem:[#allocation85_spill] sm:$0xff] }
 0x209   :  { %v3137_v60 = vmul.f32 -1.442695, %v1383_v24  ;;  %v1225_v33 = vpop.f32.mrb[19].mxu0  ;;  %v1266_v11 = vpop.f32.mrb[19].mxu1 }
 0x20a   :  { %v3138_v53 = vmul.f32 -1.442695, %v1384_v22  ;;  %v197_v11 = vld [vmem:[%s5227_s4] sm:$0xf] }
 0x20b   :  { %3264 = vpow2.f32 %v3137_v60  ;;  %v5726_v22 = vld [vmem:[#allocation76_spill] sm:$0xff] }
 0x20c   :  { %3266 = vpow2.f32 %v3138_v53  ;;  %v5727_v24 = vsub.s32 0, %v5726_v22 }
 0x20d   :  { %3268 = vtanh.f32 %v1385_v5 }
 0x20e   :  { %v4247_v62 = vrot.slane %v197_v11, %v5727_v24 }
 0x210   :  { %5728 = vst [vmem:[#allocation79_spill] sm:$0xff] %v4247_v62 }
 0x215   :  { %v3265_v46 = vpop.eup %3264 }
 0x216   :  { %v3267_v44 = vpop.eup %3266  ;;  %v1390_v7 = vadd.f32 1.0, %v3265_v46 }
 0x217   :  { %v1396_v36 = vadd.f32 1.0, %v3267_v44  ;;  %v3269_v32 = vpop.eup %3268  ;;  %v5729_v44 = vsub.s32 1, %v5726_v22 }
 0x218   :  { %3270 = vrcp.f32 %v1390_v7 }
 0x219   :  { %3272 = vrcp.f32 %v1396_v36  ;;  %v4251_v48 = vrot.slane %v197_v11, %v5729_v44  ;;  %v5733_v44 = vsub.s32 2, %v5726_v22 }
 0x21b   :  { %5730 = vst [vmem:[#allocation82_spill] sm:$0xff] %v4251_v48 }
 0x222   :  { %v3271_v56 = vpop.eup %3270 }
 0x223   :  { %v3273_v16 = vpop.eup %3272  ;;  %v1407_v23 = vmul.f32 %v3271_v56, %v3269_v32 }
 0x224   :  { %v1406_v18 = vmul.f32 %v3273_v16, %v5725_v37  ;;  %v5731_v37 = vsub.s32 3, %v5726_v22 }
 0x226   :  { %v4240_v12 = vadd.f32 %v1407_v23, %v1406_v18  ;;  %v4257_v18 = vrot.slane %v197_v11, %v5731_v37 }
 0x228   :  { %5732 = vst [vmem:[#allocation80_spill] sm:$0xff] %v4257_v18 }
 0x246   :  { %v1302_v5 = vpop.f32.mrb[20].mxu0  ;;  %v1343_v1 = vpop.f32.mrb[20].mxu1 }
 0x247   :  { %v1350_v7 = vadd.f32 %v1302_v5, %v4247_v62  ;;  %v1304_v33 = vpop.f32.mrb[21].mxu0  ;;  %v1345_v60 = vpop.f32.mrb[21].mxu1  ;;  %v4262_v5 = vrot.slane %v197_v11, %v5733_v44  ;;  %v3139_v62 = vmul.f32 -1.442695, %v1386_v6 }
 0x248   :  { %v1351_v53 = vadd.f32 %v1304_v33, %v4251_v48  ;;  %v1306_v46 = vpop.f32.mrb[22].mxu0  ;;  %v1347_v36 = vpop.f32.mrb[22].mxu1  ;;  %v1353_v24 = vadd.f32 %v1345_v60, %v4257_v18 }
 0x249   :  { %v3134_v32 = vmul.f32 -1.442695, %v1350_v7  ;;  %v1307_v56 = vpop.f32.mrb[23].mxu0  ;;  %v1348_v16 = vpop.f32.mrb[23].mxu1  ;;  %5734 = vst [vmem:[#allocation83_spill] sm:$0xff] %v4262_v5  ;;  %v1352_v46 = vadd.f32 %v1343_v1, %v4262_v5 }
 0x24a   :  { %v3135_v23 = vmul.f32 -1.442695, %v1351_v53  ;;  %v3136_v33 = vmul.f32 -1.442695, %v1353_v24 }
 0x24b   :  { %3274 = vpow2.f32 %v3134_v32 }
 0x24c   :  { %3276 = vpow2.f32 %v3135_v23 }
 0x24d   :  { %3278 = vpow2.f32 %v3139_v62 }
 0x24e   :  { %3280 = vpow2.f32 %v3136_v33 }
 0x24f   :  { %3282 = vtanh.f32 %v1352_v46 }
 0x255   :  { %v3275_v7 = vpop.eup %3274 }
 0x256   :  { %v3277_v36 = vpop.eup %3276  ;;  %v1357_v53 = vadd.f32 1.0, %v3275_v7 }
 0x257   :  { %v1363_v56 = vadd.f32 1.0, %v3277_v36  ;;  %v3279_v32 = vpop.eup %3278 }
 0x258   :  { %3284 = vrcp.f32 %v1357_v53  ;;  %v3281_v16 = vpop.eup %3280  ;;  %v1403_v22 = vadd.f32 1.0, %v3279_v32  ;;  %v5735_v32 = vld [vmem:[#allocation75_spill] sm:$0xff] }
 0x259   :  { %3286 = vrcp.f32 %v1363_v56  ;;  %v3283_v60 = vpop.eup %3282  ;;  %v1370_v6 = vadd.f32 1.0, %v3281_v16  ;;  %v5736_v16 = vld [vmem:[#allocation86_spill] sm:$0xff] }
 0x25a   :  { %3288 = vtanh.f32 %v4240_v12 }
 0x25b   :  { %3290 = vrcp.f32 %v1403_v22  ;;  %v5739_v22 = vld [vmem:[#allocation89_spill] sm:$0xff] }
 0x25c   :  { %3292 = vrcp.f32 %v1370_v6  ;;  %v5742_v6 = vld [vmem:[#allocation92_spill] sm:$0xff] }
 0x262   :  { %v3285_v23 = vpop.eup %3284 }
 0x263   :  { %v3287_v11 = vpop.eup %3286  ;;  %v1374_v37 = vmul.f32 %v3285_v23, %v3283_v60  ;;  %v5737_v60 = vld [vmem:[#allocation87_spill] sm:$0xff]  ;;  %v5738_v23 = vld [vmem:[#allocation88_spill] sm:$0xff] }
 0x264   :  { %v1373_v24 = vmul.f32 0.0, %v3287_v11  ;;  %v3289_v1 = vpop.eup %3288  ;;  %v5740_v11 = vld [vmem:[#allocation90_spill] sm:$0xff] }
 0x265   :  { %v3291_v44 = vpop.eup %3290 }
 0x266   :  { %v4266_v62 = vadd.f32 %v1374_v37, %v1373_v24  ;;  %v3293_v33 = vpop.eup %3292  ;;  %v1410_v7 = vmul.f32 %v3291_v44, %v3289_v1  ;;  %v5741_v37 = vld [vmem:[#allocation91_spill] sm:$0xff]  ;;  %v5743_v24 = vld [vmem:[#allocation93_spill] sm:$0xff]  ;;  %v5744_v1 = vld [vmem:[#allocation94_spill] sm:$0xff] }
 0x267   :  { %v5745_v44 = vld [vmem:[#allocation95_spill] sm:$0xff] }
 0x268   :  { %3294 = vtanh.f32 %v4266_v62  ;;  %v4269_v56 = vpack.c.bf16 %v1410_v7, %v1410_v7  ;;  %v5748_v7 = vld [vmem:[#allocation98_spill] sm:$0xff] }
 0x272   :  { %v3295_v46 = vpop.eup %3294 }
 0x273   :  { %v1377_v36 = vmul.f32 %v3295_v46, %v3293_v33  ;;  %v5746_v33 = vld [vmem:[#allocation96_spill] sm:$0xff]  ;;  %v5747_v46 = vld [vmem:[#allocation97_spill] sm:$0xff] }
 0x275   :  { %v1378_v53 = vpack.c.bf16 %v1377_v36, %v1377_v36  ;;  %v5749_v36 = vld [vmem:[#allocation99_spill] sm:$0xff] }
 0x277   :  { %1444 = vmatprep.mubr.bf16.mxu0 %v1378_v53  ;;  %1485 = vmatprep.mubr.bf16.mxu1 %v1378_v53 }
 0x278   :  { %1445 = vmatmul.mubr.bf16.vlgmr.msra.gmra.mrb[24].mxu0 %v4269_v56  ;;  %1486 = vmatmul.mubr.bf16.vlgmr.msra.gmra.mrb[24].mxu1 %v4269_v56 }
 0x279   :  { %1495 = vmatpush1.bf16.msra.mxu0 %v3886_v52  ;;  %1536 = vmatpush1.bf16.msra.mxu1 %v5735_v32 }
 0x27a   :  { %1526 = vmatprep.mubr.bf16.mxu0 %v1378_v53  ;;  %1567 = vmatprep.mubr.bf16.mxu1 %v1378_v53  ;;  %v5750_v53 = vld [vmem:[#allocation100_spill] sm:$0xff] }
 0x27b   :  { %1496 = vmatprep.subr.bf16.mxu0 %v5736_v16  ;;  %1537 = vmatprep.subr.bf16.mxu1 %v5737_v60 }
 0x27d   :  { %1497 = vmatpush1.bf16.msra.mxu0 %v5738_v23  ;;  %1538 = vmatpush1.bf16.msra.mxu1 %v5739_v22 }
 0x27e   :  { %1498 = vmatprep.subr.bf16.mxu0 %v5740_v11  ;;  %1539 = vmatprep.subr.bf16.mxu1 %v5741_v37  ;;  %v5751_v11 = vld [vmem:[#allocation101_spill] sm:$0xff]  ;;  %v5752_v37 = vld [vmem:[#allocation102_spill] sm:$0xff] }
 0x281   :  { %1499 = vmatpush1.bf16.msra.mxu0 %v5742_v6  ;;  %1540 = vmatpush1.bf16.msra.mxu1 %v5743_v24  ;;  %v5753_v6 = vld [vmem:[#allocation103_spill] sm:$0xff]  ;;  %v5754_v24 = vld [vmem:[#allocation104_spill] sm:$0xff] }
 0x282   :  { %1500 = vmatprep.subr.bf16.mxu0 %v5744_v1  ;;  %1541 = vmatprep.subr.bf16.mxu1 %v5745_v44  ;;  %v5755_v1 = vld [vmem:[#allocation105_spill] sm:$0xff]  ;;  %v5756_v44 = vld [vmem:[#allocation106_spill] sm:$0xff] }
 0x285   :  { %1501 = vmatpush1.bf16.msra.mxu0 %v5746_v33  ;;  %1542 = vmatpush1.bf16.msra.mxu1 %v5747_v46  ;;  %v5757_v33 = vld [vmem:[#allocation107_spill] sm:$0xff]  ;;  %v5758_v46 = vld [vmem:[#allocation108_spill] sm:$0xff] }
 0x286   :  { %1502 = vmatprep.subr.bf16.mxu0 %v5748_v7  ;;  %1543 = vmatprep.subr.bf16.mxu1 %v5749_v36  ;;  %v5759_v7 = vld [vmem:[#allocation109_spill] sm:$0xff]  ;;  %v5760_v36 = vld [vmem:[#allocation110_spill] sm:$0xff] }
 0x289   :  { %1503 = vmatpush1.bf16.msra.mxu0 %v5750_v53  ;;  %1544 = vmatpush1.bf16.msra.mxu1 %v5751_v11  ;;  %v5761_v53 = vld [vmem:[#allocation111_spill] sm:$0xff]  ;;  %v5762_v11 = vld [vmem:[#allocation112_spill] sm:$0xff] }
 0x28a   :  { %1504 = vmatprep.subr.bf16.mxu0 %v5752_v37  ;;  %1545 = vmatprep.subr.bf16.mxu1 %v5753_v6  ;;  %v5763_v37 = vld [vmem:[#allocation113_spill] sm:$0xff]  ;;  %v5764_v6 = vld [vmem:[#allocation114_spill] sm:$0xff] }
 0x28d   :  { %1505 = vmatpush1.bf16.msra.mxu0 %v5754_v24  ;;  %1546 = vmatpush1.bf16.msra.mxu1 %v5755_v1  ;;  %v5765_v24 = vld [vmem:[#allocation115_spill] sm:$0xff]  ;;  %v5766_v1 = vld [vmem:[#allocation116_spill] sm:$0xff] }
 0x28e   :  { %1506 = vmatprep.subr.bf16.mxu0 %v5756_v44  ;;  %1547 = vmatprep.subr.bf16.mxu1 %v5757_v33  ;;  %v5767_v44 = vld [vmem:[#allocation117_spill] sm:$0xff]  ;;  %v5768_v33 = vld [vmem:[#allocation118_spill] sm:$0xff] }
 0x291   :  { %1507 = vmatpush1.bf16.msra.mxu0 %v5758_v46  ;;  %1548 = vmatpush1.bf16.msra.mxu1 %v5759_v7  ;;  %v5769_v46 = vld [vmem:[#allocation119_spill] sm:$0xff]  ;;  %v5770_v7 = vld [vmem:[#allocation120_spill] sm:$0xff] }
 0x292   :  { %1508 = vmatprep.subr.bf16.mxu0 %v5760_v36  ;;  %1549 = vmatprep.subr.bf16.mxu1 %v5761_v53  ;;  %v5771_v36 = vld [vmem:[#allocation121_spill] sm:$0xff]  ;;  %v5772_v53 = vld [vmem:[#allocation122_spill] sm:$0xff] }
 0x295   :  { %1509 = vmatpush1.bf16.msra.mxu0 %v5762_v11  ;;  %1550 = vmatpush1.bf16.msra.mxu1 %v5763_v37  ;;  %v5773_v11 = vld [vmem:[#allocation123_spill] sm:$0xff]  ;;  %v5774_v37 = vld [vmem:[#allocation124_spill] sm:$0xff] }
 0x296   :  { %1510 = vmatprep.subr.bf16.mxu0 %v5764_v6  ;;  %1551 = vmatprep.subr.bf16.mxu1 %v5765_v24  ;;  %v5775_v6 = vld [vmem:[#allocation125_spill] sm:$0xff]  ;;  %v5776_v24 = vld [vmem:[#allocation126_spill] sm:$0xff] }
 0x299   :  { %1511 = vmatpush1.bf16.msra.mxu0 %v5766_v1  ;;  %1552 = vmatpush1.bf16.msra.mxu1 %v5767_v44  ;;  %v5777_v1 = vld [vmem:[#allocation127_spill] sm:$0xff]  ;;  %v5778_v44 = vld [vmem:[#allocation128_spill] sm:$0xff] }
 0x29a   :  { %1512 = vmatprep.subr.bf16.mxu0 %v5768_v33  ;;  %1553 = vmatprep.subr.bf16.mxu1 %v5769_v46  ;;  %v5779_v33 = vld [vmem:[#allocation129_spill] sm:$0xff]  ;;  %v5780_v46 = vld [vmem:[#allocation130_spill] sm:$0xff] }
 0x29d   :  { %1513 = vmatpush1.bf16.msra.mxu0 %v5770_v7  ;;  %1554 = vmatpush1.bf16.msra.mxu1 %v5771_v36  ;;  %v5781_v7 = vld [vmem:[#allocation131_spill] sm:$0xff] }
 0x29e   :  { %1514 = vmatprep.subr.bf16.mxu0 %v5772_v53  ;;  %1555 = vmatprep.subr.bf16.mxu1 %v5773_v11 }
 0x2a1   :  { %1515 = vmatpush1.bf16.msra.mxu0 %v5774_v37  ;;  %1556 = vmatpush1.bf16.msra.mxu1 %v5775_v6  ;;  %v5782_v37 = vld [vmem:[#allocation135_spill] sm:$0xff]  ;;  %v5783_v6 = vld [vmem:[#allocation136_spill] sm:$0xff] }
 0x2a2   :  { %1516 = vmatprep.subr.bf16.mxu0 %v5776_v24  ;;  %1557 = vmatprep.subr.bf16.mxu1 %v5777_v1 }
 0x2a5   :  { %1517 = vmatpush1.bf16.msra.mxu0 %v5778_v44  ;;  %1558 = vmatpush1.bf16.msra.mxu1 %v5779_v33  ;;  %v5784_v44 = vld [vmem:[#allocation139_spill] sm:$0xff]  ;;  %v5785_v33 = vld [vmem:[#allocation140_spill] sm:$0xff] }
 0x2a6   :  { %1518 = vmatprep.subr.bf16.mxu0 %v5780_v46  ;;  %1559 = vmatprep.subr.bf16.mxu1 %v5781_v7 }
 0x2a9   :  { %1519 = vmatpush1.bf16.msra.mxu0 %v4071_v29  ;;  %1560 = vmatpush1.bf16.msra.mxu1 %v4073_v9 }
 0x2aa   :  { %1520 = vmatprep.subr.bf16.mxu0 %v4077_v14  ;;  %1561 = vmatprep.subr.bf16.mxu1 %v5782_v37 }
 0x2ad   :  { %1521 = vmatpush1.bf16.msra.mxu0 %v5783_v6  ;;  %1562 = vmatpush1.bf16.msra.mxu1 %v4085_v61 }
 0x2ae   :  { %1522 = vmatprep.subr.bf16.mxu0 %v4089_v25  ;;  %1563 = vmatprep.subr.bf16.mxu1 %v5784_v44 }
 0x2b1   :  { %1523 = vmatpush1.bf16.msra.mxu0 %v5785_v33  ;;  %1564 = vmatpush1.bf16.msra.mxu1 %v4097_v28 }
 0x2b2   :  { %1524 = vmatprep.subr.bf16.mxu0 %v4101_v13  ;;  %1565 = vmatprep.subr.bf16.mxu1 %v4103_v0 }
 0x2b5   :  { %1525 = vmatpush1.bf16.msra.mxu0 %v4109_v45  ;;  %1566 = vmatpush1.bf16.msra.mxu1 %v4111_v54 }
 0x2b6   :  { %1638 = vmatprep.subr.bf16.mxu0 %v3663_v15  ;;  %1679 = vmatprep.subr.bf16.mxu1 %v3667_v20 }
 0x2b8   :  { %1527 = vmatmul.mubr.bf16.vlgmr.msra.gmra.mrb[28].mxu0 %v4269_v56  ;;  %1568 = vmatmul.mubr.bf16.vlgmr.msra.gmra.mrb[28].mxu1 %v4269_v56  ;;  %v5786_v56 = vld [vmem:[#allocation39_spill] sm:$0xff] }
 0x2b9   :  { %1639 = vmatpush1.bf16.msra.mxu0 %v3665_v17  ;;  %1680 = vmatpush1.bf16.msra.mxu1 %v3674_v26 }
 0x2ba   :  { %1640 = vmatprep.subr.bf16.mxu0 %v3669_v21  ;;  %1681 = vmatprep.subr.bf16.mxu1 %v3680_v30 }
 0x2bd   :  { %1641 = vmatpush1.bf16.msra.mxu0 %v3676_v27  ;;  %1682 = vmatpush1.bf16.msra.mxu1 %v3688_v34 }
 0x2be   :  { %1642 = vmatprep.subr.bf16.mxu0 %v3682_v31  ;;  %1683 = vmatprep.subr.bf16.mxu1 %v3694_v38 }
 0x2c1   :  { %1643 = vmatpush1.bf16.msra.mxu0 %v3690_v35  ;;  %1684 = vmatpush1.bf16.msra.mxu1 %v3701_v40 }
 0x2c2   :  { %1644 = vmatprep.subr.bf16.mxu0 %v3696_v39  ;;  %1685 = vmatprep.subr.bf16.mxu1 %v3707_v42 }
 0x2c5   :  { %1645 = vmatpush1.bf16.msra.mxu0 %v3703_v41  ;;  %1686 = vmatpush1.bf16.msra.mxu1 %v3711_v43 }
 0x2c6   :  { %1646 = vmatprep.subr.bf16.mxu0 %v3715_v47  ;;  %1687 = vmatprep.subr.bf16.mxu1 %v3717_v49  ;;  %v5826_v49 = vld [vmem:[#allocation78_spill] sm:$0xff] }
 0x2c9   :  { %1647 = vmatpush1.bf16.msra.mxu0 %v3719_v50  ;;  %1688 = vmatpush1.bf16.msra.mxu1 %v3721_v51  ;;  %v5825_v50 = vld [vmem:[#allocation148_spill] sm:$0xff] }
 0x2ca   :  { %1648 = vmatprep.subr.bf16.mxu0 %v3727_v55  ;;  %1689 = vmatprep.subr.bf16.mxu1 %v3729_v57  ;;  %v5787_v55 = vld [vmem:[#allocation40_spill] sm:$0xff]  ;;  %v5788_v57 = vld [vmem:[#allocation41_spill] sm:$0xff] }
 0x2cd   :  { %1649 = vmatpush1.bf16.msra.mxu0 %v3731_v58  ;;  %1690 = vmatpush1.bf16.msra.mxu1 %v3733_v59  ;;  %v5789_v58 = vld [vmem:[#allocation42_spill] sm:$0xff]  ;;  %v5790_v59 = vld [vmem:[#allocation43_spill] sm:$0xff] }
 0x2ce   :  { %1650 = vmatprep.subr.bf16.mxu0 %v3739_v63  ;;  %1691 = vmatprep.subr.bf16.mxu1 %v3741_v2  ;;  %v5791_v63 = vld [vmem:[#allocation44_spill] sm:$0xff]  ;;  %v5792_v2 = vld [vmem:[#allocation45_spill] sm:$0xff] }
 0x2d1   :  { %1651 = vmatpush1.bf16.msra.mxu0 %v3743_v3  ;;  %1692 = vmatpush1.bf16.msra.mxu1 %v3745_v4  ;;  %v5793_v3 = vld [vmem:[#allocation46_spill] sm:$0xff]  ;;  %v5794_v4 = vld [vmem:[#allocation47_spill] sm:$0xff] }
 0x2d2   :  { %1652 = vmatprep.subr.bf16.mxu0 %v3751_v8  ;;  %1693 = vmatprep.subr.bf16.mxu1 %v3753_v10  ;;  %v5795_v8 = vld [vmem:[#allocation48_spill] sm:$0xff]  ;;  %v5796_v10 = vld [vmem:[#allocation49_spill] sm:$0xff] }
 0x2d5   :  { %1653 = vmatpush1.bf16.msra.mxu0 %v5786_v56  ;;  %1694 = vmatpush1.bf16.msra.mxu1 %v5787_v55  ;;  %v5797_v56 = vld [vmem:[#allocation50_spill] sm:$0xff]  ;;  %v5798_v55 = vld [vmem:[#allocation51_spill] sm:$0xff] }
 0x2d6   :  { %1654 = vmatprep.subr.bf16.mxu0 %v5788_v57  ;;  %1695 = vmatprep.subr.bf16.mxu1 %v5789_v58  ;;  %v5799_v57 = vld [vmem:[#allocation52_spill] sm:$0xff]  ;;  %v5800_v58 = vld [vmem:[#allocation53_spill] sm:$0xff] }
 0x2d9   :  { %1655 = vmatpush1.bf16.msra.mxu0 %v5790_v59  ;;  %1696 = vmatpush1.bf16.msra.mxu1 %v5791_v63  ;;  %v5801_v59 = vld [vmem:[#allocation54_spill] sm:$0xff]  ;;  %v5802_v63 = vld [vmem:[#allocation55_spill] sm:$0xff] }
 0x2da   :  { %1656 = vmatprep.subr.bf16.mxu0 %v5792_v2  ;;  %1697 = vmatprep.subr.bf16.mxu1 %v5793_v3  ;;  %v5803_v2 = vld [vmem:[#allocation56_spill] sm:$0xff]  ;;  %v5804_v3 = vld [vmem:[#allocation57_spill] sm:$0xff] }
 0x2dd   :  { %1657 = vmatpush1.bf16.msra.mxu0 %v5794_v4  ;;  %1698 = vmatpush1.bf16.msra.mxu1 %v5795_v8  ;;  %v5805_v4 = vld [vmem:[#allocation58_spill] sm:$0xff]  ;;  %v5806_v8 = vld [vmem:[#allocation59_spill] sm:$0xff] }
 0x2de   :  { %1658 = vmatprep.subr.bf16.mxu0 %v5796_v10  ;;  %1699 = vmatprep.subr.bf16.mxu1 %v5797_v56  ;;  %v5807_v10 = vld [vmem:[#allocation60_spill] sm:$0xff]  ;;  %v5808_v56 = vld [vmem:[#allocation61_spill] sm:$0xff] }
 0x2e1   :  { %1659 = vmatpush1.bf16.msra.mxu0 %v5798_v55  ;;  %1700 = vmatpush1.bf16.msra.mxu1 %v5799_v57  ;;  %v5809_v55 = vld [vmem:[#allocation63_spill] sm:$0xff]  ;;  %v5810_v57 = vld [vmem:[#allocation62_spill] sm:$0xff] }
 0x2e2   :  { %1660 = vmatprep.subr.bf16.mxu0 %v5800_v58  ;;  %1701 = vmatprep.subr.bf16.mxu1 %v5801_v59  ;;  %v5811_v58 = vld [vmem:[#allocation64_spill] sm:$0xff]  ;;  %v5812_v59 = vld [vmem:[#allocation65_spill] sm:$0xff] }
 0x2e5   :  { %1661 = vmatpush1.bf16.msra.mxu0 %v5802_v63  ;;  %1702 = vmatpush1.bf16.msra.mxu1 %v5803_v2  ;;  %v5813_v63 = vld [vmem:[#allocation66_spill] sm:$0xff]  ;;  %v5814_v2 = vld [vmem:[#allocation67_spill] sm:$0xff] }
 0x2e6   :  { %1662 = vmatprep.subr.bf16.mxu0 %v5804_v3  ;;  %1703 = vmatprep.subr.bf16.mxu1 %v5805_v4  ;;  %v5815_v3 = vld [vmem:[#allocation68_spill] sm:$0xff]  ;;  %v5816_v4 = vld [vmem:[#allocation69_spill] sm:$0xff] }
 0x2e9   :  { %1663 = vmatpush1.bf16.msra.mxu0 %v5806_v8  ;;  %1704 = vmatpush1.bf16.msra.mxu1 %v5807_v10  ;;  %v5817_v8 = vld [vmem:[#allocation70_spill] sm:$0xff]  ;;  %v5818_v10 = vld [vmem:[#allocation71_spill] sm:$0xff] }
 0x2ea   :  { %1664 = vmatprep.subr.bf16.mxu0 %v5808_v56  ;;  %1705 = vmatprep.subr.bf16.mxu1 %v5809_v55  ;;  %v5819_v56 = vld [vmem:[#allocation72_spill] sm:$0xff]  ;;  %v5820_v55 = vld [vmem:[#allocation73_spill] sm:$0xff] }
 0x2ed   :  { %1665 = vmatpush1.bf16.msra.mxu0 %v5810_v57  ;;  %1706 = vmatpush1.bf16.msra.mxu1 %v5811_v58  ;;  %v5821_v57 = vld [vmem:[#allocation74_spill] sm:$0xff]  ;;  %v5822_v58 = vld [vmem:[#allocation77_spill] sm:$0xff] }
 0x2ee   :  { %1666 = vmatprep.subr.bf16.mxu0 %v5812_v59  ;;  %1707 = vmatprep.subr.bf16.mxu1 %v5813_v63  ;;  %v5823_v59 = vld [vmem:[#allocation144_spill] sm:$0xff] }
 0x2ef   :  { %v384_v51 = vadd.f32 %v5823_v59, %v5822_v58  ;;  %v5824_v63 = vld [vmem:[#allocation84_spill] sm:$0xff] }
 0x2f1   :  { %1667 = vmatpush1.bf16.msra.mxu0 %v5814_v2  ;;  %1708 = vmatpush1.bf16.msra.mxu1 %v5815_v3  ;;  %v457_v2 = vadd.f32 %v5825_v50, %v5824_v63  ;;  %v5827_v3 = vld [vmem:[#allocation147_spill] sm:$0xff] }
 0x2f2   :  { %1668 = vmatprep.subr.bf16.mxu0 %v5816_v4  ;;  %1709 = vmatprep.subr.bf16.mxu1 %v5817_v8  ;;  %v386_v47 = vadd.f32 %v5827_v3, %v5826_v49  ;;  %v5828_v4 = vld [vmem:[#allocation150_spill] sm:$0xff] }
 0x2f3   :  { %v459_v8 = vadd.f32 %v5828_v4, %v5723_v19 }
 0x2f5   :  { %1669 = vmatpush1.bf16.msra.mxu0 %v5818_v10  ;;  %1710 = vmatpush1.bf16.msra.mxu1 %v5819_v56 }
 0x2f6   :  { %1720 = vmatprep.subr.bf16.mxu0 %v5820_v55  ;;  %1761 = vmatprep.subr.bf16.mxu1 %v5821_v57 }
 0x34b   :  { %v1446_v43 = vpop.f32.mrb[24].mxu0  ;;  %v1487_v10 = vpop.f32.mrb[24].mxu1 }
 0x34c   :  { %v1609_v41 = vadd.f32 %v1446_v43, %v384_v51  ;;  %v1611_v56 = vadd.f32 %v1487_v10, %v457_v2  ;;  %v1448_v42 = vpop.f32.mrb[25].mxu0  ;;  %v1489_v55 = vpop.f32.mrb[25].mxu1 }
 0x34d   :  { %v1610_v39 = vadd.f32 %v1448_v42, %v386_v47  ;;  %v1612_v57 = vadd.f32 %v1489_v55, %v459_v8  ;;  %v1450_v40 = vpop.f32.mrb[26].mxu0  ;;  %v1491_v35 = vpop.f32.mrb[26].mxu1 }
 0x34e   :  { %v3143_v59 = vmul.f32 -1.442695, %v1609_v41  ;;  %v1451_v58 = vpop.f32.mrb[27].mxu0  ;;  %v1492_v38 = vpop.f32.mrb[27].mxu1 }
 0x34f   :  { %v3144_v50 = vmul.f32 -1.442695, %v1610_v39  ;;  %v5829_v39 = vld [vmem:[#allocation79_spill] sm:$0xff] }
 0x350   :  { %3296 = vpow2.f32 %v3143_v59 }
 0x351   :  { %3298 = vpow2.f32 %v3144_v50 }
 0x352   :  { %3300 = vtanh.f32 %v1611_v56 }
 0x35a   :  { %v3297_v3 = vpop.eup %3296 }
 0x35b   :  { %v3299_v49 = vpop.eup %3298  ;;  %v1616_v63 = vadd.f32 1.0, %v3297_v3  ;;  %v3145_v3 = vmul.f32 -1.442695, %v1612_v57 }
 0x35c   :  { %v1622_v4 = vadd.f32 1.0, %v3299_v49  ;;  %v3301_v43 = vpop.eup %3300 }
 0x35d   :  { %3302 = vrcp.f32 %v1616_v63 }
 0x35e   :  { %3304 = vrcp.f32 %v1622_v4 }
 0x367   :  { %v3303_v51 = vpop.eup %3302 }
 0x368   :  { %v3305_v2 = vpop.eup %3304  ;;  %v1633_v42 = vmul.f32 %v3303_v51, %v3301_v43 }
 0x369   :  { %v1632_v40 = vmul.f32 %v3305_v2, %v4240_v12 }
 0x36b   :  { %v4412_v35 = vadd.f32 %v1633_v42, %v1632_v40 }
 0x38b   :  { %v1528_v41 = vpop.f32.mrb[28].mxu0  ;;  %v1569_v38 = vpop.f32.mrb[28].mxu1 }
 0x38c   :  { %v1576_v47 = vadd.f32 %v1528_v41, %v5829_v39  ;;  %v1530_v55 = vpop.f32.mrb[29].mxu0  ;;  %v1571_v58 = vpop.f32.mrb[29].mxu1  ;;  %v1578_v43 = vadd.f32 %v1569_v38, %v4262_v5 }
 0x38d   :  { %v1577_v8 = vadd.f32 %v1530_v55, %v4251_v48  ;;  %v1532_v10 = vpop.f32.mrb[30].mxu0  ;;  %v1573_v49 = vpop.f32.mrb[30].mxu1  ;;  %v1579_v12 = vadd.f32 %v1571_v58, %v4257_v18 }
 0x38e   :  { %v3140_v63 = vmul.f32 -1.442695, %v1576_v47  ;;  %v1533_v56 = vpop.f32.mrb[31].mxu0  ;;  %v1574_v59 = vpop.f32.mrb[31].mxu1 }
 0x38f   :  { %v3141_v50 = vmul.f32 -1.442695, %v1577_v8  ;;  %v3142_v4 = vmul.f32 -1.442695, %v1579_v12 }
 0x390   :  { %3306 = vpow2.f32 %v3140_v63 }
 0x391   :  { %3308 = vpow2.f32 %v3141_v50 }
 0x392   :  { %3310 = vpow2.f32 %v3145_v3 }
 0x393   :  { %3312 = vpow2.f32 %v3142_v4 }
 0x394   :  { %3314 = vtanh.f32 %v1578_v43 }
 0x39a   :  { %v3307_v51 = vpop.eup %3306 }
 0x39b   :  { %v3309_v2 = vpop.eup %3308  ;;  %v1583_v42 = vadd.f32 1.0, %v3307_v51 }
 0x39c   :  { %v1589_v40 = vadd.f32 1.0, %v3309_v2  ;;  %v3311_v41 = vpop.eup %3310  ;;  %v5831_v2 = vld [vmem:[#allocation91_spill] sm:$0xff] }
 0x39d   :  { %3316 = vrcp.f32 %v1583_v42  ;;  %v3313_v47 = vpop.eup %3312  ;;  %v1629_v10 = vadd.f32 1.0, %v3311_v41  ;;  %v5832_v42 = vld [vmem:[#allocation92_spill] sm:$0xff]  ;;  %v5834_v41 = vld [vmem:[#allocation94_spill] sm:$0xff] }
 0x39e   :  { %3318 = vrcp.f32 %v1589_v40  ;;  %v3315_v55 = vpop.eup %3314  ;;  %v1596_v57 = vadd.f32 1.0, %v3313_v47  ;;  %v5833_v40 = vld [vmem:[#allocation93_spill] sm:$0xff]  ;;  %v5835_v47 = vld [vmem:[#allocation95_spill] sm:$0xff] }
 0x39f   :  { %3320 = vtanh.f32 %v4412_v35 }
 0x3a0   :  { %3322 = vrcp.f32 %v1629_v10  ;;  %v5838_v10 = vld [vmem:[#allocation98_spill] sm:$0xff] }
 0x3a1   :  { %3324 = vrcp.f32 %v1596_v57  ;;  %v5841_v57 = vld [vmem:[#allocation101_spill] sm:$0xff] }
 0x3a7   :  { %v3317_v8 = vpop.eup %3316 }
 0x3a8   :  { %v3319_v49 = vpop.eup %3318  ;;  %v1600_v58 = vmul.f32 %v3317_v8, %v3315_v55  ;;  %v5836_v55 = vld [vmem:[#allocation96_spill] sm:$0xff]  ;;  %v5837_v8 = vld [vmem:[#allocation97_spill] sm:$0xff] }
 0x3a9   :  { %v1599_v63 = vmul.f32 %v3319_v49, %v4266_v62  ;;  %v3321_v56 = vpop.eup %3320  ;;  %v5830_v62 = vld [vmem:[#allocation90_spill] sm:$0xff]  ;;  %v5839_v49 = vld [vmem:[#allocation99_spill] sm:$0xff] }
 0x3aa   :  { %v3323_v59 = vpop.eup %3322 }
 0x3ab   :  { %v4420_v38 = vadd.f32 %v1600_v58, %v1599_v63  ;;  %v3325_v50 = vpop.eup %3324  ;;  %v1636_v3 = vmul.f32 %v3323_v59, %v3321_v56  ;;  %v5840_v58 = vld [vmem:[#allocation100_spill] sm:$0xff]  ;;  %v5842_v63 = vld [vmem:[#allocation102_spill] sm:$0xff]  ;;  %v5843_v56 = vld [vmem:[#allocation103_spill] sm:$0xff] }
 0x3ac   :  { %v5844_v59 = vld [vmem:[#allocation104_spill] sm:$0xff] }
 0x3ad   :  { %3326 = vtanh.f32 %v4420_v38  ;;  %v4423_v51 = vpack.c.bf16 %v1636_v3, %v1636_v3  ;;  %v5847_v3 = vld [vmem:[#allocation107_spill] sm:$0xff] }
 0x3b7   :  { %v3327_v12 = vpop.eup %3326 }
 0x3b8   :  { %v1603_v4 = vmul.f32 %v3327_v12, %v3325_v50  ;;  %v5845_v50 = vld [vmem:[#allocation105_spill] sm:$0xff]  ;;  %v5846_v12 = vld [vmem:[#allocation106_spill] sm:$0xff] }
 0x3ba   :  { %v1604_v43 = vpack.c.bf16 %v1603_v4, %v1603_v4  ;;  %v5848_v4 = vld [vmem:[#allocation108_spill] sm:$0xff] }
 0x3bc   :  { %1670 = vmatprep.mubr.bf16.mxu0 %v1604_v43  ;;  %1711 = vmatprep.mubr.bf16.mxu1 %v1604_v43 }
 0x3bd   :  { %1671 = vmatmul.mubr.bf16.vlgmr.msra.gmra.mrb[32].mxu0 %v4423_v51  ;;  %1712 = vmatmul.mubr.bf16.vlgmr.msra.gmra.mrb[32].mxu1 %v4423_v51 }
 0x3be   :  { %1721 = vmatpush1.bf16.msra.mxu0 %v3886_v52  ;;  %1762 = vmatpush1.bf16.msra.mxu1 %v5735_v32 }
 0x3bf   :  { %1752 = vmatprep.mubr.bf16.mxu0 %v1604_v43  ;;  %1793 = vmatprep.mubr.bf16.mxu1 %v1604_v43  ;;  %v5849_v43 = vld [vmem:[#allocation109_spill] sm:$0xff] }
 0x3c0   :  { %1722 = vmatprep.subr.bf16.mxu0 %v5736_v16  ;;  %1763 = vmatprep.subr.bf16.mxu1 %v5737_v60 }
 0x3c2   :  { %1723 = vmatpush1.bf16.msra.mxu0 %v5738_v23  ;;  %1764 = vmatpush1.bf16.msra.mxu1 %v5739_v22 }
 0x3c3   :  { %1724 = vmatprep.subr.bf16.mxu0 %v5830_v62  ;;  %1765 = vmatprep.subr.bf16.mxu1 %v5831_v2 }
 0x3c6   :  { %1725 = vmatpush1.bf16.msra.mxu0 %v5832_v42  ;;  %1766 = vmatpush1.bf16.msra.mxu1 %v5833_v40 }
 0x3c7   :  { %1726 = vmatprep.subr.bf16.mxu0 %v5834_v41  ;;  %1767 = vmatprep.subr.bf16.mxu1 %v5835_v47 }
 0x3ca   :  { %1727 = vmatpush1.bf16.msra.mxu0 %v5836_v55  ;;  %1768 = vmatpush1.bf16.msra.mxu1 %v5837_v8 }
 0x3cb   :  { %1728 = vmatprep.subr.bf16.mxu0 %v5838_v10  ;;  %1769 = vmatprep.subr.bf16.mxu1 %v5839_v49  ;;  %v5850_v49 = vld [vmem:[#allocation110_spill] sm:$0xff] }
 0x3ce   :  { %1729 = vmatpush1.bf16.msra.mxu0 %v5840_v58  ;;  %1770 = vmatpush1.bf16.msra.mxu1 %v5841_v57  ;;  %v5851_v58 = vld [vmem:[#allocation111_spill] sm:$0xff]  ;;  %v5852_v57 = vld [vmem:[#allocation112_spill] sm:$0xff] }
 0x3cf   :  { %1730 = vmatprep.subr.bf16.mxu0 %v5842_v63  ;;  %1771 = vmatprep.subr.bf16.mxu1 %v5843_v56  ;;  %v5853_v63 = vld [vmem:[#allocation113_spill] sm:$0xff]  ;;  %v5854_v56 = vld [vmem:[#allocation114_spill] sm:$0xff] }
 0x3d2   :  { %1731 = vmatpush1.bf16.msra.mxu0 %v5844_v59  ;;  %1772 = vmatpush1.bf16.msra.mxu1 %v5845_v50  ;;  %v5855_v59 = vld [vmem:[#allocation115_spill] sm:$0xff]  ;;  %v5856_v50 = vld [vmem:[#allocation116_spill] sm:$0xff] }
 0x3d3   :  { %1732 = vmatprep.subr.bf16.mxu0 %v5846_v12  ;;  %1773 = vmatprep.subr.bf16.mxu1 %v5847_v3  ;;  %v5857_v12 = vld [vmem:[#allocation117_spill] sm:$0xff]  ;;  %v5858_v3 = vld [vmem:[#allocation118_spill] sm:$0xff] }
 0x3d6   :  { %1733 = vmatpush1.bf16.msra.mxu0 %v5848_v4  ;;  %1774 = vmatpush1.bf16.msra.mxu1 %v5849_v43  ;;  %v5859_v4 = vld [vmem:[#allocation119_spill] sm:$0xff]  ;;  %v5860_v43 = vld [vmem:[#allocation120_spill] sm:$0xff] }
 0x3d7   :  { %1734 = vmatprep.subr.bf16.mxu0 %v5850_v49  ;;  %1775 = vmatprep.subr.bf16.mxu1 %v5851_v58 }
 0x3da   :  { %1735 = vmatpush1.bf16.msra.mxu0 %v5852_v57  ;;  %1776 = vmatpush1.bf16.msra.mxu1 %v5853_v63  ;;  %v5861_v63 = vld [vmem:[#allocation124_spill] sm:$0xff] }
 0x3db   :  { %1736 = vmatprep.subr.bf16.mxu0 %v5854_v56  ;;  %1777 = vmatprep.subr.bf16.mxu1 %v5855_v59  ;;  %v5862_v56 = vld [vmem:[#allocation125_spill] sm:$0xff] }
 0x3de   :  { %1737 = vmatpush1.bf16.msra.mxu0 %v5856_v50  ;;  %1778 = vmatpush1.bf16.msra.mxu1 %v5857_v12  ;;  %v5863_v12 = vld [vmem:[#allocation128_spill] sm:$0xff] }
 0x3df   :  { %1738 = vmatprep.subr.bf16.mxu0 %v5858_v3  ;;  %1779 = vmatprep.subr.bf16.mxu1 %v5859_v4  ;;  %v5864_v3 = vld [vmem:[#allocation129_spill] sm:$0xff] }
 0x3e2   :  { %1739 = vmatpush1.bf16.msra.mxu0 %v5860_v43  ;;  %1780 = vmatpush1.bf16.msra.mxu1 %v5771_v36 }
 0x3e3   :  { %1740 = vmatprep.subr.bf16.mxu0 %v5772_v53  ;;  %1781 = vmatprep.subr.bf16.mxu1 %v5773_v11 }
 0x3e6   :  { %1741 = vmatpush1.bf16.msra.mxu0 %v5861_v63  ;;  %1782 = vmatpush1.bf16.msra.mxu1 %v5862_v56 }
 0x3e7   :  { %1742 = vmatprep.subr.bf16.mxu0 %v5776_v24  ;;  %1783 = vmatprep.subr.bf16.mxu1 %v5777_v1 }
 0x3ea   :  { %1743 = vmatpush1.bf16.msra.mxu0 %v5863_v12  ;;  %1784 = vmatpush1.bf16.msra.mxu1 %v5864_v3 }
 0x3eb   :  { %1744 = vmatprep.subr.bf16.mxu0 %v5780_v46  ;;  %1785 = vmatprep.subr.bf16.mxu1 %v5781_v7 }
 0x3ee   :  { %1745 = vmatpush1.bf16.msra.mxu0 %v4071_v29  ;;  %1786 = vmatpush1.bf16.msra.mxu1 %v4073_v9 }
 0x3ef   :  { %1746 = vmatprep.subr.bf16.mxu0 %v4077_v14  ;;  %1787 = vmatprep.subr.bf16.mxu1 %v5782_v37 }
 0x3f2   :  { %1747 = vmatpush1.bf16.msra.mxu0 %v5783_v6  ;;  %1788 = vmatpush1.bf16.msra.mxu1 %v4085_v61 }
 0x3f3   :  { %1748 = vmatprep.subr.bf16.mxu0 %v4089_v25  ;;  %1789 = vmatprep.subr.bf16.mxu1 %v5784_v44 }
 0x3f6   :  { %1749 = vmatpush1.bf16.msra.mxu0 %v5785_v33  ;;  %1790 = vmatpush1.bf16.msra.mxu1 %v4097_v28 }
 0x3f7   :  { %1750 = vmatprep.subr.bf16.mxu0 %v4101_v13  ;;  %1791 = vmatprep.subr.bf16.mxu1 %v4103_v0  ;;  %v5925_v0 = vld [vmem:[#allocation152_spill] sm:$0xff]  ;;  %v5926_v13 = vld [vmem:[#allocation78_spill] sm:$0xff] }
 0x3fa   :  { %1751 = vmatpush1.bf16.msra.mxu0 %v4109_v45  ;;  %1792 = vmatpush1.bf16.msra.mxu1 %v4111_v54  ;;  %v5867_v54 = vld [vmem:[#allocation21_spill] sm:$0xff] }
 0x3fb   :  { %1864 = vmatprep.subr.bf16.mxu0 %v3663_v15  ;;  %1905 = vmatprep.subr.bf16.mxu1 %v3667_v20  ;;  %v5865_v15 = vld [vmem:[#allocation19_spill] sm:$0xff]  ;;  %v5866_v20 = vld [vmem:[#allocation18_spill] sm:$0xff] }
 0x3fd   :  { %1753 = vmatmul.mubr.bf16.vlgmr.msra.gmra.mrb[36].mxu0 %v4423_v51  ;;  %1794 = vmatmul.mubr.bf16.vlgmr.msra.gmra.mrb[36].mxu1 %v4423_v51  ;;  %v5868_v51 = vld [vmem:[#allocation20_spill] sm:$0xff] }
 0x3fe   :  { %1865 = vmatpush1.bf16.msra.mxu0 %v3665_v17  ;;  %1906 = vmatpush1.bf16.msra.mxu1 %v3674_v26  ;;  %v5869_v17 = vld [vmem:[#allocation23_spill] sm:$0xff]  ;;  %v5870_v26 = vld [vmem:[#allocation22_spill] sm:$0xff] }
 0x3ff   :  { %1866 = vmatprep.subr.bf16.mxu0 %v3669_v21  ;;  %1907 = vmatprep.subr.bf16.mxu1 %v3680_v30  ;;  %v5871_v21 = vld [vmem:[#allocation24_spill] sm:$0xff]  ;;  %v5872_v30 = vld [vmem:[#allocation25_spill] sm:$0xff] }
 0x402   :  { %1867 = vmatpush1.bf16.msra.mxu0 %v3676_v27  ;;  %1908 = vmatpush1.bf16.msra.mxu1 %v3688_v34  ;;  %v5873_v27 = vld [vmem:[#allocation26_spill] sm:$0xff]  ;;  %v5874_v34 = vld [vmem:[#allocation27_spill] sm:$0xff] }
 0x403   :  { %1868 = vmatprep.subr.bf16.mxu0 %v3682_v31  ;;  %1909 = vmatprep.subr.bf16.mxu1 %v5865_v15  ;;  %v5875_v31 = vld [vmem:[#allocation28_spill] sm:$0xff]  ;;  %v5876_v15 = vld [vmem:[#allocation29_spill] sm:$0xff] }
 0x406   :  { %1869 = vmatpush1.bf16.msra.mxu0 %v5866_v20  ;;  %1910 = vmatpush1.bf16.msra.mxu1 %v5867_v54  ;;  %v5877_v20 = vld [vmem:[#allocation30_spill] sm:$0xff]  ;;  %v5878_v54 = vld [vmem:[#allocation31_spill] sm:$0xff] }
 0x407   :  { %1870 = vmatprep.subr.bf16.mxu0 %v5868_v51  ;;  %1911 = vmatprep.subr.bf16.mxu1 %v5869_v17  ;;  %v5879_v51 = vld [vmem:[#allocation32_spill] sm:$0xff]  ;;  %v5880_v17 = vld [vmem:[#allocation33_spill] sm:$0xff] }
 0x40a   :  { %1871 = vmatpush1.bf16.msra.mxu0 %v5870_v26  ;;  %1912 = vmatpush1.bf16.msra.mxu1 %v5871_v21  ;;  %v5881_v26 = vld [vmem:[#allocation34_spill] sm:$0xff]  ;;  %v5882_v21 = vld [vmem:[#allocation35_spill] sm:$0xff] }
 0x40b   :  { %1872 = vmatprep.subr.bf16.mxu0 %v5872_v30  ;;  %1913 = vmatprep.subr.bf16.mxu1 %v5873_v27  ;;  %v5883_v30 = vld [vmem:[#allocation36_spill] sm:$0xff]  ;;  %v5884_v27 = vld [vmem:[#allocation37_spill] sm:$0xff] }
 0x40e   :  { %1873 = vmatpush1.bf16.msra.mxu0 %v5874_v34  ;;  %1914 = vmatpush1.bf16.msra.mxu1 %v5875_v31  ;;  %v5885_v34 = vld [vmem:[#allocation38_spill] sm:$0xff]  ;;  %v5886_v31 = vld [vmem:[#allocation39_spill] sm:$0xff] }
 0x40f   :  { %1874 = vmatprep.subr.bf16.mxu0 %v5876_v15  ;;  %1915 = vmatprep.subr.bf16.mxu1 %v5877_v20  ;;  %v5887_v15 = vld [vmem:[#allocation40_spill] sm:$0xff]  ;;  %v5888_v20 = vld [vmem:[#allocation41_spill] sm:$0xff] }
 0x412   :  { %1875 = vmatpush1.bf16.msra.mxu0 %v5878_v54  ;;  %1916 = vmatpush1.bf16.msra.mxu1 %v5879_v51  ;;  %v5889_v54 = vld [vmem:[#allocation42_spill] sm:$0xff]  ;;  %v5890_v51 = vld [vmem:[#allocation43_spill] sm:$0xff] }
 0x413   :  { %1876 = vmatprep.subr.bf16.mxu0 %v5880_v17  ;;  %1917 = vmatprep.subr.bf16.mxu1 %v5881_v26  ;;  %v5891_v17 = vld [vmem:[#allocation44_spill] sm:$0xff]  ;;  %v5892_v26 = vld [vmem:[#allocation45_spill] sm:$0xff] }
 0x416   :  { %1877 = vmatpush1.bf16.msra.mxu0 %v5882_v21  ;;  %1918 = vmatpush1.bf16.msra.mxu1 %v5883_v30  ;;  %v5893_v21 = vld [vmem:[#allocation46_spill] sm:$0xff]  ;;  %v5894_v30 = vld [vmem:[#allocation47_spill] sm:$0xff] }
 0x417   :  { %1878 = vmatprep.subr.bf16.mxu0 %v5884_v27  ;;  %1919 = vmatprep.subr.bf16.mxu1 %v5885_v34  ;;  %v5895_v27 = vld [vmem:[#allocation48_spill] sm:$0xff]  ;;  %v5896_v34 = vld [vmem:[#allocation49_spill] sm:$0xff] }
 0x41a   :  { %1879 = vmatpush1.bf16.msra.mxu0 %v5886_v31  ;;  %1920 = vmatpush1.bf16.msra.mxu1 %v5887_v15  ;;  %v5897_v31 = vld [vmem:[#allocation50_spill] sm:$0xff]  ;;  %v5898_v15 = vld [vmem:[#allocation51_spill] sm:$0xff] }
 0x41b   :  { %1880 = vmatprep.subr.bf16.mxu0 %v5888_v20  ;;  %1921 = vmatprep.subr.bf16.mxu1 %v5889_v54  ;;  %v5899_v20 = vld [vmem:[#allocation52_spill] sm:$0xff]  ;;  %v5900_v54 = vld [vmem:[#allocation53_spill] sm:$0xff] }
 0x41e   :  { %1881 = vmatpush1.bf16.msra.mxu0 %v5890_v51  ;;  %1922 = vmatpush1.bf16.msra.mxu1 %v5891_v17  ;;  %v5901_v51 = vld [vmem:[#allocation54_spill] sm:$0xff]  ;;  %v5902_v17 = vld [vmem:[#allocation55_spill] sm:$0xff] }
 0x41f   :  { %1882 = vmatprep.subr.bf16.mxu0 %v5892_v26  ;;  %1923 = vmatprep.subr.bf16.mxu1 %v5893_v21  ;;  %v5903_v26 = vld [vmem:[#allocation56_spill] sm:$0xff]  ;;  %v5904_v21 = vld [vmem:[#allocation57_spill] sm:$0xff] }
 0x422   :  { %1883 = vmatpush1.bf16.msra.mxu0 %v5894_v30  ;;  %1924 = vmatpush1.bf16.msra.mxu1 %v5895_v27  ;;  %v5905_v30 = vld [vmem:[#allocation58_spill] sm:$0xff]  ;;  %v5906_v27 = vld [vmem:[#allocation59_spill] sm:$0xff] }
 0x423   :  { %1884 = vmatprep.subr.bf16.mxu0 %v5896_v34  ;;  %1925 = vmatprep.subr.bf16.mxu1 %v5897_v31  ;;  %v5907_v34 = vld [vmem:[#allocation60_spill] sm:$0xff]  ;;  %v5908_v31 = vld [vmem:[#allocation61_spill] sm:$0xff] }
 0x426   :  { %1885 = vmatpush1.bf16.msra.mxu0 %v5898_v15  ;;  %1926 = vmatpush1.bf16.msra.mxu1 %v5899_v20  ;;  %v5909_v15 = vld [vmem:[#allocation63_spill] sm:$0xff]  ;;  %v5910_v20 = vld [vmem:[#allocation62_spill] sm:$0xff] }
 0x427   :  { %1886 = vmatprep.subr.bf16.mxu0 %v5900_v54  ;;  %1927 = vmatprep.subr.bf16.mxu1 %v5901_v51  ;;  %v5911_v54 = vld [vmem:[#allocation64_spill] sm:$0xff]  ;;  %v5912_v51 = vld [vmem:[#allocation65_spill] sm:$0xff] }
 0x42a   :  { %1887 = vmatpush1.bf16.msra.mxu0 %v5902_v17  ;;  %1928 = vmatpush1.bf16.msra.mxu1 %v5903_v26  ;;  %v5913_v17 = vld [vmem:[#allocation66_spill] sm:$0xff]  ;;  %v5914_v26 = vld [vmem:[#allocation67_spill] sm:$0xff] }
 0x42b   :  { %1888 = vmatprep.subr.bf16.mxu0 %v5904_v21  ;;  %1929 = vmatprep.subr.bf16.mxu1 %v5905_v30  ;;  %v5915_v21 = vld [vmem:[#allocation68_spill] sm:$0xff]  ;;  %v5916_v30 = vld [vmem:[#allocation69_spill] sm:$0xff] }
 0x42e   :  { %1889 = vmatpush1.bf16.msra.mxu0 %v5906_v27  ;;  %1930 = vmatpush1.bf16.msra.mxu1 %v5907_v34  ;;  %v5917_v27 = vld [vmem:[#allocation70_spill] sm:$0xff]  ;;  %v5918_v34 = vld [vmem:[#allocation71_spill] sm:$0xff] }
 0x42f   :  { %1890 = vmatprep.subr.bf16.mxu0 %v5908_v31  ;;  %1931 = vmatprep.subr.bf16.mxu1 %v5909_v15  ;;  %v5919_v31 = vld [vmem:[#allocation72_spill] sm:$0xff]  ;;  %v5920_v15 = vld [vmem:[#allocation73_spill] sm:$0xff] }
 0x432   :  { %1891 = vmatpush1.bf16.msra.mxu0 %v5910_v20  ;;  %1932 = vmatpush1.bf16.msra.mxu1 %v5911_v54  ;;  %v5921_v20 = vld [vmem:[#allocation74_spill] sm:$0xff]  ;;  %v5922_v54 = vld [vmem:[#allocation77_spill] sm:$0xff] }
 0x433   :  { %1892 = vmatprep.subr.bf16.mxu0 %v5912_v51  ;;  %1933 = vmatprep.subr.bf16.mxu1 %v5913_v17  ;;  %v5923_v51 = vld [vmem:[#allocation149_spill] sm:$0xff]  ;;  %v5924_v17 = vld [vmem:[#allocation84_spill] sm:$0xff] }
 0x434   :  { %v388_v45 = vadd.f32 %v5923_v51, %v5922_v54 }
 0x436   :  { %1893 = vmatpush1.bf16.msra.mxu0 %v5914_v26  ;;  %1934 = vmatpush1.bf16.msra.mxu1 %v5915_v21  ;;  %v461_v26 = vadd.f32 %v5925_v0, %v5924_v17  ;;  %v5927_v21 = vld [vmem:[#allocation151_spill] sm:$0xff] }
 0x437   :  { %1894 = vmatprep.subr.bf16.mxu0 %v5916_v30  ;;  %1935 = vmatprep.subr.bf16.mxu1 %v5917_v27  ;;  %v390_v28 = vadd.f32 %v5927_v21, %v5926_v13  ;;  %v5928_v30 = vld [vmem:[#allocation153_spill] sm:$0xff] }
 0x438   :  { %v463_v27 = vadd.f32 %v5928_v30, %v5723_v19 }
 0x43a   :  { %1895 = vmatpush1.bf16.msra.mxu0 %v5918_v34  ;;  %1936 = vmatpush1.bf16.msra.mxu1 %v5919_v31 }
 0x43b   :  { %1946 = vmatprep.subr.bf16.mxu0 %v5920_v15  ;;  %1987 = vmatprep.subr.bf16.mxu1 %v5921_v20 }
 0x490   :  { %v1672_v33 = vpop.f32.mrb[32].mxu0  ;;  %v1713_v34 = vpop.f32.mrb[32].mxu1 }
 0x491   :  { %v1835_v44 = vadd.f32 %v1672_v33, %v388_v45  ;;  %v1837_v31 = vadd.f32 %v1713_v34, %v461_v26  ;;  %v1674_v25 = vpop.f32.mrb[33].mxu0  ;;  %v1715_v15 = vpop.f32.mrb[33].mxu1 }
 0x492   :  { %v1836_v61 = vadd.f32 %v1674_v25, %v390_v28  ;;  %v1838_v20 = vadd.f32 %v1715_v15, %v463_v27  ;;  %v1676_v6 = vpop.f32.mrb[34].mxu0  ;;  %v1717_v37 = vpop.f32.mrb[34].mxu1 }
 0x493   :  { %v3149_v51 = vmul.f32 -1.442695, %v1835_v44  ;;  %v1677_v54 = vpop.f32.mrb[35].mxu0  ;;  %v1718_v14 = vpop.f32.mrb[35].mxu1 }
 0x494   :  { %v3150_v0 = vmul.f32 -1.442695, %v1836_v61 }
 0x495   :  { %3328 = vpow2.f32 %v3149_v51 }
 0x496   :  { %3330 = vpow2.f32 %v3150_v0  ;;  %v3151_v0 = vmul.f32 -1.442695, %v1838_v20 }
 0x497   :  { %3332 = vtanh.f32 %v1837_v31 }
 0x49f   :  { %v3329_v21 = vpop.eup %3328 }
 0x4a0   :  { %v3331_v13 = vpop.eup %3330  ;;  %v1842_v17 = vadd.f32 1.0, %v3329_v21 }
 0x4a1   :  { %v1848_v30 = vadd.f32 1.0, %v3331_v13  ;;  %v3333_v26 = vpop.eup %3332 }
 0x4a2   :  { %3334 = vrcp.f32 %v1842_v17 }
 0x4a3   :  { %3336 = vrcp.f32 %v1848_v30 }
 0x4ac   :  { %v3335_v34 = vpop.eup %3334 }
 0x4ad   :  { %v3337_v45 = vpop.eup %3336  ;;  %v1859_v25 = vmul.f32 %v3335_v34, %v3333_v26 }
 0x4ae   :  { %v1858_v15 = vmul.f32 %v3337_v45, %v4412_v35 }
 0x4b0   :  { %v4566_v27 = vadd.f32 %v1859_v25, %v1858_v15 }
 0x4d0   :  { %v1754_v28 = vpop.f32.mrb[36].mxu0  ;;  %v1795_v14 = vpop.f32.mrb[36].mxu1 }
 0x4d1   :  { %v1802_v61 = vadd.f32 %v1754_v28, %v5829_v39  ;;  %v1756_v54 = vpop.f32.mrb[37].mxu0  ;;  %v1797_v37 = vpop.f32.mrb[37].mxu1  ;;  %v1804_v30 = vadd.f32 %v1795_v14, %v4262_v5 }
 0x4d2   :  { %v1803_v6 = vadd.f32 %v1756_v54, %v4251_v48  ;;  %v1758_v31 = vpop.f32.mrb[38].mxu0  ;;  %v1799_v13 = vpop.f32.mrb[38].mxu1  ;;  %v1805_v35 = vadd.f32 %v1797_v37, %v4257_v18 }
 0x4d3   :  { %v3146_v17 = vmul.f32 -1.442695, %v1802_v61  ;;  %v1759_v44 = vpop.f32.mrb[39].mxu0  ;;  %v1800_v33 = vpop.f32.mrb[39].mxu1 }
 0x4d4   :  { %v3147_v51 = vmul.f32 -1.442695, %v1803_v6  ;;  %v3148_v21 = vmul.f32 -1.442695, %v1805_v35 }
 0x4d5   :  { %3338 = vpow2.f32 %v3146_v17 }
 0x4d6   :  { %3340 = vpow2.f32 %v3147_v51 }
 0x4d7   :  { %3342 = vpow2.f32 %v3151_v0 }
 0x4d8   :  { %3344 = vpow2.f32 %v3148_v21 }
 0x4d9   :  { %3346 = vtanh.f32 %v1804_v30 }
 0x4df   :  { %v3339_v26 = vpop.eup %3338 }
 0x4e0   :  { %v3341_v34 = vpop.eup %3340  ;;  %v1809_v45 = vadd.f32 1.0, %v3339_v26  ;;  %v5930_v26 = vld [vmem:[#allocation100_spill] sm:$0xff] }
 0x4e1   :  { %v1815_v25 = vadd.f32 1.0, %v3341_v34  ;;  %v3343_v15 = vpop.eup %3342  ;;  %v5931_v34 = vld [vmem:[#allocation101_spill] sm:$0xff] }
 0x4e2   :  { %3348 = vrcp.f32 %v1809_v45  ;;  %v3345_v28 = vpop.eup %3344  ;;  %v1855_v6 = vadd.f32 1.0, %v3343_v15  ;;  %v5932_v45 = vld [vmem:[#allocation102_spill] sm:$0xff]  ;;  %v5934_v15 = vld [vmem:[#allocation104_spill] sm:$0xff] }
 0x4e3   :  { %3350 = vrcp.f32 %v1815_v25  ;;  %v3347_v61 = vpop.eup %3346  ;;  %v1822_v20 = vadd.f32 1.0, %v3345_v28  ;;  %v5933_v25 = vld [vmem:[#allocation103_spill] sm:$0xff]  ;;  %v5935_v28 = vld [vmem:[#allocation105_spill] sm:$0xff] }
 0x4e4   :  { %3352 = vtanh.f32 %v4566_v27 }
 0x4e5   :  { %3354 = vrcp.f32 %v1855_v6  ;;  %v5938_v6 = vld [vmem:[#allocation108_spill] sm:$0xff] }
 0x4e6   :  { %3356 = vrcp.f32 %v1822_v20  ;;  %v5941_v20 = vld [vmem:[#allocation114_spill] sm:$0xff] }
 0x4ec   :  { %v3349_v54 = vpop.eup %3348 }
 0x4ed   :  { %v3351_v31 = vpop.eup %3350  ;;  %v1826_v37 = vmul.f32 %v3349_v54, %v3347_v61  ;;  %v5936_v61 = vld [vmem:[#allocation106_spill] sm:$0xff]  ;;  %v5937_v54 = vld [vmem:[#allocation107_spill] sm:$0xff] }
 0x4ee   :  { %v1825_v13 = vmul.f32 %v3351_v31, %v4420_v38  ;;  %v3353_v17 = vpop.eup %3352  ;;  %v5929_v38 = vld [vmem:[#allocation99_spill] sm:$0xff]  ;;  %v5939_v31 = vld [vmem:[#allocation109_spill] sm:$0xff] }
 0x4ef   :  { %v3355_v44 = vpop.eup %3354 }
 0x4f0   :  { %v4574_v14 = vadd.f32 %v1826_v37, %v1825_v13  ;;  %v3357_v33 = vpop.eup %3356  ;;  %v1862_v35 = vmul.f32 %v3355_v44, %v3353_v17  ;;  %v5940_v37 = vld [vmem:[#allocation113_spill] sm:$0xff]  ;;  %v5943_v17 = vld [vmem:[#allocation118_spill] sm:$0xff] }
 0x4f1   :  { %v5942_v13 = vld [vmem:[#allocation117_spill] sm:$0xff]  ;;  %v5944_v44 = vld [vmem:[#allocation134_spill] sm:$0xff] }
 0x4f2   :  { %3358 = vtanh.f32 %v4574_v14  ;;  %v4577_v30 = vpack.c.bf16 %v1862_v35, %v1862_v35  ;;  %v5947_v35 = vld [vmem:[#allocation137_spill] sm:$0xff] }
 0x4fc   :  { %v3359_v51 = vpop.eup %3358 }
 0x4fd   :  { %v1829_v0 = vmul.f32 %v3359_v51, %v3357_v33  ;;  %v5945_v33 = vld [vmem:[#allocation135_spill] sm:$0xff]  ;;  %v5946_v51 = vld [vmem:[#allocation136_spill] sm:$0xff] }
 0x4ff   :  { %v1830_v21 = vpack.c.bf16 %v1829_v0, %v1829_v0  ;;  %v5948_v0 = vld [vmem:[#allocation138_spill] sm:$0xff] }
 0x501   :  { %1896 = vmatprep.mubr.bf16.mxu0 %v1830_v21  ;;  %1937 = vmatprep.mubr.bf16.mxu1 %v1830_v21 }
 0x502   :  { %1897 = vmatmul.mubr.bf16.vlgmr.msra.gmra.mrb[40].mxu0 %v4577_v30  ;;  %1938 = vmatmul.mubr.bf16.vlgmr.msra.gmra.mrb[40].mxu1 %v4577_v30 }
 0x503   :  { %1947 = vmatpush1.bf16.msra.mxu0 %v3886_v52  ;;  %1988 = vmatpush1.bf16.msra.mxu1 %v5735_v32 }
 0x504   :  { %1978 = vmatprep.mubr.bf16.mxu0 %v1830_v21  ;;  %2019 = vmatprep.mubr.bf16.mxu1 %v1830_v21  ;;  %v5949_v21 = vld [vmem:[#allocation139_spill] sm:$0xff] }
 0x505   :  { %1948 = vmatprep.subr.bf16.mxu0 %v5736_v16  ;;  %1989 = vmatprep.subr.bf16.mxu1 %v5737_v60 }
 0x507   :  { %1949 = vmatpush1.bf16.msra.mxu0 %v5738_v23  ;;  %1990 = vmatpush1.bf16.msra.mxu1 %v5739_v22 }
 0x508   :  { %1950 = vmatprep.subr.bf16.mxu0 %v5830_v62  ;;  %1991 = vmatprep.subr.bf16.mxu1 %v5831_v2 }
 0x50b   :  { %1951 = vmatpush1.bf16.msra.mxu0 %v5832_v42  ;;  %1992 = vmatpush1.bf16.msra.mxu1 %v5833_v40 }
 0x50c   :  { %1952 = vmatprep.subr.bf16.mxu0 %v5834_v41  ;;  %1993 = vmatprep.subr.bf16.mxu1 %v5835_v47 }
 0x50f   :  { %1953 = vmatpush1.bf16.msra.mxu0 %v5836_v55  ;;  %1994 = vmatpush1.bf16.msra.mxu1 %v5837_v8 }
 0x510   :  { %1954 = vmatprep.subr.bf16.mxu0 %v5838_v10  ;;  %1995 = vmatprep.subr.bf16.mxu1 %v5929_v38 }
 0x513   :  { %1955 = vmatpush1.bf16.msra.mxu0 %v5930_v26  ;;  %1996 = vmatpush1.bf16.msra.mxu1 %v5931_v34 }
 0x514   :  { %1956 = vmatprep.subr.bf16.mxu0 %v5932_v45  ;;  %1997 = vmatprep.subr.bf16.mxu1 %v5933_v25 }
 0x517   :  { %1957 = vmatpush1.bf16.msra.mxu0 %v5934_v15  ;;  %1998 = vmatpush1.bf16.msra.mxu1 %v5935_v28 }
 0x518   :  { %1958 = vmatprep.subr.bf16.mxu0 %v5936_v61  ;;  %1999 = vmatprep.subr.bf16.mxu1 %v5937_v54 }
 0x51b   :  { %1959 = vmatpush1.bf16.msra.mxu0 %v5938_v6  ;;  %2000 = vmatpush1.bf16.msra.mxu1 %v5939_v31 }
 0x51c   :  { %1960 = vmatprep.subr.bf16.mxu0 %v5850_v49  ;;  %2001 = vmatprep.subr.bf16.mxu1 %v5851_v58 }
 0x51f   :  { %1961 = vmatpush1.bf16.msra.mxu0 %v5852_v57  ;;  %2002 = vmatpush1.bf16.msra.mxu1 %v5940_v37 }
 0x520   :  { %1962 = vmatprep.subr.bf16.mxu0 %v5941_v20  ;;  %2003 = vmatprep.subr.bf16.mxu1 %v5855_v59 }
 0x523   :  { %1963 = vmatpush1.bf16.msra.mxu0 %v5856_v50  ;;  %2004 = vmatpush1.bf16.msra.mxu1 %v5942_v13 }
 0x524   :  { %1964 = vmatprep.subr.bf16.mxu0 %v5943_v17  ;;  %2005 = vmatprep.subr.bf16.mxu1 %v5859_v4 }
 0x527   :  { %1965 = vmatpush1.bf16.msra.mxu0 %v5860_v43  ;;  %2006 = vmatpush1.bf16.msra.mxu1 %v5771_v36 }
 0x528   :  { %1966 = vmatprep.subr.bf16.mxu0 %v5772_v53  ;;  %2007 = vmatprep.subr.bf16.mxu1 %v5773_v11 }
 0x52b   :  { %1967 = vmatpush1.bf16.msra.mxu0 %v5861_v63  ;;  %2008 = vmatpush1.bf16.msra.mxu1 %v5862_v56 }
 0x52c   :  { %1968 = vmatprep.subr.bf16.mxu0 %v5776_v24  ;;  %2009 = vmatprep.subr.bf16.mxu1 %v5777_v1  ;;  %v6026_v1 = vld [vmem:[#allocation78_spill] sm:$0xff] }
 0x52f   :  { %1969 = vmatpush1.bf16.msra.mxu0 %v5863_v12  ;;  %2010 = vmatpush1.bf16.msra.mxu1 %v5864_v3  ;;  %v5950_v3 = vld [vmem:[#allocation140_spill] sm:$0xff] }
 0x530   :  { %1970 = vmatprep.subr.bf16.mxu0 %v5780_v46  ;;  %2011 = vmatprep.subr.bf16.mxu1 %v5781_v7  ;;  %v5951_v46 = vld [vmem:[#allocation141_spill] sm:$0xff]  ;;  %v5952_v7 = vld [vmem:[#allocation142_spill] sm:$0xff]  ;;  %v6025_v12 = vld [vmem:[#allocation156_spill] sm:$0xff] }
 0x533   :  { %1971 = vmatpush1.bf16.msra.mxu0 %v4071_v29  ;;  %2012 = vmatpush1.bf16.msra.mxu1 %v4073_v9  ;;  %v5953_v29 = vld [vmem:[#allocation143_spill] sm:$0xff]  ;;  %v5954_v9 = vld [vmem:[#allocation145_spill] sm:$0xff] }
 0x534   :  { %1972 = vmatprep.subr.bf16.mxu0 %v5944_v44  ;;  %2013 = vmatprep.subr.bf16.mxu1 %v5945_v33  ;;  %v5955_v44 = vld [vmem:[#allocation146_spill] sm:$0xff]  ;;  %v5956_v33 = vld [vmem:[#allocation9_spill] sm:$0xff] }
 0x537   :  { %1973 = vmatpush1.bf16.msra.mxu0 %v5946_v51  ;;  %2014 = vmatpush1.bf16.msra.mxu1 %v5947_v35  ;;  %v5957_v51 = vld [vmem:[#allocation11_spill] sm:$0xff] }
 0x538   :  { %1974 = vmatprep.subr.bf16.mxu0 %v5948_v0  ;;  %2015 = vmatprep.subr.bf16.mxu1 %v5949_v21  ;;  %v5958_v21 = vld [vmem:[#allocation10_spill] sm:$0xff]  ;;  %v5967_v0 = vld [vmem:[#allocation21_spill] sm:$0xff] }
 0x53b   :  { %1975 = vmatpush1.bf16.msra.mxu0 %v5950_v3  ;;  %2016 = vmatpush1.bf16.msra.mxu1 %v5951_v46  ;;  %v5959_v3 = vld [vmem:[#allocation13_spill] sm:$0xff]  ;;  %v5960_v46 = vld [vmem:[#allocation12_spill] sm:$0xff] }
 0x53c   :  { %1976 = vmatprep.subr.bf16.mxu0 %v5952_v7  ;;  %2017 = vmatprep.subr.bf16.mxu1 %v5953_v29  ;;  %v5961_v7 = vld [vmem:[#allocation15_spill] sm:$0xff]  ;;  %v5962_v29 = vld [vmem:[#allocation14_spill] sm:$0xff] }
 0x53f   :  { %1977 = vmatpush1.bf16.msra.mxu0 %v5954_v9  ;;  %2018 = vmatpush1.bf16.msra.mxu1 %v5955_v44  ;;  %v5963_v9 = vld [vmem:[#allocation17_spill] sm:$0xff]  ;;  %v5964_v44 = vld [vmem:[#allocation16_spill] sm:$0xff] }
 0x540   :  { %2090 = vmatprep.subr.bf16.mxu0 %v5956_v33  ;;  %2131 = vmatprep.subr.bf16.mxu1 %v5957_v51  ;;  %v5965_v33 = vld [vmem:[#allocation19_spill] sm:$0xff]  ;;  %v5966_v51 = vld [vmem:[#allocation18_spill] sm:$0xff] }
 0x542   :  { %1979 = vmatmul.mubr.bf16.vlgmr.msra.gmra.mrb[44].mxu0 %v4577_v30  ;;  %2020 = vmatmul.mubr.bf16.vlgmr.msra.gmra.mrb[44].mxu1 %v4577_v30  ;;  %v5968_v30 = vld [vmem:[#allocation20_spill] sm:$0xff] }
 0x543   :  { %2091 = vmatpush1.bf16.msra.mxu0 %v5958_v21  ;;  %2132 = vmatpush1.bf16.msra.mxu1 %v5959_v3  ;;  %v5969_v21 = vld [vmem:[#allocation23_spill] sm:$0xff]  ;;  %v5970_v3 = vld [vmem:[#allocation22_spill] sm:$0xff] }
 0x544   :  { %2092 = vmatprep.subr.bf16.mxu0 %v5960_v46  ;;  %2133 = vmatprep.subr.bf16.mxu1 %v5961_v7  ;;  %v5971_v46 = vld [vmem:[#allocation24_spill] sm:$0xff]  ;;  %v5972_v7 = vld [vmem:[#allocation25_spill] sm:$0xff] }
 0x547   :  { %2093 = vmatpush1.bf16.msra.mxu0 %v5962_v29  ;;  %2134 = vmatpush1.bf16.msra.mxu1 %v5963_v9  ;;  %v5973_v29 = vld [vmem:[#allocation26_spill] sm:$0xff]  ;;  %v5974_v9 = vld [vmem:[#allocation27_spill] sm:$0xff] }
 0x548   :  { %2094 = vmatprep.subr.bf16.mxu0 %v5964_v44  ;;  %2135 = vmatprep.subr.bf16.mxu1 %v5965_v33  ;;  %v5975_v44 = vld [vmem:[#allocation28_spill] sm:$0xff]  ;;  %v5976_v33 = vld [vmem:[#allocation29_spill] sm:$0xff] }
 0x54b   :  { %2095 = vmatpush1.bf16.msra.mxu0 %v5966_v51  ;;  %2136 = vmatpush1.bf16.msra.mxu1 %v5967_v0  ;;  %v5977_v51 = vld [vmem:[#allocation30_spill] sm:$0xff]  ;;  %v5978_v0 = vld [vmem:[#allocation31_spill] sm:$0xff] }
 0x54c   :  { %2096 = vmatprep.subr.bf16.mxu0 %v5968_v30  ;;  %2137 = vmatprep.subr.bf16.mxu1 %v5969_v21  ;;  %v5979_v30 = vld [vmem:[#allocation32_spill] sm:$0xff]  ;;  %v5980_v21 = vld [vmem:[#allocation33_spill] sm:$0xff] }
 0x54f   :  { %2097 = vmatpush1.bf16.msra.mxu0 %v5970_v3  ;;  %2138 = vmatpush1.bf16.msra.mxu1 %v5971_v46  ;;  %v5981_v3 = vld [vmem:[#allocation34_spill] sm:$0xff]  ;;  %v5982_v46 = vld [vmem:[#allocation35_spill] sm:$0xff] }
 0x550   :  { %2098 = vmatprep.subr.bf16.mxu0 %v5972_v7  ;;  %2139 = vmatprep.subr.bf16.mxu1 %v5973_v29  ;;  %v5983_v7 = vld [vmem:[#allocation36_spill] sm:$0xff]  ;;  %v5984_v29 = vld [vmem:[#allocation37_spill] sm:$0xff] }
 0x553   :  { %2099 = vmatpush1.bf16.msra.mxu0 %v5974_v9  ;;  %2140 = vmatpush1.bf16.msra.mxu1 %v5975_v44  ;;  %v5985_v9 = vld [vmem:[#allocation38_spill] sm:$0xff]  ;;  %v5986_v44 = vld [vmem:[#allocation39_spill] sm:$0xff] }
 0x554   :  { %2100 = vmatprep.subr.bf16.mxu0 %v5976_v33  ;;  %2141 = vmatprep.subr.bf16.mxu1 %v5977_v51  ;;  %v5987_v33 = vld [vmem:[#allocation40_spill] sm:$0xff]  ;;  %v5988_v51 = vld [vmem:[#allocation41_spill] sm:$0xff] }
 0x557   :  { %2101 = vmatpush1.bf16.msra.mxu0 %v5978_v0  ;;  %2142 = vmatpush1.bf16.msra.mxu1 %v5979_v30  ;;  %v5989_v0 = vld [vmem:[#allocation42_spill] sm:$0xff]  ;;  %v5990_v30 = vld [vmem:[#allocation43_spill] sm:$0xff] }
 0x558   :  { %2102 = vmatprep.subr.bf16.mxu0 %v5980_v21  ;;  %2143 = vmatprep.subr.bf16.mxu1 %v5981_v3  ;;  %v5991_v21 = vld [vmem:[#allocation44_spill] sm:$0xff]  ;;  %v5992_v3 = vld [vmem:[#allocation45_spill] sm:$0xff] }
 0x55b   :  { %2103 = vmatpush1.bf16.msra.mxu0 %v5982_v46  ;;  %2144 = vmatpush1.bf16.msra.mxu1 %v5983_v7  ;;  %v5993_v46 = vld [vmem:[#allocation46_spill] sm:$0xff]  ;;  %v5994_v7 = vld [vmem:[#allocation47_spill] sm:$0xff] }
 0x55c   :  { %2104 = vmatprep.subr.bf16.mxu0 %v5984_v29  ;;  %2145 = vmatprep.subr.bf16.mxu1 %v5985_v9  ;;  %v5995_v29 = vld [vmem:[#allocation48_spill] sm:$0xff]  ;;  %v5996_v9 = vld [vmem:[#allocation49_spill] sm:$0xff] }
 0x55f   :  { %2105 = vmatpush1.bf16.msra.mxu0 %v5986_v44  ;;  %2146 = vmatpush1.bf16.msra.mxu1 %v5987_v33  ;;  %v5997_v44 = vld [vmem:[#allocation50_spill] sm:$0xff]  ;;  %v5998_v33 = vld [vmem:[#allocation51_spill] sm:$0xff] }
 0x560   :  { %2106 = vmatprep.subr.bf16.mxu0 %v5988_v51  ;;  %2147 = vmatprep.subr.bf16.mxu1 %v5989_v0  ;;  %v5999_v51 = vld [vmem:[#allocation52_spill] sm:$0xff]  ;;  %v6000_v0 = vld [vmem:[#allocation53_spill] sm:$0xff] }
 0x563   :  { %2107 = vmatpush1.bf16.msra.mxu0 %v5990_v30  ;;  %2148 = vmatpush1.bf16.msra.mxu1 %v5991_v21  ;;  %v6001_v30 = vld [vmem:[#allocation54_spill] sm:$0xff]  ;;  %v6002_v21 = vld [vmem:[#allocation55_spill] sm:$0xff] }
 0x564   :  { %2108 = vmatprep.subr.bf16.mxu0 %v5992_v3  ;;  %2149 = vmatprep.subr.bf16.mxu1 %v5993_v46  ;;  %v6003_v3 = vld [vmem:[#allocation56_spill] sm:$0xff]  ;;  %v6004_v46 = vld [vmem:[#allocation57_spill] sm:$0xff] }
 0x567   :  { %2109 = vmatpush1.bf16.msra.mxu0 %v5994_v7  ;;  %2150 = vmatpush1.bf16.msra.mxu1 %v5995_v29  ;;  %v6005_v7 = vld [vmem:[#allocation58_spill] sm:$0xff]  ;;  %v6006_v29 = vld [vmem:[#allocation59_spill] sm:$0xff] }
 0x568   :  { %2110 = vmatprep.subr.bf16.mxu0 %v5996_v9  ;;  %2151 = vmatprep.subr.bf16.mxu1 %v5997_v44  ;;  %v6007_v9 = vld [vmem:[#allocation60_spill] sm:$0xff]  ;;  %v6008_v44 = vld [vmem:[#allocation61_spill] sm:$0xff] }
 0x56b   :  { %2111 = vmatpush1.bf16.msra.mxu0 %v5998_v33  ;;  %2152 = vmatpush1.bf16.msra.mxu1 %v5999_v51  ;;  %v6009_v33 = vld [vmem:[#allocation63_spill] sm:$0xff]  ;;  %v6010_v51 = vld [vmem:[#allocation62_spill] sm:$0xff] }
 0x56c   :  { %2112 = vmatprep.subr.bf16.mxu0 %v6000_v0  ;;  %2153 = vmatprep.subr.bf16.mxu1 %v6001_v30  ;;  %v6011_v0 = vld [vmem:[#allocation64_spill] sm:$0xff]  ;;  %v6012_v30 = vld [vmem:[#allocation65_spill] sm:$0xff] }
 0x56f   :  { %2113 = vmatpush1.bf16.msra.mxu0 %v6002_v21  ;;  %2154 = vmatpush1.bf16.msra.mxu1 %v6003_v3  ;;  %v6013_v21 = vld [vmem:[#allocation66_spill] sm:$0xff]  ;;  %v6014_v3 = vld [vmem:[#allocation67_spill] sm:$0xff] }
 0x570   :  { %2114 = vmatprep.subr.bf16.mxu0 %v6004_v46  ;;  %2155 = vmatprep.subr.bf16.mxu1 %v6005_v7  ;;  %v6015_v46 = vld [vmem:[#allocation68_spill] sm:$0xff]  ;;  %v6016_v7 = vld [vmem:[#allocation69_spill] sm:$0xff] }
 0x573   :  { %2115 = vmatpush1.bf16.msra.mxu0 %v6006_v29  ;;  %2156 = vmatpush1.bf16.msra.mxu1 %v6007_v9  ;;  %v6017_v29 = vld [vmem:[#allocation70_spill] sm:$0xff]  ;;  %v6018_v9 = vld [vmem:[#allocation71_spill] sm:$0xff] }
 0x574   :  { %2116 = vmatprep.subr.bf16.mxu0 %v6008_v44  ;;  %2157 = vmatprep.subr.bf16.mxu1 %v6009_v33  ;;  %v6019_v44 = vld [vmem:[#allocation72_spill] sm:$0xff]  ;;  %v6020_v33 = vld [vmem:[#allocation73_spill] sm:$0xff] }
 0x577   :  { %2117 = vmatpush1.bf16.msra.mxu0 %v6010_v51  ;;  %2158 = vmatpush1.bf16.msra.mxu1 %v6011_v0  ;;  %v6021_v51 = vld [vmem:[#allocation74_spill] sm:$0xff]  ;;  %v6022_v0 = vld [vmem:[#allocation77_spill] sm:$0xff] }
 0x578   :  { %2118 = vmatprep.subr.bf16.mxu0 %v6012_v30  ;;  %2159 = vmatprep.subr.bf16.mxu1 %v6013_v21  ;;  %v6023_v30 = vld [vmem:[#allocation154_spill] sm:$0xff]  ;;  %v6024_v21 = vld [vmem:[#allocation84_spill] sm:$0xff] }
 0x579   :  { %v394_v35 = vadd.f32 %v6023_v30, %v6022_v0 }
 0x57b   :  { %2119 = vmatpush1.bf16.msra.mxu0 %v6014_v3  ;;  %2160 = vmatpush1.bf16.msra.mxu1 %v6015_v46  ;;  %v467_v3 = vadd.f32 %v6025_v12, %v6024_v21  ;;  %v6027_v46 = vld [vmem:[#allocation155_spill] sm:$0xff] }
 0x57c   :  { %2120 = vmatprep.subr.bf16.mxu0 %v6016_v7  ;;  %2161 = vmatprep.subr.bf16.mxu1 %v6017_v29  ;;  %v396_v24 = vadd.f32 %v6027_v46, %v6026_v1  ;;  %v6028_v7 = vld [vmem:[#allocation158_spill] sm:$0xff] }
 0x57d   :  { %v469_v29 = vadd.f32 %v6028_v7, %v5723_v19 }
 0x57f   :  { %2121 = vmatpush1.bf16.msra.mxu0 %v6018_v9  ;;  %2162 = vmatpush1.bf16.msra.mxu1 %v6019_v44 }
 0x580   :  { %2172 = vmatprep.subr.bf16.mxu0 %v6020_v33  ;;  %2213 = vmatprep.subr.bf16.mxu1 %v6021_v51 }
 0x5d5   :  { %v1898_v56 = vpop.f32.mrb[40].mxu0  ;;  %v1939_v9 = vpop.f32.mrb[40].mxu1 }
 0x5d6   :  { %v2061_v63 = vadd.f32 %v1898_v56, %v394_v35  ;;  %v2063_v44 = vadd.f32 %v1939_v9, %v467_v3  ;;  %v1900_v11 = vpop.f32.mrb[41].mxu0  ;;  %v1941_v33 = vpop.f32.mrb[41].mxu1 }
 0x5d7   :  { %v2062_v53 = vadd.f32 %v1900_v11, %v396_v24  ;;  %v2064_v51 = vadd.f32 %v1941_v33, %v469_v29  ;;  %v1902_v36 = vpop.f32.mrb[42].mxu0  ;;  %v1943_v43 = vpop.f32.mrb[42].mxu1 }
 0x5d8   :  { %v3155_v30 = vmul.f32 -1.442695, %v2061_v63  ;;  %v1903_v0 = vpop.f32.mrb[43].mxu0  ;;  %v1944_v4 = vpop.f32.mrb[43].mxu1 }
 0x5d9   :  { %v3156_v12 = vmul.f32 -1.442695, %v2062_v53 }
 0x5da   :  { %3360 = vpow2.f32 %v3155_v30 }
 0x5db   :  { %3362 = vpow2.f32 %v3156_v12  ;;  %v3157_v12 = vmul.f32 -1.442695, %v2064_v51 }
 0x5dc   :  { %3364 = vtanh.f32 %v2063_v44 }
 0x5e4   :  { %v3361_v46 = vpop.eup %3360 }
 0x5e5   :  { %v3363_v1 = vpop.eup %3362  ;;  %v2068_v21 = vadd.f32 1.0, %v3361_v46 }
 0x5e6   :  { %v2074_v7 = vadd.f32 1.0, %v3363_v1  ;;  %v3365_v9 = vpop.eup %3364 }
 0x5e7   :  { %3366 = vrcp.f32 %v2068_v21 }
 0x5e8   :  { %3368 = vrcp.f32 %v2074_v7 }
 0x5f1   :  { %v3367_v56 = vpop.eup %3366 }
 0x5f2   :  { %v3369_v3 = vpop.eup %3368  ;;  %v2085_v11 = vmul.f32 %v3367_v56, %v3365_v9 }
 0x5f3   :  { %v2084_v29 = vmul.f32 %v3369_v3, %v4566_v27 }
 0x5f5   :  { %v4720_v24 = vadd.f32 %v2085_v11, %v2084_v29 }
 0x615   :  { %v1980_v36 = vpop.f32.mrb[44].mxu0  ;;  %v2021_v63 = vpop.f32.mrb[44].mxu1 }
 0x616   :  { %v2028_v53 = vadd.f32 %v1980_v36, %v5829_v39  ;;  %v1982_v4 = vpop.f32.mrb[45].mxu0  ;;  %v2023_v43 = vpop.f32.mrb[45].mxu1  ;;  %v2030_v7 = vadd.f32 %v2021_v63, %v4262_v5 }
 0x617   :  { %v2029_v33 = vadd.f32 %v1982_v4, %v4251_v48  ;;  %v1984_v44 = vpop.f32.mrb[46].mxu0  ;;  %v2025_v1 = vpop.f32.mrb[46].mxu1  ;;  %v2031_v27 = vadd.f32 %v2023_v43, %v4257_v18 }
 0x618   :  { %v3152_v35 = vmul.f32 -1.442695, %v2028_v53  ;;  %v1985_v0 = vpop.f32.mrb[47].mxu0  ;;  %v2026_v21 = vpop.f32.mrb[47].mxu1 }
 0x619   :  { %v3153_v30 = vmul.f32 -1.442695, %v2029_v33  ;;  %v3154_v46 = vmul.f32 -1.442695, %v2031_v27 }
 0x61a   :  { %3370 = vpow2.f32 %v3152_v35 }
 0x61b   :  { %3372 = vpow2.f32 %v3153_v30 }
 0x61c   :  { %3374 = vpow2.f32 %v3157_v12 }
 0x61d   :  { %3376 = vpow2.f32 %v3154_v46 }
 0x61e   :  { %3378 = vtanh.f32 %v2030_v7 }
 0x624   :  { %v3371_v9 = vpop.eup %3370 }
 0x625   :  { %v3373_v56 = vpop.eup %3372  ;;  %v2035_v3 = vadd.f32 1.0, %v3371_v9  ;;  %v6030_v9 = vld [vmem:[#allocation120_spill] sm:$0xff] }
 0x626   :  { %v2041_v11 = vadd.f32 1.0, %v3373_v56  ;;  %v3375_v29 = vpop.eup %3374  ;;  %v6031_v56 = vld [vmem:[#allocation121_spill] sm:$0xff] }
 0x627   :  { %3380 = vrcp.f32 %v2035_v3  ;;  %v3377_v36 = vpop.eup %3376  ;;  %v2081_v33 = vadd.f32 1.0, %v3375_v29  ;;  %v6032_v3 = vld [vmem:[#allocation122_spill] sm:$0xff]  ;;  %v6034_v29 = vld [vmem:[#allocation124_spill] sm:$0xff] }
 0x628   :  { %3382 = vrcp.f32 %v2041_v11  ;;  %v3379_v53 = vpop.eup %3378  ;;  %v2048_v51 = vadd.f32 1.0, %v3377_v36  ;;  %v6033_v11 = vld [vmem:[#allocation123_spill] sm:$0xff]  ;;  %v6035_v36 = vld [vmem:[#allocation125_spill] sm:$0xff] }
 0x629   :  { %3384 = vtanh.f32 %v4720_v24 }
 0x62a   :  { %3386 = vrcp.f32 %v2081_v33  ;;  %v6038_v33 = vld [vmem:[#allocation128_spill] sm:$0xff] }
 0x62b   :  { %3388 = vrcp.f32 %v2048_v51  ;;  %v6041_v51 = vld [vmem:[#allocation131_spill] sm:$0xff] }
 0x631   :  { %v3381_v4 = vpop.eup %3380 }
 0x632   :  { %v3383_v44 = vpop.eup %3382  ;;  %v2052_v43 = vmul.f32 %v3381_v4, %v3379_v53  ;;  %v6036_v53 = vld [vmem:[#allocation126_spill] sm:$0xff]  ;;  %v6037_v4 = vld [vmem:[#allocation127_spill] sm:$0xff] }
 0x633   :  { %v2051_v1 = vmul.f32 %v3383_v44, %v4574_v14  ;;  %v3385_v35 = vpop.eup %3384  ;;  %v6029_v14 = vld [vmem:[#allocation119_spill] sm:$0xff]  ;;  %v6039_v44 = vld [vmem:[#allocation129_spill] sm:$0xff] }
 0x634   :  { %v3387_v0 = vpop.eup %3386 }
 0x635   :  { %v4728_v63 = vadd.f32 %v2052_v43, %v2051_v1  ;;  %v3389_v21 = vpop.eup %3388  ;;  %v2088_v27 = vmul.f32 %v3387_v0, %v3385_v35  ;;  %v6040_v43 = vld [vmem:[#allocation130_spill] sm:$0xff]  ;;  %v6042_v1 = vld [vmem:[#allocation132_spill] sm:$0xff]  ;;  %v6043_v35 = vld [vmem:[#allocation133_spill] sm:$0xff] }
 0x636   :  { %v6044_v0 = vld [vmem:[#allocation134_spill] sm:$0xff] }
 0x637   :  { %3390 = vtanh.f32 %v4728_v63  ;;  %v4731_v7 = vpack.c.bf16 %v2088_v27, %v2088_v27  ;;  %v6047_v27 = vld [vmem:[#allocation137_spill] sm:$0xff] }
 0x641   :  { %v3391_v30 = vpop.eup %3390 }
 0x642   :  { %v2055_v12 = vmul.f32 %v3391_v30, %v3389_v21  ;;  %v6045_v21 = vld [vmem:[#allocation135_spill] sm:$0xff]  ;;  %v6046_v30 = vld [vmem:[#allocation136_spill] sm:$0xff] }
 0x644   :  { %v2056_v46 = vpack.c.bf16 %v2055_v12, %v2055_v12  ;;  %v6048_v12 = vld [vmem:[#allocation138_spill] sm:$0xff] }
 0x646   :  { %2122 = vmatprep.mubr.bf16.mxu0 %v2056_v46  ;;  %2163 = vmatprep.mubr.bf16.mxu1 %v2056_v46 }
 0x647   :  { %2123 = vmatmul.mubr.bf16.vlgmr.msra.gmra.mrb[48].mxu0 %v4731_v7  ;;  %2164 = vmatmul.mubr.bf16.vlgmr.msra.gmra.mrb[48].mxu1 %v4731_v7 }
 0x648   :  { %2173 = vmatpush1.bf16.msra.mxu0 %v3886_v52  ;;  %2214 = vmatpush1.bf16.msra.mxu1 %v5735_v32 }
 0x649   :  { %2204 = vmatprep.mubr.bf16.mxu0 %v2056_v46  ;;  %2245 = vmatprep.mubr.bf16.mxu1 %v2056_v46  ;;  %v6049_v46 = vld [vmem:[#allocation139_spill] sm:$0xff] }
 0x64a   :  { %2174 = vmatprep.subr.bf16.mxu0 %v5736_v16  ;;  %2215 = vmatprep.subr.bf16.mxu1 %v5737_v60 }
 0x64c   :  { %2175 = vmatpush1.bf16.msra.mxu0 %v5738_v23  ;;  %2216 = vmatpush1.bf16.msra.mxu1 %v5739_v22 }
 0x64d   :  { %2176 = vmatprep.subr.bf16.mxu0 %v5830_v62  ;;  %2217 = vmatprep.subr.bf16.mxu1 %v5831_v2 }
 0x650   :  { %2177 = vmatpush1.bf16.msra.mxu0 %v5832_v42  ;;  %2218 = vmatpush1.bf16.msra.mxu1 %v5833_v40 }
 0x651   :  { %2178 = vmatprep.subr.bf16.mxu0 %v5834_v41  ;;  %2219 = vmatprep.subr.bf16.mxu1 %v5835_v47 }
 0x654   :  { %2179 = vmatpush1.bf16.msra.mxu0 %v5836_v55  ;;  %2220 = vmatpush1.bf16.msra.mxu1 %v5837_v8 }
 0x655   :  { %2180 = vmatprep.subr.bf16.mxu0 %v5838_v10  ;;  %2221 = vmatprep.subr.bf16.mxu1 %v5929_v38 }
 0x658   :  { %2181 = vmatpush1.bf16.msra.mxu0 %v5930_v26  ;;  %2222 = vmatpush1.bf16.msra.mxu1 %v5931_v34 }
 0x659   :  { %2182 = vmatprep.subr.bf16.mxu0 %v5932_v45  ;;  %2223 = vmatprep.subr.bf16.mxu1 %v5933_v25 }
 0x65c   :  { %2183 = vmatpush1.bf16.msra.mxu0 %v5934_v15  ;;  %2224 = vmatpush1.bf16.msra.mxu1 %v5935_v28 }
 0x65d   :  { %2184 = vmatprep.subr.bf16.mxu0 %v5936_v61  ;;  %2225 = vmatprep.subr.bf16.mxu1 %v5937_v54 }
 0x660   :  { %2185 = vmatpush1.bf16.msra.mxu0 %v5938_v6  ;;  %2226 = vmatpush1.bf16.msra.mxu1 %v5939_v31 }
 0x661   :  { %2186 = vmatprep.subr.bf16.mxu0 %v5850_v49  ;;  %2227 = vmatprep.subr.bf16.mxu1 %v5851_v58 }
 0x664   :  { %2187 = vmatpush1.bf16.msra.mxu0 %v5852_v57  ;;  %2228 = vmatpush1.bf16.msra.mxu1 %v5940_v37 }
 0x665   :  { %2188 = vmatprep.subr.bf16.mxu0 %v5941_v20  ;;  %2229 = vmatprep.subr.bf16.mxu1 %v5855_v59 }
 0x668   :  { %2189 = vmatpush1.bf16.msra.mxu0 %v5856_v50  ;;  %2230 = vmatpush1.bf16.msra.mxu1 %v5942_v13 }
 0x669   :  { %2190 = vmatprep.subr.bf16.mxu0 %v5943_v17  ;;  %2231 = vmatprep.subr.bf16.mxu1 %v6029_v14 }
 0x66c   :  { %2191 = vmatpush1.bf16.msra.mxu0 %v6030_v9  ;;  %2232 = vmatpush1.bf16.msra.mxu1 %v6031_v56 }
 0x66d   :  { %2192 = vmatprep.subr.bf16.mxu0 %v6032_v3  ;;  %2233 = vmatprep.subr.bf16.mxu1 %v6033_v11 }
 0x670   :  { %2193 = vmatpush1.bf16.msra.mxu0 %v6034_v29  ;;  %2234 = vmatpush1.bf16.msra.mxu1 %v6035_v36 }
 0x671   :  { %2194 = vmatprep.subr.bf16.mxu0 %v6036_v53  ;;  %2235 = vmatprep.subr.bf16.mxu1 %v6037_v4  ;;  %v6126_v4 = vld [vmem:[#allocation78_spill] sm:$0xff] }
 0x674   :  { %2195 = vmatpush1.bf16.msra.mxu0 %v6038_v33  ;;  %2236 = vmatpush1.bf16.msra.mxu1 %v6039_v44  ;;  %v6050_v44 = vld [vmem:[#allocation140_spill] sm:$0xff] }
 0x675   :  { %2196 = vmatprep.subr.bf16.mxu0 %v6040_v43  ;;  %2237 = vmatprep.subr.bf16.mxu1 %v6041_v51  ;;  %v6051_v43 = vld [vmem:[#allocation141_spill] sm:$0xff]  ;;  %v6052_v51 = vld [vmem:[#allocation142_spill] sm:$0xff]  ;;  %v6125_v33 = vld [vmem:[#allocation160_spill] sm:$0xff] }
 0x678   :  { %2197 = vmatpush1.bf16.msra.mxu0 %v6042_v1  ;;  %2238 = vmatpush1.bf16.msra.mxu1 %v6043_v35  ;;  %v6053_v1 = vld [vmem:[#allocation143_spill] sm:$0xff]  ;;  %v6054_v35 = vld [vmem:[#allocation145_spill] sm:$0xff] }
 0x679   :  { %2198 = vmatprep.subr.bf16.mxu0 %v6044_v0  ;;  %2239 = vmatprep.subr.bf16.mxu1 %v6045_v21  ;;  %v6055_v0 = vld [vmem:[#allocation146_spill] sm:$0xff]  ;;  %v6056_v21 = vld [vmem:[#allocation9_spill] sm:$0xff] }
 0x67c   :  { %2199 = vmatpush1.bf16.msra.mxu0 %v6046_v30  ;;  %2240 = vmatpush1.bf16.msra.mxu1 %v6047_v27  ;;  %v6057_v30 = vld [vmem:[#allocation11_spill] sm:$0xff] }
 0x67d   :  { %2200 = vmatprep.subr.bf16.mxu0 %v6048_v12  ;;  %2241 = vmatprep.subr.bf16.mxu1 %v6049_v46  ;;  %v6058_v46 = vld [vmem:[#allocation10_spill] sm:$0xff]  ;;  %v6067_v12 = vld [vmem:[#allocation21_spill] sm:$0xff] }
 0x680   :  { %2201 = vmatpush1.bf16.msra.mxu0 %v6050_v44  ;;  %2242 = vmatpush1.bf16.msra.mxu1 %v6051_v43  ;;  %v6059_v44 = vld [vmem:[#allocation13_spill] sm:$0xff]  ;;  %v6060_v43 = vld [vmem:[#allocation12_spill] sm:$0xff] }
 0x681   :  { %2202 = vmatprep.subr.bf16.mxu0 %v6052_v51  ;;  %2243 = vmatprep.subr.bf16.mxu1 %v6053_v1  ;;  %v6061_v51 = vld [vmem:[#allocation15_spill] sm:$0xff]  ;;  %v6062_v1 = vld [vmem:[#allocation14_spill] sm:$0xff] }
 0x684   :  { %2203 = vmatpush1.bf16.msra.mxu0 %v6054_v35  ;;  %2244 = vmatpush1.bf16.msra.mxu1 %v6055_v0  ;;  %v6063_v35 = vld [vmem:[#allocation17_spill] sm:$0xff]  ;;  %v6064_v0 = vld [vmem:[#allocation16_spill] sm:$0xff] }
 0x685   :  { %2316 = vmatprep.subr.bf16.mxu0 %v6056_v21  ;;  %2357 = vmatprep.subr.bf16.mxu1 %v6057_v30  ;;  %v6065_v21 = vld [vmem:[#allocation19_spill] sm:$0xff]  ;;  %v6066_v30 = vld [vmem:[#allocation18_spill] sm:$0xff] }
 0x687   :  { %2205 = vmatmul.mubr.bf16.vlgmr.msra.gmra.mrb[52].mxu0 %v4731_v7  ;;  %2246 = vmatmul.mubr.bf16.vlgmr.msra.gmra.mrb[52].mxu1 %v4731_v7  ;;  %v6068_v7 = vld [vmem:[#allocation20_spill] sm:$0xff] }
 0x688   :  { %2317 = vmatpush1.bf16.msra.mxu0 %v6058_v46  ;;  %2358 = vmatpush1.bf16.msra.mxu1 %v6059_v44  ;;  %v6069_v46 = vld [vmem:[#allocation23_spill] sm:$0xff]  ;;  %v6070_v44 = vld [vmem:[#allocation22_spill] sm:$0xff] }
 0x689   :  { %2318 = vmatprep.subr.bf16.mxu0 %v6060_v43  ;;  %2359 = vmatprep.subr.bf16.mxu1 %v6061_v51  ;;  %v6071_v43 = vld [vmem:[#allocation24_spill] sm:$0xff]  ;;  %v6072_v51 = vld [vmem:[#allocation25_spill] sm:$0xff] }
 0x68c   :  { %2319 = vmatpush1.bf16.msra.mxu0 %v6062_v1  ;;  %2360 = vmatpush1.bf16.msra.mxu1 %v6063_v35  ;;  %v6073_v1 = vld [vmem:[#allocation26_spill] sm:$0xff]  ;;  %v6074_v35 = vld [vmem:[#allocation27_spill] sm:$0xff] }
 0x68d   :  { %2320 = vmatprep.subr.bf16.mxu0 %v6064_v0  ;;  %2361 = vmatprep.subr.bf16.mxu1 %v6065_v21  ;;  %v6075_v0 = vld [vmem:[#allocation28_spill] sm:$0xff]  ;;  %v6076_v21 = vld [vmem:[#allocation29_spill] sm:$0xff] }
 0x690   :  { %2321 = vmatpush1.bf16.msra.mxu0 %v6066_v30  ;;  %2362 = vmatpush1.bf16.msra.mxu1 %v6067_v12  ;;  %v6077_v30 = vld [vmem:[#allocation30_spill] sm:$0xff]  ;;  %v6078_v12 = vld [vmem:[#allocation31_spill] sm:$0xff] }
 0x691   :  { %2322 = vmatprep.subr.bf16.mxu0 %v6068_v7  ;;  %2363 = vmatprep.subr.bf16.mxu1 %v6069_v46  ;;  %v6079_v7 = vld [vmem:[#allocation32_spill] sm:$0xff]  ;;  %v6080_v46 = vld [vmem:[#allocation33_spill] sm:$0xff] }
 0x694   :  { %2323 = vmatpush1.bf16.msra.mxu0 %v6070_v44  ;;  %2364 = vmatpush1.bf16.msra.mxu1 %v6071_v43  ;;  %v6081_v44 = vld [vmem:[#allocation34_spill] sm:$0xff]  ;;  %v6082_v43 = vld [vmem:[#allocation35_spill] sm:$0xff] }
 0x695   :  { %2324 = vmatprep.subr.bf16.mxu0 %v6072_v51  ;;  %2365 = vmatprep.subr.bf16.mxu1 %v6073_v1  ;;  %v6083_v51 = vld [vmem:[#allocation36_spill] sm:$0xff]  ;;  %v6084_v1 = vld [vmem:[#allocation37_spill] sm:$0xff] }
 0x698   :  { %2325 = vmatpush1.bf16.msra.mxu0 %v6074_v35  ;;  %2366 = vmatpush1.bf16.msra.mxu1 %v6075_v0  ;;  %v6085_v35 = vld [vmem:[#allocation38_spill] sm:$0xff]  ;;  %v6086_v0 = vld [vmem:[#allocation39_spill] sm:$0xff] }
 0x699   :  { %2326 = vmatprep.subr.bf16.mxu0 %v6076_v21  ;;  %2367 = vmatprep.subr.bf16.mxu1 %v6077_v30  ;;  %v6087_v21 = vld [vmem:[#allocation40_spill] sm:$0xff]  ;;  %v6088_v30 = vld [vmem:[#allocation41_spill] sm:$0xff] }
 0x69c   :  { %2327 = vmatpush1.bf16.msra.mxu0 %v6078_v12  ;;  %2368 = vmatpush1.bf16.msra.mxu1 %v6079_v7  ;;  %v6089_v12 = vld [vmem:[#allocation42_spill] sm:$0xff]  ;;  %v6090_v7 = vld [vmem:[#allocation43_spill] sm:$0xff] }
 0x69d   :  { %2328 = vmatprep.subr.bf16.mxu0 %v6080_v46  ;;  %2369 = vmatprep.subr.bf16.mxu1 %v6081_v44  ;;  %v6091_v46 = vld [vmem:[#allocation44_spill] sm:$0xff]  ;;  %v6092_v44 = vld [vmem:[#allocation45_spill] sm:$0xff] }
 0x6a0   :  { %2329 = vmatpush1.bf16.msra.mxu0 %v6082_v43  ;;  %2370 = vmatpush1.bf16.msra.mxu1 %v6083_v51  ;;  %v6093_v43 = vld [vmem:[#allocation46_spill] sm:$0xff]  ;;  %v6094_v51 = vld [vmem:[#allocation47_spill] sm:$0xff] }
 0x6a1   :  { %2330 = vmatprep.subr.bf16.mxu0 %v6084_v1  ;;  %2371 = vmatprep.subr.bf16.mxu1 %v6085_v35  ;;  %v6095_v1 = vld [vmem:[#allocation48_spill] sm:$0xff]  ;;  %v6096_v35 = vld [vmem:[#allocation49_spill] sm:$0xff] }
 0x6a4   :  { %2331 = vmatpush1.bf16.msra.mxu0 %v6086_v0  ;;  %2372 = vmatpush1.bf16.msra.mxu1 %v6087_v21  ;;  %v6097_v0 = vld [vmem:[#allocation50_spill] sm:$0xff]  ;;  %v6098_v21 = vld [vmem:[#allocation51_spill] sm:$0xff] }
 0x6a5   :  { %2332 = vmatprep.subr.bf16.mxu0 %v6088_v30  ;;  %2373 = vmatprep.subr.bf16.mxu1 %v6089_v12  ;;  %v6099_v30 = vld [vmem:[#allocation52_spill] sm:$0xff]  ;;  %v6100_v12 = vld [vmem:[#allocation53_spill] sm:$0xff] }
 0x6a8   :  { %2333 = vmatpush1.bf16.msra.mxu0 %v6090_v7  ;;  %2374 = vmatpush1.bf16.msra.mxu1 %v6091_v46  ;;  %v6101_v7 = vld [vmem:[#allocation54_spill] sm:$0xff]  ;;  %v6102_v46 = vld [vmem:[#allocation55_spill] sm:$0xff] }
 0x6a9   :  { %2334 = vmatprep.subr.bf16.mxu0 %v6092_v44  ;;  %2375 = vmatprep.subr.bf16.mxu1 %v6093_v43  ;;  %v6103_v44 = vld [vmem:[#allocation56_spill] sm:$0xff]  ;;  %v6104_v43 = vld [vmem:[#allocation57_spill] sm:$0xff] }
 0x6ac   :  { %2335 = vmatpush1.bf16.msra.mxu0 %v6094_v51  ;;  %2376 = vmatpush1.bf16.msra.mxu1 %v6095_v1  ;;  %v6105_v51 = vld [vmem:[#allocation58_spill] sm:$0xff]  ;;  %v6106_v1 = vld [vmem:[#allocation59_spill] sm:$0xff] }
 0x6ad   :  { %2336 = vmatprep.subr.bf16.mxu0 %v6096_v35  ;;  %2377 = vmatprep.subr.bf16.mxu1 %v6097_v0  ;;  %v6107_v35 = vld [vmem:[#allocation60_spill] sm:$0xff]  ;;  %v6108_v0 = vld [vmem:[#allocation61_spill] sm:$0xff] }
 0x6b0   :  { %2337 = vmatpush1.bf16.msra.mxu0 %v6098_v21  ;;  %2378 = vmatpush1.bf16.msra.mxu1 %v6099_v30  ;;  %v6109_v21 = vld [vmem:[#allocation63_spill] sm:$0xff]  ;;  %v6110_v30 = vld [vmem:[#allocation62_spill] sm:$0xff] }
 0x6b1   :  { %2338 = vmatprep.subr.bf16.mxu0 %v6100_v12  ;;  %2379 = vmatprep.subr.bf16.mxu1 %v6101_v7  ;;  %v6111_v12 = vld [vmem:[#allocation64_spill] sm:$0xff]  ;;  %v6112_v7 = vld [vmem:[#allocation65_spill] sm:$0xff] }
 0x6b4   :  { %2339 = vmatpush1.bf16.msra.mxu0 %v6102_v46  ;;  %2380 = vmatpush1.bf16.msra.mxu1 %v6103_v44  ;;  %v6113_v46 = vld [vmem:[#allocation66_spill] sm:$0xff]  ;;  %v6114_v44 = vld [vmem:[#allocation67_spill] sm:$0xff] }
 0x6b5   :  { %2340 = vmatprep.subr.bf16.mxu0 %v6104_v43  ;;  %2381 = vmatprep.subr.bf16.mxu1 %v6105_v51  ;;  %v6115_v43 = vld [vmem:[#allocation68_spill] sm:$0xff]  ;;  %v6116_v51 = vld [vmem:[#allocation69_spill] sm:$0xff] }
 0x6b8   :  { %2341 = vmatpush1.bf16.msra.mxu0 %v6106_v1  ;;  %2382 = vmatpush1.bf16.msra.mxu1 %v6107_v35  ;;  %v6117_v1 = vld [vmem:[#allocation70_spill] sm:$0xff]  ;;  %v6118_v35 = vld [vmem:[#allocation71_spill] sm:$0xff] }
 0x6b9   :  { %2342 = vmatprep.subr.bf16.mxu0 %v6108_v0  ;;  %2383 = vmatprep.subr.bf16.mxu1 %v6109_v21  ;;  %v6119_v0 = vld [vmem:[#allocation72_spill] sm:$0xff]  ;;  %v6120_v21 = vld [vmem:[#allocation73_spill] sm:$0xff] }
 0x6bc   :  { %2343 = vmatpush1.bf16.msra.mxu0 %v6110_v30  ;;  %2384 = vmatpush1.bf16.msra.mxu1 %v6111_v12  ;;  %v6121_v30 = vld [vmem:[#allocation74_spill] sm:$0xff]  ;;  %v6122_v12 = vld [vmem:[#allocation77_spill] sm:$0xff] }
 0x6bd   :  { %2344 = vmatprep.subr.bf16.mxu0 %v6112_v7  ;;  %2385 = vmatprep.subr.bf16.mxu1 %v6113_v46  ;;  %v6123_v7 = vld [vmem:[#allocation157_spill] sm:$0xff]  ;;  %v6124_v46 = vld [vmem:[#allocation84_spill] sm:$0xff] }
 0x6be   :  { %v398_v27 = vadd.f32 %v6123_v7, %v6122_v12 }
 0x6c0   :  { %2345 = vmatpush1.bf16.msra.mxu0 %v6114_v44  ;;  %2386 = vmatpush1.bf16.msra.mxu1 %v6115_v43  ;;  %v471_v44 = vadd.f32 %v6125_v33, %v6124_v46  ;;  %v6127_v43 = vld [vmem:[#allocation159_spill] sm:$0xff] }
 0x6c1   :  { %2346 = vmatprep.subr.bf16.mxu0 %v6116_v51  ;;  %2387 = vmatprep.subr.bf16.mxu1 %v6117_v1  ;;  %v400_v53 = vadd.f32 %v6127_v43, %v6126_v4  ;;  %v6128_v51 = vld [vmem:[#allocation161_spill] sm:$0xff] }
 0x6c2   :  { %v473_v1 = vadd.f32 %v6128_v51, %v5723_v19 }
 0x6c4   :  { %2347 = vmatpush1.bf16.msra.mxu0 %v6118_v35  ;;  %2388 = vmatpush1.bf16.msra.mxu1 %v6119_v0 }
 0x6c5   :  { %2398 = vmatprep.subr.bf16.mxu0 %v6120_v21  ;;  %2439 = vmatprep.subr.bf16.mxu1 %v6121_v30 }
 0x71a   :  { %v2124_v36 = vpop.f32.mrb[48].mxu0  ;;  %v2165_v35 = vpop.f32.mrb[48].mxu1 }
 0x71b   :  { %v2287_v29 = vadd.f32 %v2124_v36, %v398_v27  ;;  %v2289_v0 = vadd.f32 %v2165_v35, %v471_v44  ;;  %v2126_v11 = vpop.f32.mrb[49].mxu0  ;;  %v2167_v21 = vpop.f32.mrb[49].mxu1 }
 0x71c   :  { %v2288_v3 = vadd.f32 %v2126_v11, %v400_v53  ;;  %v2290_v30 = vadd.f32 %v2167_v21, %v473_v1  ;;  %v2128_v56 = vpop.f32.mrb[50].mxu0  ;;  %v2169_v9 = vpop.f32.mrb[50].mxu1 }
 0x71d   :  { %v3161_v7 = vmul.f32 -1.442695, %v2287_v29  ;;  %v2129_v12 = vpop.f32.mrb[51].mxu0  ;;  %v2170_v14 = vpop.f32.mrb[51].mxu1 }
 0x71e   :  { %v3162_v33 = vmul.f32 -1.442695, %v2288_v3 }
 0x71f   :  { %3392 = vpow2.f32 %v3161_v7 }
 0x720   :  { %3394 = vpow2.f32 %v3162_v33  ;;  %v3163_v33 = vmul.f32 -1.442695, %v2290_v30 }
 0x721   :  { %3396 = vtanh.f32 %v2289_v0 }
 0x729   :  { %v3393_v43 = vpop.eup %3392 }
 0x72a   :  { %v3395_v4 = vpop.eup %3394  ;;  %v2294_v46 = vadd.f32 1.0, %v3393_v43 }
 0x72b   :  { %v2300_v51 = vadd.f32 1.0, %v3395_v4  ;;  %v3397_v36 = vpop.eup %3396 }
 0x72c   :  { %3398 = vrcp.f32 %v2294_v46 }
 0x72d   :  { %3400 = vrcp.f32 %v2300_v51 }
 0x736   :  { %v3399_v44 = vpop.eup %3398 }
 0x737   :  { %v3401_v35 = vpop.eup %3400  ;;  %v2311_v11 = vmul.f32 %v3399_v44, %v3397_v36 }
 0x738   :  { %v2310_v56 = vmul.f32 %v3401_v35, %v4720_v24 }
 0x73a   :  { %v4874_v9 = vadd.f32 %v2311_v11, %v2310_v56 }
 0x75a   :  { %v2206_v29 = vpop.f32.mrb[52].mxu0  ;;  %v2247_v14 = vpop.f32.mrb[52].mxu1 }
 0x75b   :  { %v2254_v3 = vadd.f32 %v2206_v29, %v5829_v39  ;;  %v2208_v53 = vpop.f32.mrb[53].mxu0  ;;  %v2249_v1 = vpop.f32.mrb[53].mxu1  ;;  %v2256_v51 = vadd.f32 %v2247_v14, %v4262_v5 }
 0x75c   :  { %v2255_v21 = vadd.f32 %v2208_v53, %v4251_v48  ;;  %v2210_v0 = vpop.f32.mrb[54].mxu0  ;;  %v2251_v4 = vpop.f32.mrb[54].mxu1  ;;  %v2257_v24 = vadd.f32 %v2249_v1, %v4257_v18 }
 0x75d   :  { %v3158_v27 = vmul.f32 -1.442695, %v2254_v3  ;;  %v2211_v12 = vpop.f32.mrb[55].mxu0  ;;  %v2252_v46 = vpop.f32.mrb[55].mxu1 }
 0x75e   :  { %v3159_v7 = vmul.f32 -1.442695, %v2255_v21  ;;  %v3160_v43 = vmul.f32 -1.442695, %v2257_v24 }
 0x75f   :  { %3402 = vpow2.f32 %v3158_v27 }
 0x760   :  { %3404 = vpow2.f32 %v3159_v7 }
 0x761   :  { %3406 = vpow2.f32 %v3163_v33 }
 0x762   :  { %3408 = vpow2.f32 %v3160_v43 }
 0x763   :  { %3410 = vtanh.f32 %v2256_v51 }
 0x769   :  { %v3403_v36 = vpop.eup %3402 }
 0x76a   :  { %v3405_v44 = vpop.eup %3404  ;;  %v2261_v35 = vadd.f32 1.0, %v3403_v36  ;;  %v6130_v36 = vld [vmem:[#allocation120_spill] sm:$0xff] }
 0x76b   :  { %v2267_v11 = vadd.f32 1.0, %v3405_v44  ;;  %v3407_v56 = vpop.eup %3406  ;;  %v6131_v44 = vld [vmem:[#allocation121_spill] sm:$0xff] }
 0x76c   :  { %3412 = vrcp.f32 %v2261_v35  ;;  %v3409_v29 = vpop.eup %3408  ;;  %v2307_v21 = vadd.f32 1.0, %v3407_v56  ;;  %v6132_v35 = vld [vmem:[#allocation122_spill] sm:$0xff]  ;;  %v6134_v56 = vld [vmem:[#allocation124_spill] sm:$0xff] }
 0x76d   :  { %3414 = vrcp.f32 %v2267_v11  ;;  %v3411_v3 = vpop.eup %3410  ;;  %v2274_v30 = vadd.f32 1.0, %v3409_v29  ;;  %v6133_v11 = vld [vmem:[#allocation123_spill] sm:$0xff]  ;;  %v6135_v29 = vld [vmem:[#allocation125_spill] sm:$0xff] }
 0x76e   :  { %3416 = vtanh.f32 %v4874_v9 }
 0x76f   :  { %3418 = vrcp.f32 %v2307_v21  ;;  %v6138_v21 = vld [vmem:[#allocation128_spill] sm:$0xff] }
 0x770   :  { %3420 = vrcp.f32 %v2274_v30  ;;  %v6141_v30 = vld [vmem:[#allocation131_spill] sm:$0xff] }
 0x776   :  { %v3413_v53 = vpop.eup %3412 }
 0x777   :  { %v3415_v0 = vpop.eup %3414  ;;  %v2278_v1 = vmul.f32 %v3413_v53, %v3411_v3  ;;  %v6136_v3 = vld [vmem:[#allocation126_spill] sm:$0xff]  ;;  %v6137_v53 = vld [vmem:[#allocation127_spill] sm:$0xff] }
 0x778   :  { %v2277_v4 = vmul.f32 %v3415_v0, %v4728_v63  ;;  %v3417_v27 = vpop.eup %3416  ;;  %v6129_v63 = vld [vmem:[#allocation119_spill] sm:$0xff]  ;;  %v6139_v0 = vld [vmem:[#allocation129_spill] sm:$0xff] }
 0x779   :  { %v3419_v12 = vpop.eup %3418 }
 0x77a   :  { %v4882_v14 = vadd.f32 %v2278_v1, %v2277_v4  ;;  %v3421_v46 = vpop.eup %3420  ;;  %v2314_v24 = vmul.f32 %v3419_v12, %v3417_v27  ;;  %v6140_v1 = vld [vmem:[#allocation130_spill] sm:$0xff]  ;;  %v6142_v4 = vld [vmem:[#allocation132_spill] sm:$0xff]  ;;  %v6143_v27 = vld [vmem:[#allocation133_spill] sm:$0xff] }
 0x77b   :  { %v6144_v12 = vld [vmem:[#allocation134_spill] sm:$0xff] }
 0x77c   :  { %3422 = vtanh.f32 %v4882_v14  ;;  %v4885_v51 = vpack.c.bf16 %v2314_v24, %v2314_v24  ;;  %v6147_v24 = vld [vmem:[#allocation137_spill] sm:$0xff] }
 0x786   :  { %v3423_v7 = vpop.eup %3422 }
 0x787   :  { %v2281_v33 = vmul.f32 %v3423_v7, %v3421_v46  ;;  %v6145_v46 = vld [vmem:[#allocation135_spill] sm:$0xff]  ;;  %v6146_v7 = vld [vmem:[#allocation136_spill] sm:$0xff] }
 0x789   :  { %v2282_v43 = vpack.c.bf16 %v2281_v33, %v2281_v33  ;;  %v6148_v33 = vld [vmem:[#allocation138_spill] sm:$0xff] }
 0x78b   :  { %2348 = vmatprep.mubr.bf16.mxu0 %v2282_v43  ;;  %2389 = vmatprep.mubr.bf16.mxu1 %v2282_v43 }
 0x78c   :  { %2349 = vmatmul.mubr.bf16.vlgmr.msra.gmra.mrb[56].mxu0 %v4885_v51  ;;  %2390 = vmatmul.mubr.bf16.vlgmr.msra.gmra.mrb[56].mxu1 %v4885_v51 }
 0x78d   :  { %2399 = vmatpush1.bf16.msra.mxu0 %v3886_v52  ;;  %2440 = vmatpush1.bf16.msra.mxu1 %v5735_v32 }
 0x78e   :  { %2430 = vmatprep.mubr.bf16.mxu0 %v2282_v43  ;;  %2471 = vmatprep.mubr.bf16.mxu1 %v2282_v43  ;;  %v6149_v43 = vld [vmem:[#allocation139_spill] sm:$0xff] }
 0x78f   :  { %2400 = vmatprep.subr.bf16.mxu0 %v5736_v16  ;;  %2441 = vmatprep.subr.bf16.mxu1 %v5737_v60 }
 0x791   :  { %2401 = vmatpush1.bf16.msra.mxu0 %v5738_v23  ;;  %2442 = vmatpush1.bf16.msra.mxu1 %v5739_v22 }
 0x792   :  { %2402 = vmatprep.subr.bf16.mxu0 %v5830_v62  ;;  %2443 = vmatprep.subr.bf16.mxu1 %v5831_v2 }
 0x795   :  { %2403 = vmatpush1.bf16.msra.mxu0 %v5832_v42  ;;  %2444 = vmatpush1.bf16.msra.mxu1 %v5833_v40 }
 0x796   :  { %2404 = vmatprep.subr.bf16.mxu0 %v5834_v41  ;;  %2445 = vmatprep.subr.bf16.mxu1 %v5835_v47 }
 0x799   :  { %2405 = vmatpush1.bf16.msra.mxu0 %v5836_v55  ;;  %2446 = vmatpush1.bf16.msra.mxu1 %v5837_v8 }
 0x79a   :  { %2406 = vmatprep.subr.bf16.mxu0 %v5838_v10  ;;  %2447 = vmatprep.subr.bf16.mxu1 %v5929_v38 }
 0x79d   :  { %2407 = vmatpush1.bf16.msra.mxu0 %v5930_v26  ;;  %2448 = vmatpush1.bf16.msra.mxu1 %v5931_v34 }
 0x79e   :  { %2408 = vmatprep.subr.bf16.mxu0 %v5932_v45  ;;  %2449 = vmatprep.subr.bf16.mxu1 %v5933_v25 }
 0x7a1   :  { %2409 = vmatpush1.bf16.msra.mxu0 %v5934_v15  ;;  %2450 = vmatpush1.bf16.msra.mxu1 %v5935_v28 }
 0x7a2   :  { %2410 = vmatprep.subr.bf16.mxu0 %v5936_v61  ;;  %2451 = vmatprep.subr.bf16.mxu1 %v5937_v54 }
 0x7a5   :  { %2411 = vmatpush1.bf16.msra.mxu0 %v5938_v6  ;;  %2452 = vmatpush1.bf16.msra.mxu1 %v5939_v31 }
 0x7a6   :  { %2412 = vmatprep.subr.bf16.mxu0 %v5850_v49  ;;  %2453 = vmatprep.subr.bf16.mxu1 %v5851_v58 }
 0x7a9   :  { %2413 = vmatpush1.bf16.msra.mxu0 %v5852_v57  ;;  %2454 = vmatpush1.bf16.msra.mxu1 %v5940_v37 }
 0x7aa   :  { %2414 = vmatprep.subr.bf16.mxu0 %v5941_v20  ;;  %2455 = vmatprep.subr.bf16.mxu1 %v5855_v59 }
 0x7ad   :  { %2415 = vmatpush1.bf16.msra.mxu0 %v5856_v50  ;;  %2456 = vmatpush1.bf16.msra.mxu1 %v5942_v13 }
 0x7ae   :  { %2416 = vmatprep.subr.bf16.mxu0 %v5943_v17  ;;  %2457 = vmatprep.subr.bf16.mxu1 %v6129_v63 }
 0x7b1   :  { %2417 = vmatpush1.bf16.msra.mxu0 %v6130_v36  ;;  %2458 = vmatpush1.bf16.msra.mxu1 %v6131_v44 }
 0x7b2   :  { %2418 = vmatprep.subr.bf16.mxu0 %v6132_v35  ;;  %2459 = vmatprep.subr.bf16.mxu1 %v6133_v11 }
 0x7b5   :  { %2419 = vmatpush1.bf16.msra.mxu0 %v6134_v56  ;;  %2460 = vmatpush1.bf16.msra.mxu1 %v6135_v29 }
 0x7b6   :  { %2420 = vmatprep.subr.bf16.mxu0 %v6136_v3  ;;  %2461 = vmatprep.subr.bf16.mxu1 %v6137_v53  ;;  %v6226_v53 = vld [vmem:[#allocation78_spill] sm:$0xff] }
 0x7b9   :  { %2421 = vmatpush1.bf16.msra.mxu0 %v6138_v21  ;;  %2462 = vmatpush1.bf16.msra.mxu1 %v6139_v0  ;;  %v6150_v0 = vld [vmem:[#allocation140_spill] sm:$0xff]  ;;  %v6225_v21 = vld [vmem:[#allocation165_spill] sm:$0xff] }
 0x7ba   :  { %2422 = vmatprep.subr.bf16.mxu0 %v6140_v1  ;;  %2463 = vmatprep.subr.bf16.mxu1 %v6141_v30  ;;  %v6151_v1 = vld [vmem:[#allocation141_spill] sm:$0xff]  ;;  %v6152_v30 = vld [vmem:[#allocation142_spill] sm:$0xff] }
 0x7bd   :  { %2423 = vmatpush1.bf16.msra.mxu0 %v6142_v4  ;;  %2464 = vmatpush1.bf16.msra.mxu1 %v6143_v27  ;;  %v6153_v4 = vld [vmem:[#allocation143_spill] sm:$0xff]  ;;  %v6154_v27 = vld [vmem:[#allocation145_spill] sm:$0xff] }
 0x7be   :  { %2424 = vmatprep.subr.bf16.mxu0 %v6144_v12  ;;  %2465 = vmatprep.subr.bf16.mxu1 %v6145_v46  ;;  %v6155_v12 = vld [vmem:[#allocation146_spill] sm:$0xff]  ;;  %v6156_v46 = vld [vmem:[#allocation9_spill] sm:$0xff] }
 0x7c1   :  { %2425 = vmatpush1.bf16.msra.mxu0 %v6146_v7  ;;  %2466 = vmatpush1.bf16.msra.mxu1 %v6147_v24  ;;  %v6157_v7 = vld [vmem:[#allocation11_spill] sm:$0xff] }
 0x7c2   :  { %2426 = vmatprep.subr.bf16.mxu0 %v6148_v33  ;;  %2467 = vmatprep.subr.bf16.mxu1 %v6149_v43  ;;  %v6158_v43 = vld [vmem:[#allocation10_spill] sm:$0xff]  ;;  %v6167_v33 = vld [vmem:[#allocation21_spill] sm:$0xff] }
 0x7c5   :  { %2427 = vmatpush1.bf16.msra.mxu0 %v6150_v0  ;;  %2468 = vmatpush1.bf16.msra.mxu1 %v6151_v1  ;;  %v6159_v0 = vld [vmem:[#allocation13_spill] sm:$0xff]  ;;  %v6160_v1 = vld [vmem:[#allocation12_spill] sm:$0xff] }
 0x7c6   :  { %2428 = vmatprep.subr.bf16.mxu0 %v6152_v30  ;;  %2469 = vmatprep.subr.bf16.mxu1 %v6153_v4  ;;  %v6161_v30 = vld [vmem:[#allocation15_spill] sm:$0xff]  ;;  %v6162_v4 = vld [vmem:[#allocation14_spill] sm:$0xff] }
 0x7c9   :  { %2429 = vmatpush1.bf16.msra.mxu0 %v6154_v27  ;;  %2470 = vmatpush1.bf16.msra.mxu1 %v6155_v12  ;;  %v6163_v27 = vld [vmem:[#allocation17_spill] sm:$0xff]  ;;  %v6164_v12 = vld [vmem:[#allocation16_spill] sm:$0xff] }
 0x7ca   :  { %2542 = vmatprep.subr.bf16.mxu0 %v6156_v46  ;;  %2583 = vmatprep.subr.bf16.mxu1 %v6157_v7  ;;  %v6165_v46 = vld [vmem:[#allocation19_spill] sm:$0xff]  ;;  %v6166_v7 = vld [vmem:[#allocation18_spill] sm:$0xff] }
 0x7cc   :  { %2431 = vmatmul.mubr.bf16.vlgmr.msra.gmra.mrb[60].mxu0 %v4885_v51  ;;  %2472 = vmatmul.mubr.bf16.vlgmr.msra.gmra.mrb[60].mxu1 %v4885_v51  ;;  %v6168_v51 = vld [vmem:[#allocation20_spill] sm:$0xff] }
 0x7cd   :  { %2543 = vmatpush1.bf16.msra.mxu0 %v6158_v43  ;;  %2584 = vmatpush1.bf16.msra.mxu1 %v6159_v0  ;;  %v6169_v43 = vld [vmem:[#allocation23_spill] sm:$0xff]  ;;  %v6170_v0 = vld [vmem:[#allocation22_spill] sm:$0xff] }
 0x7ce   :  { %2544 = vmatprep.subr.bf16.mxu0 %v6160_v1  ;;  %2585 = vmatprep.subr.bf16.mxu1 %v6161_v30  ;;  %v6171_v1 = vld [vmem:[#allocation24_spill] sm:$0xff]  ;;  %v6172_v30 = vld [vmem:[#allocation25_spill] sm:$0xff] }
 0x7d1   :  { %2545 = vmatpush1.bf16.msra.mxu0 %v6162_v4  ;;  %2586 = vmatpush1.bf16.msra.mxu1 %v6163_v27  ;;  %v6173_v4 = vld [vmem:[#allocation26_spill] sm:$0xff]  ;;  %v6174_v27 = vld [vmem:[#allocation27_spill] sm:$0xff] }
 0x7d2   :  { %2546 = vmatprep.subr.bf16.mxu0 %v6164_v12  ;;  %2587 = vmatprep.subr.bf16.mxu1 %v6165_v46  ;;  %v6175_v12 = vld [vmem:[#allocation28_spill] sm:$0xff]  ;;  %v6176_v46 = vld [vmem:[#allocation29_spill] sm:$0xff] }
 0x7d5   :  { %2547 = vmatpush1.bf16.msra.mxu0 %v6166_v7  ;;  %2588 = vmatpush1.bf16.msra.mxu1 %v6167_v33  ;;  %v6177_v7 = vld [vmem:[#allocation30_spill] sm:$0xff]  ;;  %v6178_v33 = vld [vmem:[#allocation31_spill] sm:$0xff] }
 0x7d6   :  { %2548 = vmatprep.subr.bf16.mxu0 %v6168_v51  ;;  %2589 = vmatprep.subr.bf16.mxu1 %v6169_v43  ;;  %v6179_v51 = vld [vmem:[#allocation32_spill] sm:$0xff]  ;;  %v6180_v43 = vld [vmem:[#allocation33_spill] sm:$0xff] }
 0x7d9   :  { %2549 = vmatpush1.bf16.msra.mxu0 %v6170_v0  ;;  %2590 = vmatpush1.bf16.msra.mxu1 %v6171_v1  ;;  %v6181_v0 = vld [vmem:[#allocation34_spill] sm:$0xff]  ;;  %v6182_v1 = vld [vmem:[#allocation35_spill] sm:$0xff] }
 0x7da   :  { %2550 = vmatprep.subr.bf16.mxu0 %v6172_v30  ;;  %2591 = vmatprep.subr.bf16.mxu1 %v6173_v4  ;;  %v6183_v30 = vld [vmem:[#allocation36_spill] sm:$0xff]  ;;  %v6184_v4 = vld [vmem:[#allocation37_spill] sm:$0xff] }
 0x7dd   :  { %2551 = vmatpush1.bf16.msra.mxu0 %v6174_v27  ;;  %2592 = vmatpush1.bf16.msra.mxu1 %v6175_v12  ;;  %v6185_v27 = vld [vmem:[#allocation38_spill] sm:$0xff]  ;;  %v6186_v12 = vld [vmem:[#allocation39_spill] sm:$0xff] }
 0x7de   :  { %2552 = vmatprep.subr.bf16.mxu0 %v6176_v46  ;;  %2593 = vmatprep.subr.bf16.mxu1 %v6177_v7  ;;  %v6187_v46 = vld [vmem:[#allocation40_spill] sm:$0xff]  ;;  %v6188_v7 = vld [vmem:[#allocation41_spill] sm:$0xff] }
 0x7e1   :  { %2553 = vmatpush1.bf16.msra.mxu0 %v6178_v33  ;;  %2594 = vmatpush1.bf16.msra.mxu1 %v6179_v51  ;;  %v6189_v33 = vld [vmem:[#allocation42_spill] sm:$0xff]  ;;  %v6190_v51 = vld [vmem:[#allocation43_spill] sm:$0xff] }
 0x7e2   :  { %2554 = vmatprep.subr.bf16.mxu0 %v6180_v43  ;;  %2595 = vmatprep.subr.bf16.mxu1 %v6181_v0  ;;  %v6191_v43 = vld [vmem:[#allocation44_spill] sm:$0xff]  ;;  %v6192_v0 = vld [vmem:[#allocation45_spill] sm:$0xff] }
 0x7e5   :  { %2555 = vmatpush1.bf16.msra.mxu0 %v6182_v1  ;;  %2596 = vmatpush1.bf16.msra.mxu1 %v6183_v30  ;;  %v6193_v1 = vld [vmem:[#allocation46_spill] sm:$0xff]  ;;  %v6194_v30 = vld [vmem:[#allocation47_spill] sm:$0xff] }
 0x7e6   :  { %2556 = vmatprep.subr.bf16.mxu0 %v6184_v4  ;;  %2597 = vmatprep.subr.bf16.mxu1 %v6185_v27  ;;  %v6195_v4 = vld [vmem:[#allocation48_spill] sm:$0xff]  ;;  %v6196_v27 = vld [vmem:[#allocation49_spill] sm:$0xff] }
 0x7e9   :  { %2557 = vmatpush1.bf16.msra.mxu0 %v6186_v12  ;;  %2598 = vmatpush1.bf16.msra.mxu1 %v6187_v46  ;;  %v6197_v12 = vld [vmem:[#allocation50_spill] sm:$0xff]  ;;  %v6198_v46 = vld [vmem:[#allocation51_spill] sm:$0xff] }
 0x7ea   :  { %2558 = vmatprep.subr.bf16.mxu0 %v6188_v7  ;;  %2599 = vmatprep.subr.bf16.mxu1 %v6189_v33  ;;  %v6199_v7 = vld [vmem:[#allocation52_spill] sm:$0xff]  ;;  %v6200_v33 = vld [vmem:[#allocation53_spill] sm:$0xff] }
 0x7ed   :  { %2559 = vmatpush1.bf16.msra.mxu0 %v6190_v51  ;;  %2600 = vmatpush1.bf16.msra.mxu1 %v6191_v43  ;;  %v6201_v51 = vld [vmem:[#allocation54_spill] sm:$0xff]  ;;  %v6202_v43 = vld [vmem:[#allocation55_spill] sm:$0xff] }
 0x7ee   :  { %2560 = vmatprep.subr.bf16.mxu0 %v6192_v0  ;;  %2601 = vmatprep.subr.bf16.mxu1 %v6193_v1  ;;  %v6203_v0 = vld [vmem:[#allocation56_spill] sm:$0xff]  ;;  %v6204_v1 = vld [vmem:[#allocation57_spill] sm:$0xff] }
 0x7f1   :  { %2561 = vmatpush1.bf16.msra.mxu0 %v6194_v30  ;;  %2602 = vmatpush1.bf16.msra.mxu1 %v6195_v4  ;;  %v6205_v30 = vld [vmem:[#allocation58_spill] sm:$0xff]  ;;  %v6206_v4 = vld [vmem:[#allocation59_spill] sm:$0xff] }
 0x7f2   :  { %2562 = vmatprep.subr.bf16.mxu0 %v6196_v27  ;;  %2603 = vmatprep.subr.bf16.mxu1 %v6197_v12  ;;  %v6207_v27 = vld [vmem:[#allocation60_spill] sm:$0xff]  ;;  %v6208_v12 = vld [vmem:[#allocation61_spill] sm:$0xff] }
 0x7f5   :  { %2563 = vmatpush1.bf16.msra.mxu0 %v6198_v46  ;;  %2604 = vmatpush1.bf16.msra.mxu1 %v6199_v7  ;;  %v6209_v46 = vld [vmem:[#allocation63_spill] sm:$0xff]  ;;  %v6210_v7 = vld [vmem:[#allocation62_spill] sm:$0xff] }
 0x7f6   :  { %2564 = vmatprep.subr.bf16.mxu0 %v6200_v33  ;;  %2605 = vmatprep.subr.bf16.mxu1 %v6201_v51  ;;  %v6211_v33 = vld [vmem:[#allocation64_spill] sm:$0xff]  ;;  %v6212_v51 = vld [vmem:[#allocation65_spill] sm:$0xff] }
 0x7f9   :  { %2565 = vmatpush1.bf16.msra.mxu0 %v6202_v43  ;;  %2606 = vmatpush1.bf16.msra.mxu1 %v6203_v0  ;;  %v6213_v43 = vld [vmem:[#allocation66_spill] sm:$0xff]  ;;  %v6214_v0 = vld [vmem:[#allocation67_spill] sm:$0xff] }
 0x7fa   :  { %2566 = vmatprep.subr.bf16.mxu0 %v6204_v1  ;;  %2607 = vmatprep.subr.bf16.mxu1 %v6205_v30  ;;  %v6215_v1 = vld [vmem:[#allocation68_spill] sm:$0xff]  ;;  %v6216_v30 = vld [vmem:[#allocation69_spill] sm:$0xff] }
 0x7fd   :  { %2567 = vmatpush1.bf16.msra.mxu0 %v6206_v4  ;;  %2608 = vmatpush1.bf16.msra.mxu1 %v6207_v27  ;;  %v6217_v4 = vld [vmem:[#allocation70_spill] sm:$0xff]  ;;  %v6218_v27 = vld [vmem:[#allocation71_spill] sm:$0xff] }
 0x7fe   :  { %2568 = vmatprep.subr.bf16.mxu0 %v6208_v12  ;;  %2609 = vmatprep.subr.bf16.mxu1 %v6209_v46  ;;  %v6219_v12 = vld [vmem:[#allocation72_spill] sm:$0xff]  ;;  %v6220_v46 = vld [vmem:[#allocation73_spill] sm:$0xff] }
 0x801   :  { %2569 = vmatpush1.bf16.msra.mxu0 %v6210_v7  ;;  %2610 = vmatpush1.bf16.msra.mxu1 %v6211_v33  ;;  %v6221_v7 = vld [vmem:[#allocation74_spill] sm:$0xff]  ;;  %v6222_v33 = vld [vmem:[#allocation77_spill] sm:$0xff] }
 0x802   :  { %2570 = vmatprep.subr.bf16.mxu0 %v6212_v51  ;;  %2611 = vmatprep.subr.bf16.mxu1 %v6213_v43  ;;  %v6223_v51 = vld [vmem:[#allocation162_spill] sm:$0xff]  ;;  %v6224_v43 = vld [vmem:[#allocation84_spill] sm:$0xff] }
 0x803   :  { %v404_v24 = vadd.f32 %v6223_v51, %v6222_v33 }
 0x805   :  { %2571 = vmatpush1.bf16.msra.mxu0 %v6214_v0  ;;  %2612 = vmatpush1.bf16.msra.mxu1 %v6215_v1  ;;  %v477_v0 = vadd.f32 %v6225_v21, %v6224_v43  ;;  %v6227_v1 = vld [vmem:[#allocation163_spill] sm:$0xff] }
 0x806   :  { %2572 = vmatprep.subr.bf16.mxu0 %v6216_v30  ;;  %2613 = vmatprep.subr.bf16.mxu1 %v6217_v4  ;;  %v406_v3 = vadd.f32 %v6227_v1, %v6226_v53  ;;  %v6228_v30 = vld [vmem:[#allocation167_spill] sm:$0xff] }
 0x807   :  { %v479_v4 = vadd.f32 %v6228_v30, %v5723_v19  ;;  %v6258_v19 = vld [vmem:[#allocation73_spill] sm:$0xff] }
 0x809   :  { %2573 = vmatpush1.bf16.msra.mxu0 %v6218_v27  ;;  %2614 = vmatpush1.bf16.msra.mxu1 %v6219_v12 }
 0x80a   :  { %2624 = vmatprep.subr.bf16.mxu0 %v6220_v46  ;;  %2665 = vmatprep.subr.bf16.mxu1 %v6221_v7 }
 0x85f   :  { %v2350_v29 = vpop.f32.mrb[56].mxu0  ;;  %v2391_v27 = vpop.f32.mrb[56].mxu1 }
 0x860   :  { %v2513_v56 = vadd.f32 %v2350_v29, %v404_v24  ;;  %v2515_v12 = vadd.f32 %v2391_v27, %v477_v0  ;;  %v2352_v11 = vpop.f32.mrb[57].mxu0  ;;  %v2393_v46 = vpop.f32.mrb[57].mxu1 }
 0x861   :  { %v2514_v35 = vadd.f32 %v2352_v11, %v406_v3  ;;  %v2516_v7 = vadd.f32 %v2393_v46, %v479_v4  ;;  %v2354_v44 = vpop.f32.mrb[58].mxu0  ;;  %v2395_v36 = vpop.f32.mrb[58].mxu1 }
 0x862   :  { %v3167_v51 = vmul.f32 -1.442695, %v2513_v56  ;;  %v2355_v33 = vpop.f32.mrb[59].mxu0  ;;  %v2396_v63 = vpop.f32.mrb[59].mxu1 }
 0x863   :  { %v3168_v21 = vmul.f32 -1.442695, %v2514_v35 }
 0x864   :  { %3424 = vpow2.f32 %v3167_v51 }
 0x865   :  { %3426 = vpow2.f32 %v3168_v21  ;;  %v3169_v21 = vmul.f32 -1.442695, %v2516_v7 }
 0x866   :  { %3428 = vtanh.f32 %v2515_v12 }
 0x86e   :  { %v3425_v1 = vpop.eup %3424 }
 0x86f   :  { %v3427_v53 = vpop.eup %3426  ;;  %v2520_v43 = vadd.f32 1.0, %v3425_v1 }
 0x870   :  { %v2526_v30 = vadd.f32 1.0, %v3427_v53  ;;  %v3429_v29 = vpop.eup %3428 }
 0x871   :  { %3430 = vrcp.f32 %v2520_v43 }
 0x872   :  { %3432 = vrcp.f32 %v2526_v30 }
 0x87b   :  { %v3431_v24 = vpop.eup %3430 }
 0x87c   :  { %v3433_v0 = vpop.eup %3432  ;;  %v2537_v11 = vmul.f32 %v3431_v24, %v3429_v29 }
 0x87d   :  { %v2536_v44 = vmul.f32 %v3433_v0, %v4874_v9 }
 0x87f   :  { %v5028_v36 = vadd.f32 %v2537_v11, %v2536_v44 }
 0x881   :  { %6229 = vst [vmem:[#allocation85_spill] sm:$0xff] %v5028_v36 }
 0x89f   :  { %v2432_v56 = vpop.f32.mrb[60].mxu0  ;;  %v2473_v63 = vpop.f32.mrb[60].mxu1 }
 0x8a0   :  { %v2480_v35 = vadd.f32 %v2432_v56, %v5829_v39  ;;  %v2434_v3 = vpop.f32.mrb[61].mxu0  ;;  %v2475_v46 = vpop.f32.mrb[61].mxu1  ;;  %v2482_v30 = vadd.f32 %v2473_v63, %v4262_v5  ;;  %v6253_v5 = vld [vmem:[#allocation141_spill] sm:$0xff] }
 0x8a1   :  { %v2481_v33 = vadd.f32 %v2434_v3, %v4251_v48  ;;  %v2436_v4 = vpop.f32.mrb[62].mxu0  ;;  %v2477_v53 = vpop.f32.mrb[62].mxu1  ;;  %v2483_v9 = vadd.f32 %v2475_v46, %v4257_v18  ;;  %v6254_v18 = vld [vmem:[#allocation142_spill] sm:$0xff]  ;;  %v6255_v48 = vld [vmem:[#allocation143_spill] sm:$0xff]  ;;  %v6256_v39 = vld [vmem:[#allocation145_spill] sm:$0xff] }
 0x8a2   :  { %v3164_v43 = vmul.f32 -1.442695, %v2480_v35  ;;  %v2437_v27 = vpop.f32.mrb[63].mxu0  ;;  %v2478_v12 = vpop.f32.mrb[63].mxu1 }
 0x8a3   :  { %v3165_v51 = vmul.f32 -1.442695, %v2481_v33  ;;  %v3166_v1 = vmul.f32 -1.442695, %v2483_v9 }
 0x8a4   :  { %3434 = vpow2.f32 %v3164_v43 }
 0x8a5   :  { %3436 = vpow2.f32 %v3165_v51 }
 0x8a6   :  { %3438 = vpow2.f32 %v3169_v21 }
 0x8a7   :  { %3440 = vpow2.f32 %v3166_v1 }
 0x8a8   :  { %3442 = vtanh.f32 %v2482_v30 }
 0x8ae   :  { %v3435_v29 = vpop.eup %3434 }
 0x8af   :  { %v3437_v24 = vpop.eup %3436  ;;  %v2487_v0 = vadd.f32 1.0, %v3435_v29  ;;  %v6232_v29 = vld [vmem:[#allocation120_spill] sm:$0xff] }
 0x8b0   :  { %v2493_v11 = vadd.f32 1.0, %v3437_v24  ;;  %v3439_v44 = vpop.eup %3438  ;;  %v6233_v24 = vld [vmem:[#allocation121_spill] sm:$0xff] }
 0x8b1   :  { %3444 = vrcp.f32 %v2487_v0  ;;  %v3441_v56 = vpop.eup %3440  ;;  %v2533_v33 = vadd.f32 1.0, %v3439_v44  ;;  %v6234_v0 = vld [vmem:[#allocation122_spill] sm:$0xff]  ;;  %v6236_v44 = vld [vmem:[#allocation124_spill] sm:$0xff] }
 0x8b2   :  { %3446 = vrcp.f32 %v2493_v11  ;;  %v3443_v35 = vpop.eup %3442  ;;  %v2500_v7 = vadd.f32 1.0, %v3441_v56  ;;  %v6235_v11 = vld [vmem:[#allocation123_spill] sm:$0xff]  ;;  %v6237_v56 = vld [vmem:[#allocation125_spill] sm:$0xff] }
 0x8b3   :  { %3448 = vtanh.f32 %v5028_v36  ;;  %v6257_v36 = vld [vmem:[#allocation146_spill] sm:$0xff] }
 0x8b4   :  { %3450 = vrcp.f32 %v2533_v33  ;;  %v6240_v33 = vld [vmem:[#allocation128_spill] sm:$0xff] }
 0x8b5   :  { %3452 = vrcp.f32 %v2500_v7  ;;  %v6243_v7 = vld [vmem:[#allocation131_spill] sm:$0xff] }
 0x8bb   :  { %v3445_v3 = vpop.eup %3444 }
 0x8bc   :  { %v3447_v4 = vpop.eup %3446  ;;  %v2504_v46 = vmul.f32 %v3445_v3, %v3443_v35  ;;  %v6238_v35 = vld [vmem:[#allocation126_spill] sm:$0xff]  ;;  %v6239_v3 = vld [vmem:[#allocation127_spill] sm:$0xff] }
 0x8bd   :  { %v2503_v53 = vmul.f32 %v3447_v4, %v4882_v14  ;;  %v3449_v43 = vpop.eup %3448  ;;  %v6231_v14 = vld [vmem:[#allocation119_spill] sm:$0xff]  ;;  %v6241_v4 = vld [vmem:[#allocation129_spill] sm:$0xff] }
 0x8be   :  { %v3451_v27 = vpop.eup %3450 }
 0x8bf   :  { %v5036_v63 = vadd.f32 %v2504_v46, %v2503_v53  ;;  %v3453_v12 = vpop.eup %3452  ;;  %v2540_v9 = vmul.f32 %v3451_v27, %v3449_v43  ;;  %v6242_v46 = vld [vmem:[#allocation130_spill] sm:$0xff]  ;;  %v6244_v53 = vld [vmem:[#allocation132_spill] sm:$0xff]  ;;  %v6245_v43 = vld [vmem:[#allocation133_spill] sm:$0xff] }
 0x8c0   :  { %v6246_v27 = vld [vmem:[#allocation134_spill] sm:$0xff] }
 0x8c1   :  { %6230 = vst [vmem:[#allocation76_spill] sm:$0xff] %v5036_v63  ;;  %3454 = vtanh.f32 %v5036_v63  ;;  %v5039_v30 = vpack.c.bf16 %v2540_v9, %v2540_v9  ;;  %v6249_v9 = vld [vmem:[#allocation137_spill] sm:$0xff]  ;;  %v6252_v63 = vld [vmem:[#allocation140_spill] sm:$0xff] }
 0x8cb   :  { %v3455_v51 = vpop.eup %3454 }
 0x8cc   :  { %v2507_v21 = vmul.f32 %v3455_v51, %v3453_v12  ;;  %v6247_v12 = vld [vmem:[#allocation135_spill] sm:$0xff]  ;;  %v6248_v51 = vld [vmem:[#allocation136_spill] sm:$0xff] }
 0x8ce   :  { %v2508_v1 = vpack.c.bf16 %v2507_v21, %v2507_v21  ;;  %v6250_v21 = vld [vmem:[#allocation138_spill] sm:$0xff] }
 0x8d0   :  { %2574 = vmatprep.mubr.bf16.mxu0 %v2508_v1  ;;  %2615 = vmatprep.mubr.bf16.mxu1 %v2508_v1 }
 0x8d1   :  { %2575 = vmatmul.mubr.bf16.vlgmr.msra.gmra.mrb[64].mxu0 %v5039_v30  ;;  %2616 = vmatmul.mubr.bf16.vlgmr.msra.gmra.mrb[64].mxu1 %v5039_v30 }
 0x8d2   :  { %2625 = vmatpush1.bf16.msra.mxu0 %v3886_v52  ;;  %2666 = vmatpush1.bf16.msra.mxu1 %v5735_v32 }
 0x8d3   :  { %2656 = vmatprep.mubr.bf16.mxu0 %v2508_v1  ;;  %2697 = vmatprep.mubr.bf16.mxu1 %v2508_v1  ;;  %v6251_v1 = vld [vmem:[#allocation139_spill] sm:$0xff] }
 0x8d4   :  { %2626 = vmatprep.subr.bf16.mxu0 %v5736_v16  ;;  %2667 = vmatprep.subr.bf16.mxu1 %v5737_v60 }
 0x8d6   :  { %2627 = vmatpush1.bf16.msra.mxu0 %v5738_v23  ;;  %2668 = vmatpush1.bf16.msra.mxu1 %v5739_v22 }
 0x8d7   :  { %2628 = vmatprep.subr.bf16.mxu0 %v5830_v62  ;;  %2669 = vmatprep.subr.bf16.mxu1 %v5831_v2 }
 0x8da   :  { %2629 = vmatpush1.bf16.msra.mxu0 %v5832_v42  ;;  %2670 = vmatpush1.bf16.msra.mxu1 %v5833_v40 }
 0x8db   :  { %2630 = vmatprep.subr.bf16.mxu0 %v5834_v41  ;;  %2671 = vmatprep.subr.bf16.mxu1 %v5835_v47 }
 0x8de   :  { %2631 = vmatpush1.bf16.msra.mxu0 %v5836_v55  ;;  %2672 = vmatpush1.bf16.msra.mxu1 %v5837_v8 }
 0x8df   :  { %2632 = vmatprep.subr.bf16.mxu0 %v5838_v10  ;;  %2673 = vmatprep.subr.bf16.mxu1 %v5929_v38 }
 0x8e2   :  { %2633 = vmatpush1.bf16.msra.mxu0 %v5930_v26  ;;  %2674 = vmatpush1.bf16.msra.mxu1 %v5931_v34 }
 0x8e3   :  { %2634 = vmatprep.subr.bf16.mxu0 %v5932_v45  ;;  %2675 = vmatprep.subr.bf16.mxu1 %v5933_v25 }
 0x8e6   :  { %2635 = vmatpush1.bf16.msra.mxu0 %v5934_v15  ;;  %2676 = vmatpush1.bf16.msra.mxu1 %v5935_v28 }
 0x8e7   :  { %2636 = vmatprep.subr.bf16.mxu0 %v5936_v61  ;;  %2677 = vmatprep.subr.bf16.mxu1 %v5937_v54 }
 0x8ea   :  { %2637 = vmatpush1.bf16.msra.mxu0 %v5938_v6  ;;  %2678 = vmatpush1.bf16.msra.mxu1 %v5939_v31 }
 0x8eb   :  { %2638 = vmatprep.subr.bf16.mxu0 %v5850_v49  ;;  %2679 = vmatprep.subr.bf16.mxu1 %v5851_v58 }
 0x8ee   :  { %2639 = vmatpush1.bf16.msra.mxu0 %v5852_v57  ;;  %2680 = vmatpush1.bf16.msra.mxu1 %v5940_v37 }
 0x8ef   :  { %2640 = vmatprep.subr.bf16.mxu0 %v5941_v20  ;;  %2681 = vmatprep.subr.bf16.mxu1 %v5855_v59 }
 0x8f2   :  { %2641 = vmatpush1.bf16.msra.mxu0 %v5856_v50  ;;  %2682 = vmatpush1.bf16.msra.mxu1 %v5942_v13 }
 0x8f3   :  { %2642 = vmatprep.subr.bf16.mxu0 %v5943_v17  ;;  %2683 = vmatprep.subr.bf16.mxu1 %v6231_v14 }
 0x8f6   :  { %2643 = vmatpush1.bf16.msra.mxu0 %v6232_v29  ;;  %2684 = vmatpush1.bf16.msra.mxu1 %v6233_v24 }
 0x8f7   :  { %2644 = vmatprep.subr.bf16.mxu0 %v6234_v0  ;;  %2685 = vmatprep.subr.bf16.mxu1 %v6235_v11 }
 0x8fa   :  { %2645 = vmatpush1.bf16.msra.mxu0 %v6236_v44  ;;  %2686 = vmatpush1.bf16.msra.mxu1 %v6237_v56 }
 0x8fb   :  { %2646 = vmatprep.subr.bf16.mxu0 %v6238_v35  ;;  %2687 = vmatprep.subr.bf16.mxu1 %v6239_v3 }
 0x8fe   :  { %2647 = vmatpush1.bf16.msra.mxu0 %v6240_v33  ;;  %2688 = vmatpush1.bf16.msra.mxu1 %v6241_v4 }
 0x8ff   :  { %2648 = vmatprep.subr.bf16.mxu0 %v6242_v46  ;;  %2689 = vmatprep.subr.bf16.mxu1 %v6243_v7 }
 0x902   :  { %2649 = vmatpush1.bf16.msra.mxu0 %v6244_v53  ;;  %2690 = vmatpush1.bf16.msra.mxu1 %v6245_v43 }
 0x903   :  { %2650 = vmatprep.subr.bf16.mxu0 %v6246_v27  ;;  %2691 = vmatprep.subr.bf16.mxu1 %v6247_v12 }
 0x906   :  { %2651 = vmatpush1.bf16.msra.mxu0 %v6248_v51  ;;  %2692 = vmatpush1.bf16.msra.mxu1 %v6249_v9  ;;  %v6259_v51 = vld [vmem:[#allocation74_spill] sm:$0xff] }
 0x907   :  { %2652 = vmatprep.subr.bf16.mxu0 %v6250_v21  ;;  %2693 = vmatprep.subr.bf16.mxu1 %v6251_v1 }
 0x90a   :  { %2653 = vmatpush1.bf16.msra.mxu0 %v6252_v63  ;;  %2694 = vmatpush1.bf16.msra.mxu1 %v6253_v5 }
 0x90b   :  { %2654 = vmatprep.subr.bf16.mxu0 %v6254_v18  ;;  %2695 = vmatprep.subr.bf16.mxu1 %v6255_v48 }
 0x90e   :  { %2655 = vmatpush1.bf16.msra.mxu0 %v6256_v39  ;;  %2696 = vmatpush1.bf16.msra.mxu1 %v6257_v36 }
 0x90f   :  { %2768 = vmatprep.subr.bf16.mxu0 %v6258_v19  ;;  %2809 = vmatprep.subr.bf16.mxu1 %v6259_v51  ;;  %v6261_v19 = vld [vmem:[#allocation77_spill] sm:$0xff] }
 0x911   :  { %2657 = vmatmul.mubr.bf16.vlgmr.msra.gmra.mrb[68].mxu0 %v5039_v30  ;;  %2698 = vmatmul.mubr.bf16.vlgmr.msra.gmra.mrb[68].mxu1 %v5039_v30 }
 0x912   :  { %2769 = vmatpush1.bf16.msra.mxu0 %v3886_v52  ;;  %2810 = vmatpush1.bf16.msra.mxu1 %v5735_v32  ;;  %v6260_v52 = vld [vmem:[#allocation136_spill] sm:$0xff] }
 0x913   :  { %2770 = vmatprep.subr.bf16.mxu0 %v5736_v16  ;;  %2811 = vmatprep.subr.bf16.mxu1 %v5737_v60  ;;  %v6262_v32 = vld [vmem:[#allocation164_spill] sm:$0xff] }
 0x914   :  { %v408_v16 = vadd.f32 %v6262_v32, %v6261_v19  ;;  %v6263_v60 = vld [vmem:[#allocation84_spill] sm:$0xff] }
 0x916   :  { %2771 = vmatpush1.bf16.msra.mxu0 %v5738_v23  ;;  %2812 = vmatpush1.bf16.msra.mxu1 %v5739_v22  ;;  %v6264_v23 = vld [vmem:[#allocation168_spill] sm:$0xff] }
 0x917   :  { %2772 = vmatprep.subr.bf16.mxu0 %v5830_v62  ;;  %2813 = vmatprep.subr.bf16.mxu1 %v5831_v2  ;;  %v481_v22 = vadd.f32 %v6264_v23, %v6263_v60  ;;  %v6265_v62 = vld [vmem:[#allocation78_spill] sm:$0xff] }
 0x918   :  { %v6266_v2 = vld [vmem:[#allocation166_spill] sm:$0xff] }
 0x91a   :  { %2773 = vmatpush1.bf16.msra.mxu0 %v5832_v42  ;;  %2814 = vmatpush1.bf16.msra.mxu1 %v5833_v40  ;;  %v410_v42 = vadd.f32 %v6266_v2, %v6265_v62  ;;  %v6267_v40 = vld [vmem:[#allocation81_spill] sm:$0xff] }
 0x91b   :  { %2774 = vmatprep.subr.bf16.mxu0 %v5834_v41  ;;  %2815 = vmatprep.subr.bf16.mxu1 %v5835_v47  ;;  %v6268_v41 = vld [vmem:[#allocation169_spill] sm:$0xff] }
 0x91e   :  { %2775 = vmatpush1.bf16.msra.mxu0 %v5836_v55  ;;  %2816 = vmatpush1.bf16.msra.mxu1 %v5837_v8 }
 0x91f   :  { %2776 = vmatprep.subr.bf16.mxu0 %v5838_v10  ;;  %2817 = vmatprep.subr.bf16.mxu1 %v5929_v38 }
 0x922   :  { %2777 = vmatpush1.bf16.msra.mxu0 %v5930_v26  ;;  %2818 = vmatpush1.bf16.msra.mxu1 %v5931_v34 }
 0x923   :  { %2778 = vmatprep.subr.bf16.mxu0 %v5932_v45  ;;  %2819 = vmatprep.subr.bf16.mxu1 %v5933_v25 }
 0x926   :  { %2779 = vmatpush1.bf16.msra.mxu0 %v5934_v15  ;;  %2820 = vmatpush1.bf16.msra.mxu1 %v5935_v28 }
 0x927   :  { %2780 = vmatprep.subr.bf16.mxu0 %v5936_v61  ;;  %2821 = vmatprep.subr.bf16.mxu1 %v5937_v54 }
 0x92a   :  { %2781 = vmatpush1.bf16.msra.mxu0 %v5938_v6  ;;  %2822 = vmatpush1.bf16.msra.mxu1 %v5939_v31 }
 0x92b   :  { %2782 = vmatprep.subr.bf16.mxu0 %v5850_v49  ;;  %2823 = vmatprep.subr.bf16.mxu1 %v5851_v58 }
 0x92e   :  { %2783 = vmatpush1.bf16.msra.mxu0 %v5852_v57  ;;  %2824 = vmatpush1.bf16.msra.mxu1 %v5940_v37 }
 0x92f   :  { %2784 = vmatprep.subr.bf16.mxu0 %v5941_v20  ;;  %2825 = vmatprep.subr.bf16.mxu1 %v5855_v59 }
 0x932   :  { %2785 = vmatpush1.bf16.msra.mxu0 %v5856_v50  ;;  %2826 = vmatpush1.bf16.msra.mxu1 %v5942_v13  ;;  %v6269_v13 = vld [vmem:[#allocation85_spill] sm:$0xff] }
 0x933   :  { %2786 = vmatprep.subr.bf16.mxu0 %v5943_v17  ;;  %2827 = vmatprep.subr.bf16.mxu1 %v6231_v14 }
 0x936   :  { %2787 = vmatpush1.bf16.msra.mxu0 %v6232_v29  ;;  %2828 = vmatpush1.bf16.msra.mxu1 %v6233_v24 }
 0x937   :  { %2788 = vmatprep.subr.bf16.mxu0 %v6234_v0  ;;  %2829 = vmatprep.subr.bf16.mxu1 %v6235_v11  ;;  %v6270_v0 = vld [vmem:[#allocation79_spill] sm:$0xff] }
 0x93a   :  { %2789 = vmatpush1.bf16.msra.mxu0 %v6236_v44  ;;  %2830 = vmatpush1.bf16.msra.mxu1 %v6237_v56 }
 0x93b   :  { %2790 = vmatprep.subr.bf16.mxu0 %v6238_v35  ;;  %2831 = vmatprep.subr.bf16.mxu1 %v6239_v3  ;;  %v6271_v35 = vld [vmem:[#allocation82_spill] sm:$0xff] }
 0x93e   :  { %2791 = vmatpush1.bf16.msra.mxu0 %v6240_v33  ;;  %2832 = vmatpush1.bf16.msra.mxu1 %v6241_v4 }
 0x93f   :  { %2792 = vmatprep.subr.bf16.mxu0 %v6242_v46  ;;  %2833 = vmatprep.subr.bf16.mxu1 %v6243_v7 }
 0x942   :  { %2793 = vmatpush1.bf16.msra.mxu0 %v6244_v53  ;;  %2834 = vmatpush1.bf16.msra.mxu1 %v6245_v43 }
 0x943   :  { %2794 = vmatprep.subr.bf16.mxu0 %v6246_v27  ;;  %2835 = vmatprep.subr.bf16.mxu1 %v6247_v12  ;;  %v6272_v27 = vld [vmem:[#allocation80_spill] sm:$0xff] }
 0x946   :  { %2795 = vmatpush1.bf16.msra.mxu0 %v6260_v52  ;;  %2836 = vmatpush1.bf16.msra.mxu1 %v6249_v9  ;;  %v6273_v9 = vld [vmem:[#allocation83_spill] sm:$0xff] }
 0x947   :  { %2796 = vmatprep.subr.bf16.mxu0 %v6250_v21  ;;  %2837 = vmatprep.subr.bf16.mxu1 %v6251_v1 }
 0x94a   :  { %2797 = vmatpush1.bf16.msra.mxu0 %v6252_v63  ;;  %2838 = vmatpush1.bf16.msra.mxu1 %v6253_v5  ;;  %v483_v5 = vadd.f32 %v6268_v41, %v6267_v40 }
 0x94b   :  { %2798 = vmatprep.subr.bf16.mxu0 %v6254_v18  ;;  %2839 = vmatprep.subr.bf16.mxu1 %v6255_v48 }
 0x94e   :  { %2799 = vmatpush1.bf16.msra.mxu0 %v6256_v39  ;;  %2840 = vmatpush1.bf16.msra.mxu1 %v6257_v36 }
 0x9a4   :  { %v2576_v47 = vpop.f32.mrb[64].mxu0  ;;  %v2617_v18 = vpop.f32.mrb[64].mxu1 }
 0x9a5   :  { %v2739_v55 = vadd.f32 %v2576_v47, %v408_v16  ;;  %v2741_v48 = vadd.f32 %v2617_v18, %v481_v22  ;;  %v2578_v8 = vpop.f32.mrb[65].mxu0  ;;  %v2619_v39 = vpop.f32.mrb[65].mxu1 }
 0x9a6   :  { %v2740_v10 = vadd.f32 %v2578_v8, %v410_v42  ;;  %v2742_v49 = vadd.f32 %v2619_v39, %v483_v5  ;;  %v2580_v58 = vpop.f32.mrb[66].mxu0  ;;  %v2621_v57 = vpop.f32.mrb[66].mxu1  ;;  %v6274_v42 = vld [vmem:[#allocation76_spill] sm:$0xff]  ;;  %v3557_v39 = vmov 0.0  }
 0x9a7   :  { %v3173_v59 = vmul.f32 -1.442695, %v2739_v55  ;;  %v2581_v50 = vpop.f32.mrb[67].mxu0  ;;  %v2622_v38 = vpop.f32.mrb[67].mxu1  ;;  %v3240_v8 = vld [vmem:[%s5228_s5] sm:$0xff]   ;;  %3197 = vmatprep.subr.bf16.mxu0 %v3557_v39  ;;  %v3243_v58 = vld [vmem:[%s5228_s5 + $0x18] sm:$0xff]  }
 0x9a8   :  { %v3174_v26 = vmul.f32 -1.442695, %v2740_v10  ;;  %v3175_v34 = vmul.f32 -1.442695, %v2742_v49  ;;  %v3241_v10 = vld [vmem:[%s5228_s5 + $0x8] sm:$0xff]   ;;  %v3242_v49 = vld [vmem:[%s5228_s5 + $0x10] sm:$0xff]  }
 0x9a9   :  { %3456 = vpow2.f32 %v3173_v59  ;;  %v3244_v57 = vld [vmem:[%s5228_s5 + $0x20] sm:$0xff]   ;;  %v3245_v59 = vld [vmem:[%s5228_s5 + $0x28] sm:$0xff]   ;;  %v3246_v50 = vld [vmem:[%s5228_s5 + $0x30] sm:$0xff]  }
 0x9aa   :  { %3458 = vpow2.f32 %v3174_v26  ;;  %v3247_v38 = vld [vmem:[%s5228_s5 + $0x38] sm:$0xff]  }
 0x9ab   :  { %3460 = vpow2.f32 %v3175_v34 }
 0x9ac   :  { %3462 = vtanh.f32 %v2741_v48 }
 0x9b3   :  { %v3457_v45 = vpop.eup %3456 }
 0x9b4   :  { %v3459_v25 = vpop.eup %3458  ;;  %v2746_v15 = vadd.f32 1.0, %v3457_v45 }
 0x9b5   :  { %v2752_v28 = vadd.f32 1.0, %v3459_v25  ;;  %v3461_v61 = vpop.eup %3460 }
 0x9b6   :  { %3464 = vrcp.f32 %v2746_v15  ;;  %v3463_v54 = vpop.eup %3462  ;;  %v2759_v20 = vadd.f32 1.0, %v3461_v61 }
 0x9b7   :  { %3466 = vrcp.f32 %v2752_v28 }
 0x9b8   :  { %3468 = vrcp.f32 %v2759_v20 }
 0x9c0   :  { %v3465_v6 = vpop.eup %3464 }
 0x9c1   :  { %v3467_v31 = vpop.eup %3466  ;;  %v2763_v37 = vmul.f32 %v3465_v6, %v3463_v54 }
 0x9c2   :  { %v2762_v17 = vmul.f32 %v3467_v31, %v6269_v13  ;;  %v3469_v63 = vpop.eup %3468 }
 0x9c4   :  { %v2764_v36 = vadd.f32 %v2763_v37, %v2762_v17 }
 0x9c6   :  { %3470 = vtanh.f32 %v2764_v36 }
 0x9d0   :  { %v3471_v30 = vpop.eup %3470 }
 0x9d1   :  { %v2766_v14 = vmul.f32 %v3471_v30, %v3469_v63 }
 0x9d3   :  { %v2767_v48 = vpack.c.bf16 %v2766_v14, %v2766_v14 }
 0x9e4   :  { %v2658_v29 = vpop.f32.mrb[68].mxu0  ;;  %v2699_v24 = vpop.f32.mrb[68].mxu1 }
 0x9e5   :  { %v2706_v11 = vadd.f32 %v2658_v29, %v6270_v0  ;;  %v2660_v44 = vpop.f32.mrb[69].mxu0  ;;  %v2701_v56 = vpop.f32.mrb[69].mxu1  ;;  %v2708_v21 = vadd.f32 %v2699_v24, %v6273_v9 }
 0x9e6   :  { %v2707_v3 = vadd.f32 %v2660_v44, %v6271_v35  ;;  %v2662_v33 = vpop.f32.mrb[70].mxu0  ;;  %v2703_v4 = vpop.f32.mrb[70].mxu1  ;;  %v2709_v12 = vadd.f32 %v2701_v56, %v6272_v27 }
 0x9e7   :  { %v3170_v46 = vmul.f32 -1.442695, %v2706_v11  ;;  %v2663_v7 = vpop.f32.mrb[71].mxu0  ;;  %v2704_v53 = vpop.f32.mrb[71].mxu1 }
 0x9e8   :  { %v3171_v43 = vmul.f32 -1.442695, %v2707_v3  ;;  %v3172_v51 = vmul.f32 -1.442695, %v2709_v12 }
 0x9e9   :  { %3472 = vpow2.f32 %v3170_v46 }
 0x9ea   :  { %3474 = vpow2.f32 %v3171_v43  ;;  %v3179_v43 = vld [vmem:[%s5229_s6] ss:$0 sm:$0xff] }
 0x9eb   :  { %3476 = vpow2.f32 %v3172_v51 }
 0x9ec   :  { %3478 = vtanh.f32 %v2708_v21 }
 0x9f3   :  { %v3473_v1 = vpop.eup %3472 }
 0x9f4   :  { %v3475_v52 = vpop.eup %3474  ;;  %v2713_v19 = vadd.f32 1.0, %v3473_v1 }
 0x9f5   :  { %v2719_v32 = vadd.f32 1.0, %v3475_v52  ;;  %v3477_v16 = vpop.eup %3476 }
 0x9f6   :  { %3480 = vrcp.f32 %v2713_v19  ;;  %v3479_v60 = vpop.eup %3478  ;;  %v2726_v2 = vadd.f32 1.0, %v3477_v16 }
 0x9f7   :  { %3482 = vrcp.f32 %v2719_v32 }
 0x9f8   :  { %3484 = vrcp.f32 %v2726_v2 }
 0xa00   :  { %v3481_v23 = vpop.eup %3480 }
 0xa01   :  { %v3483_v22 = vpop.eup %3482  ;;  %v2730_v62 = vmul.f32 %v3481_v23, %v3479_v60 }
 0xa02   :  { %v2729_v40 = vmul.f32 %v3483_v22, %v6274_v42  ;;  %v3485_v5 = vpop.eup %3484 }
 0xa04   :  { %v5185_v41 = vadd.f32 %v2730_v62, %v2729_v40 }
 0xa06   :  { %3486 = vtanh.f32 %v5185_v41 }
 0xa10   :  { %v3487_v47 = vpop.eup %3486 }
 0xa11   :  { %v2733_v18 = vmul.f32 %v3487_v47, %v3485_v5 }
 0xa13   :  { %v2734_v55 = vpack.c.bf16 %v2733_v18, %v2733_v18 }
 0xa15   :  { %2800 = vmatprep.mubr.bf16.mxu0 %v2734_v55  ;;  %2841 = vmatprep.mubr.bf16.mxu1 %v2734_v55 }
 0xa16   :  { %2801 = vmatmul.mubr.bf16.vlgmr.msra.gmra.mrb[72].mxu0 %v2767_v48  ;;  %2842 = vmatmul.mubr.bf16.vlgmr.msra.gmra.mrb[72].mxu1 %v2767_v48 }
 0xa17   :  { %3198 = vmatpush3.bf16.msra.mxu0 %v3240_v8  ;;  %3213 = vmatprep.mubr.msk.bf16.mxu0 %vm3558_vm2, %v3557_v39 }
 0xa18   :  { %3199 = vmatprep.subr.bf16.mxu0 %v3557_v39 }
 0xa1b   :  { %3200 = vmatpush3.bf16.msra.mxu0 %v3241_v10 }
 0xa1c   :  { %3201 = vmatprep.subr.bf16.mxu0 %v3557_v39 }
 0xa1f   :  { %3202 = vmatpush3.bf16.msra.mxu0 %v3242_v49 }
 0xa20   :  { %3203 = vmatprep.subr.bf16.mxu0 %v3557_v39 }
 0xa23   :  { %3204 = vmatpush3.bf16.msra.mxu0 %v3243_v58 }
 0xa24   :  { %3205 = vmatprep.subr.bf16.mxu0 %v3557_v39 }
 0xa27   :  { %3206 = vmatpush3.bf16.msra.mxu0 %v3244_v57 }
 0xa28   :  { %3207 = vmatprep.subr.bf16.mxu0 %v3557_v39 }
 0xa2b   :  { %3208 = vmatpush3.bf16.msra.mxu0 %v3245_v59 }
 0xa2c   :  { %3209 = vmatprep.subr.bf16.mxu0 %v3557_v39 }
 0xa2f   :  { %3210 = vmatpush3.bf16.msra.mxu0 %v3246_v50 }
 0xa30   :  { %3211 = vmatprep.subr.bf16.mxu0 %v3557_v39 }
 0xa33   :  { %3212 = vmatpush3.bf16.msra.mxu0 %v3247_v38 }
 0xae9   :  { %v2802_v26 = vpop.f32.mrb[72].mxu0  ;;  %v2843_v34 = vpop.f32.mrb[72].mxu1 }
 0xaea   :  { %v2850_v45 = vadd.f32 %v2802_v26, %v6270_v0  ;;  %v2804_v25 = vpop.f32.mrb[73].mxu0  ;;  %v2845_v15 = vpop.f32.mrb[73].mxu1  ;;  %v2852_v36 = vadd.f32 %v2843_v34, %v6273_v9 }
 0xaeb   :  { %v2851_v28 = vadd.f32 %v2804_v25, %v6271_v35  ;;  %v2806_v61 = vpop.f32.mrb[74].mxu0  ;;  %v2847_v54 = vpop.f32.mrb[74].mxu1  ;;  %v2853_v13 = vadd.f32 %v2845_v15, %v6272_v27 }
 0xaec   :  { %v3176_v6 = vmul.f32 -1.442695, %v2850_v45  ;;  %v2807_v31 = vpop.f32.mrb[75].mxu0  ;;  %v2848_v37 = vpop.f32.mrb[75].mxu1 }
 0xaed   :  { %v3177_v20 = vmul.f32 -1.442695, %v2851_v28  ;;  %v3178_v17 = vmul.f32 -1.442695, %v2853_v13 }
 0xaee   :  { %3488 = vpow2.f32 %v3176_v6 }
 0xaef   :  { %3490 = vpow2.f32 %v3177_v20 }
 0xaf0   :  { %3492 = vpow2.f32 %v3178_v17 }
 0xaf1   :  { %3494 = vtanh.f32 %v2852_v36 }
 0xaf8   :  { %v3489_v63 = vpop.eup %3488 }
 0xaf9   :  { %v3491_v30 = vpop.eup %3490  ;;  %v2857_v14 = vadd.f32 1.0, %v3489_v63 }
 0xafa   :  { %v2863_v29 = vadd.f32 1.0, %v3491_v30  ;;  %v3493_v24 = vpop.eup %3492 }
 0xafb   :  { %3496 = vrcp.f32 %v2857_v14  ;;  %v3495_v0 = vpop.eup %3494  ;;  %v2870_v35 = vadd.f32 1.0, %v3493_v24 }
 0xafc   :  { %3498 = vrcp.f32 %v2863_v29 }
 0xafd   :  { %3500 = vrcp.f32 %v2870_v35 }
 0xb05   :  { %v3497_v11 = vpop.eup %3496 }
 0xb06   :  { %v3499_v44 = vpop.eup %3498  ;;  %v2874_v56 = vmul.f32 %v3497_v11, %v3495_v0 }
 0xb07   :  { %v2873_v3 = vmul.f32 %v3499_v44, %v5185_v41  ;;  %v3501_v4 = vpop.eup %3500 }
 0xb09   :  { %v2875_v33 = vadd.f32 %v2874_v56, %v2873_v3 }
 0xb0b   :  { %3502 = vtanh.f32 %v2875_v33 }
 0xb15   :  { %v3503_v46 = vpop.eup %3502 }
 0xb16   :  { %v2877_v7 = vmul.f32 %v3503_v46, %v3501_v4 }
 0xb18   :  { %v2878_v53 = vpack.c.bf16 %v2877_v7, %v2877_v7 }
 0xb1a   :  { %3214 = vmatmul.mubr.bf16.vlgmr.msra.gmra.mrb[76].mxu0 %v2878_v53 }
 0xbed   :  { %v2968_v27 = vpop.f32.mrb[76].mxu0 }
 0xbee   :  { %v2969_v12 = vadd.f32 %v3179_v43, %v2968_v27  ;;  %v3215_v51 = vpop.f32.mrb[77].mxu0 }
 0xbef   :  { %v2971_v9 = vpop.f32.mrb[78].mxu0 }
 0xbf0   :  { %2974 = vst [vmem:[%s5230_s7] sm:$0xff] %v2969_v12  ;;  %v3216_v21 = vpop.f32.mrb[79].mxu0 }
 0xbf1   :  { %2979 = vsyncpa [#allocation4], 1 }
 0xbf2   :  { %2980 = vsyncpa [#allocation6], 1 }

</bundles_post_ra>
